<compile_context>
chip_gen: v7x
topology: tpu7x:2x2x1
jax: 0.10.0
libtpu: 0.0.40
codegen_flags: <defaults>
</compile_context>

<pallas_src>
import jax
import jax.numpy as jnp
from jax.experimental import pallas as pl
from jax.experimental.pallas import tpu as pltpu


def _bf16(x):
    return x.astype(jnp.bfloat16)


def _pick_row_block(n):
    for rb in (512, 256, 128, 64, 32, 16, 8):
        if rb <= n and n % rb == 0:
            return rb
    return n


def _vmem_limit(arrays):
    """Heuristic scoped-VMEM limit from the (over-estimated) resident set."""
    total = sum(int(a.size) * a.dtype.itemsize for a in arrays)
    return max(32 << 20, min(64 << 20, 2 * total + (8 << 20)))


# ------------------------------ generic GEMM ----------------------------------

def _linear_kernel(x_ref, w_ref, b_ref, o_ref):
    x = x_ref[...].astype(w_ref.dtype)          # cast fused in VMEM (no HBM pass)
    acc = jnp.dot(x, w_ref[...], preferred_element_type=jnp.float32) + b_ref[...]
    o_ref[...] = acc.astype(o_ref.dtype)


def linear(x, w, b, out_dtype=jnp.float32):
    """Row-tiled GEMM y = x @ w + b. w is bf16; x is cast inside the kernel."""
    n, d_in = x.shape
    d_out = w.shape[1]
    rb = _pick_row_block(n)
    return pl.pallas_call(
        _linear_kernel,
        grid=(n // rb,),
        in_specs=[pl.BlockSpec((rb, d_in), lambda i: (i, 0)),
                  pl.BlockSpec((d_in, d_out), lambda i: (0, 0)),
                  pl.BlockSpec((1, d_out), lambda i: (0, 0))],
        out_specs=pl.BlockSpec((rb, d_out), lambda i: (i, 0)),
        out_shape=jax.ShapeDtypeStruct((n, d_out), out_dtype),
        compiler_params=pltpu.CompilerParams(
            dimension_semantics=("parallel",),
            vmem_limit_bytes=_vmem_limit([x, w, b])),
    )(x, w, b.reshape(1, d_out).astype(jnp.float32))


# ------------------------- fused bidirectional encoder ------------------------

def _lstm_gate_math(gates, c_prev, H):
    i = jax.nn.sigmoid(gates[:, 0:H])
    f = jax.nn.sigmoid(gates[:, H:2 * H])
    g = jnp.tanh(gates[:, 2 * H:3 * H])
    o = jax.nn.sigmoid(gates[:, 3 * H:4 * H])
    c_new = f * c_prev + i * g
    h_new = o * jnp.tanh(c_new)
    return h_new, c_new


def _enc_bilstm_kernel(gxf_ref, gxb_ref, whhf_ref, whhb_ref,
                       outf_ref, outb_ref, hf_ref, cf_ref, hb_ref, cb_ref):
    j = pl.program_id(0)
    Tc = gxf_ref.shape[0]
    H = whhf_ref.shape[0]

    @pl.when(j == 0)
    def _():
        hf_ref[...] = jnp.zeros_like(hf_ref)
        cf_ref[...] = jnp.zeros_like(cf_ref)
        hb_ref[...] = jnp.zeros_like(hb_ref)
        cb_ref[...] = jnp.zeros_like(cb_ref)

    whh_f = whhf_ref[...]
    whh_b = whhb_ref[...]
    hf, cf = hf_ref[...], cf_ref[...]
    hb, cb = hb_ref[...], cb_ref[...]
    # Fully-unrolled chunk of Tc recurrence steps per grid iteration amortizes
    # the per-grid-step pipeline overhead (~0.35 us) over Tc tiny matmuls.
    for i in range(Tc):
        gates_f = gxf_ref[i] + jnp.dot(hf.astype(jnp.bfloat16), whh_f,
                                       preferred_element_type=jnp.float32)
        hf, cf = _lstm_gate_math(gates_f, cf, H)
        outf_ref[i] = hf
        gates_b = gxb_ref[Tc - 1 - i] + jnp.dot(hb.astype(jnp.bfloat16), whh_b,
                                                preferred_element_type=jnp.float32)
        hb, cb = _lstm_gate_math(gates_b, cb, H)
        outb_ref[Tc - 1 - i] = hb
    hf_ref[...] = hf
    cf_ref[...] = cf
    hb_ref[...] = hb
    cb_ref[...] = cb


def encoder_bilstm(gx_f, gx_b, whh_f, whh_b, chunk=8):
    """gx_*: [S,B,4H] precomputed x@W_ih+b (time-major). Returns per-step outputs
    + final (h, c) for each direction."""
    S, B, H4 = gx_f.shape
    H = H4 // 4
    Tc = min(chunk, S)
    while S % Tc != 0:
        Tc -= 1
    nc = S // Tc
    state = jax.ShapeDtypeStruct((B, H), jnp.float32)
    seq = jax.ShapeDtypeStruct((S, B, H), jnp.float32)
    st_spec = pl.BlockSpec((B, H), lambda j: (0, 0))
    # TODO(synk): on v7x the two directions could run on separate TensorCores
    # (leading parallel grid axis of size 2); kept fused for v5e/v6e (1 TC).
    return pl.pallas_call(
        _enc_bilstm_kernel,
        grid=(nc,),
        in_specs=[pl.BlockSpec((Tc, B, H4), lambda j: (j, 0, 0)),
                  pl.BlockSpec((Tc, B, H4), lambda j: (nc - 1 - j, 0, 0)),
                  pl.BlockSpec((H, H4), lambda j: (0, 0)),
                  pl.BlockSpec((H, H4), lambda j: (0, 0))],
        out_specs=(pl.BlockSpec((Tc, B, H), lambda j: (j, 0, 0)),
                   pl.BlockSpec((Tc, B, H), lambda j: (nc - 1 - j, 0, 0)),
                   st_spec, st_spec, st_spec, st_spec),
        out_shape=(seq, seq, state, state, state, state),
        compiler_params=pltpu.CompilerParams(
            dimension_semantics=("arbitrary",),
            vmem_limit_bytes=_vmem_limit([gx_f, gx_b, whh_f, whh_b])),
    )(gx_f, gx_b, whh_f, whh_b)


# ------------------------------ fused decoder ---------------------------------

def _decoder_kernel(gx_ref, pgx_ref, h0_ref, c0_ref, whh_ref,
                    encf_ref, encs_ref, v_ref, mask_ref,
                    ws_h_ref, ws_c_ref, ws_b_ref,
                    wout_h_ref, wout_ctx_ref, wout_b_ref,
                    out_ref, attn_ref, pgen_ref,
                    h_state, c_state):
    t = pl.program_id(0)
    H = whh_ref.shape[0]

    @pl.when(t == 0)
    def _():
        h_state[...] = h0_ref[...]
        c_state[...] = c0_ref[...]

    # ---- LSTM cell: only the recurrent h @ W_hh matmul lives in the loop ----
    gates = gx_ref[0] + jnp.dot(h_state[...].astype(jnp.bfloat16), whh_ref[...],
                                preferred_element_type=jnp.float32)
    h_new, c_new = _lstm_gate_math(gates, c_state[...], H)
    h_state[...] = h_new
    c_state[...] = c_new
    h_bf = h_new.astype(jnp.bfloat16)
    c_bf = c_new.astype(jnp.bfloat16)

    # ---- attention features W_s([h, c]); last column = folded p_gen c-part ----
    df_ext = (jnp.dot(h_bf, ws_h_ref[...], preferred_element_type=jnp.float32)
              + jnp.dot(c_bf, ws_c_ref[...], preferred_element_type=jnp.float32)
              + ws_b_ref[...])                                    # [B, H+1]
    dec_feat = df_ext[:, :H]
    pgen_c = df_ext[:, H:H + 1]

    feats = jnp.tanh(encf_ref[...] + dec_feat[:, None, :])        # [B, S, H]
    e = jnp.sum(v_ref[...][None, :, :] * feats, axis=-1)          # [B, S]

    # masked softmax over S: exp -> mask -> single EXACT normalization
    e = e - jnp.max(e, axis=1, keepdims=True)
    a = jnp.exp(e) * mask_ref[...]
    a = a / jnp.maximum(jnp.sum(a, axis=1, keepdims=True), 1e-9)

    # context vector on the VPU/XLU (a q=1 MXU matvec would waste the array)
    ctx = jnp.sum(a[:, :, None] * encs_ref[...], axis=1)          # [B, 2H] f32

    # ---- W_out([h, ctx]); last column = folded p_gen h/ctx parts ----
    out_ext = (jnp.dot(h_bf, wout_h_ref[...], preferred_element_type=jnp.float32)
               + jnp.dot(ctx.astype(jnp.bfloat16), wout_ctx_ref[...],
                         preferred_element_type=jnp.float32)
               + wout_b_ref[...])                                  # [B, H+1]

    out_ref[0] = out_ext[:, :H]
    attn_ref[0] = a
    pgen_ref[0] = jax.nn.sigmoid(out_ext[:, H:H + 1] + pgen_c + pgx_ref[0])


def decoder_forward(gx_all, pgx_all, h0, c0, whh, enc_feat, enc_states, v, mask,
                    ws_h, ws_c, ws_b, wout_h, wout_ctx, wout_b):
    T, B, _ = gx_all.shape
    H = whh.shape[0]
    S = enc_feat.shape[1]

    def step_spec(arr):
        nd = arr.ndim
        return pl.BlockSpec((1,) + arr.shape[1:],
                            lambda t, nd=nd: (t,) + (0,) * (nd - 1))

    def const_spec(arr):
        nd = arr.ndim
        return pl.BlockSpec(arr.shape, lambda t, nd=nd: (0,) * nd)

    consts = (h0, c0, whh, enc_feat, enc_states, v, mask,
              ws_h, ws_c, ws_b, wout_h, wout_ctx, wout_b)

    return pl.pallas_call(
        _decoder_kernel,
        grid=(T,),
        in_specs=[step_spec(gx_all), step_spec(pgx_all)]
                 + [const_spec(a) for a in consts],
        out_specs=(pl.BlockSpec((1, B, H), lambda t: (t, 0, 0)),
                   pl.BlockSpec((1, B, S), lambda t: (t, 0, 0)),
                   pl.BlockSpec((1, B, 1), lambda t: (t, 0, 0))),
        out_shape=(jax.ShapeDtypeStruct((T, B, H), jnp.float32),
                   jax.ShapeDtypeStruct((T, B, S), jnp.float32),
                   jax.ShapeDtypeStruct((T, B, 1), jnp.float32)),
        scratch_shapes=[pltpu.VMEM((B, H), jnp.float32),
                        pltpu.VMEM((B, H), jnp.float32)],
        compiler_params=pltpu.CompilerParams(
            dimension_semantics=("arbitrary",),
            vmem_limit_bytes=_vmem_limit(list(consts) + [gx_all, pgx_all])),
    )(gx_all, pgx_all, *consts)


# ------------------ hoisted vocab projection + softmax + p_gen scale ----------

def _vocab_pointer_kernel(out_ref, pgen_ref, w_ref, b_ref, o_ref):
    V = w_ref.shape[1]
    logits = (jnp.dot(out_ref[...].astype(jnp.bfloat16), w_ref[...],
                      preferred_element_type=jnp.float32) + b_ref[...])
    logits = logits - jnp.max(logits, axis=1, keepdims=True)
    ev = jnp.exp(logits)
    vocab_dist = ev / jnp.sum(ev, axis=1, keepdims=True)     # exact normalize
    gen = pgen_ref[...] * vocab_dist                          # p_gen * P_vocab
    n_oov = o_ref.shape[1] - V
    if n_oov > 0:                                             # zero-pad to Vext
        gen = jnp.concatenate(
            [gen, jnp.zeros((gen.shape[0], n_oov), gen.dtype)], axis=1)
    o_ref[...] = gen


def vocab_pointer_base(dec_out, p_gen, proj_w, proj_b, n_extra):
    """dec_out: [N,H] f32 (all decode steps stacked), p_gen: [N,1].
    Returns [N, V+n_extra] with p_gen * softmax(dec_out @ proj_w + b) in the
    first V columns and zeros elsewhere."""
    # TODO(synk): for production V (~50k), add a 256-aligned V-tile grid axis
    # with an online softmax instead of keeping the full [H,V] weight tile.
    N, H = dec_out.shape
    V = proj_w.shape[1]
    Vext = V + n_extra
    rb = _pick_row_block(N)
    return pl.pallas_call(
        _vocab_pointer_kernel,
        grid=(N // rb,),
        in_specs=[pl.BlockSpec((rb, H), lambda i: (i, 0)),
                  pl.BlockSpec((rb, 1), lambda i: (i, 0)),
                  pl.BlockSpec((H, V), lambda i: (0, 0)),
                  pl.BlockSpec((1, V), lambda i: (0, 0))],
        out_specs=pl.BlockSpec((rb, Vext), lambda i: (i, 0)),
        out_shape=jax.ShapeDtypeStruct((N, Vext), jnp.float32),
        compiler_params=pltpu.CompilerParams(
            dimension_semantics=("parallel",),
            vmem_limit_bytes=_vmem_limit([dec_out, p_gen, proj_w, proj_b])),
    )(dec_out, p_gen, proj_w, proj_b.reshape(1, V))


# -------------------------------- parameters ----------------------------------

def init_params(key, vocab_size, embed_dim, hidden_dim):
    E, H, V = embed_dim, hidden_dim, vocab_size
    ks = iter(jax.random.split(key, 32))

    def nrm(shape, s=0.1):
        return (s * jax.random.normal(next(ks), shape)).astype(jnp.float32)

    p = {}
    p['embedding'] = nrm((V, E), 1.0)
    # bidirectional encoder LSTM (forward / backward directions)
    p['enc_wih_f'] = nrm((E, 4 * H)); p['enc_whh_f'] = nrm((H, 4 * H)); p['enc_b_f'] = nrm((4 * H,))
    p['enc_wih_b'] = nrm((E, 4 * H)); p['enc_whh_b'] = nrm((H, 4 * H)); p['enc_b_b'] = nrm((4 * H,))
    # reduce_state
    p['reduce_c_w'] = nrm((2 * H, H)); p['reduce_c_b'] = nrm((H,))
    p['reduce_h_w'] = nrm((2 * H, H)); p['reduce_h_b'] = nrm((H,))
    # attention decoder
    p['W_s_w'] = nrm((2 * H, H));          p['W_s_b'] = nrm((H,))
    p['input2x_w'] = nrm((E + 2 * H, E));  p['input2x_b'] = nrm((E,))
    p['W_p_gen_w'] = nrm((4 * H + E, 1));  p['W_p_gen_b'] = nrm((1,))
    p['W_out_w'] = nrm((3 * H, H));        p['W_out_b'] = nrm((H,))
    p['W_h_w'] = nrm((2 * H, H));          p['W_h_b'] = nrm((H,))   # 1x1 conv == matmul
    p['v'] = jax.random.uniform(next(ks), (H,), dtype=jnp.float32)
    p['dec_wih'] = nrm((E, 4 * H)); p['dec_whh'] = nrm((H, 4 * H)); p['dec_b'] = nrm((4 * H,))
    p['out_proj_w'] = nrm((H, V)); p['out_proj_b'] = nrm((V,))
    return p


# ------------------------------- forward pass ---------------------------------

def run_model(params, enc_batch, dec_batch, enc_padding_mask,
              enc_batch_extend_vocab, max_art_oovs):
    B, S = enc_batch.shape
    T = dec_batch.shape[1]
    E = params['embedding'].shape[1]
    H = params['reduce_c_w'].shape[1]
    V = params['out_proj_w'].shape[1]
    Vext = V + max_art_oovs

    # glue: time-major embedding gathers (no reshape/transpose passes later)
    emb_enc = params['embedding'][enc_batch.T]                     # [S,B,E]
    emb_dec = params['embedding'][dec_batch.T]                     # [T,B,E]

    # ---- encoder: x @ W_ih hoisted into one row-tiled GEMM per direction ----
    enc_x = emb_enc.reshape(S * B, E)
    gx_f = linear(enc_x, _bf16(params['enc_wih_f']),
                  params['enc_b_f']).reshape(S, B, 4 * H)
    gx_b = linear(enc_x, _bf16(params['enc_wih_b']),
                  params['enc_b_b']).reshape(S, B, 4 * H)

    out_f, out_b, h_f, c_f, h_b, c_b = encoder_bilstm(
        gx_f, gx_b, _bf16(params['enc_whh_f']), _bf16(params['enc_whh_b']))
    encoder_states = jnp.concatenate([out_f, out_b], axis=-1).transpose(1, 0, 2)  # [B,S,2H]

    new_c = linear(jnp.concatenate([c_f, c_b], -1),
                   _bf16(params['reduce_c_w']), params['reduce_c_b'])
    new_h = linear(jnp.concatenate([h_f, h_b], -1),
                   _bf16(params['reduce_h_w']), params['reduce_h_b'])

    # encoder_features = W_h (1x1 conv over 2H channels) == channels-last matmul
    enc_feat = linear(encoder_states.reshape(B * S, 2 * H),
                      _bf16(params['W_h_w']), params['W_h_b']).reshape(B, S, H)

    # ---- decoder hoisted projections.  With initial_state_attention=False the
    # reference rebuilds a ZERO context before input2x every step, so only the
    # first E rows of input2x_w contribute (no zero-padded concat needed).
    x_flat = linear(emb_dec.reshape(T * B, E), _bf16(params['input2x_w'][:E]),
                    params['input2x_b'], out_dtype=jnp.bfloat16)   # [T*B, E]
    # Fold the p_gen x-column (and its bias) into the gate GEMM as an extra col.
    wpg = params['W_p_gen_w']            # rows: [ctx(2H) | h(H) | c(H) | x(E)]
    gate_w = jnp.concatenate([params['dec_wih'], wpg[4 * H:]], axis=1)   # [E,4H+1]
    gate_b = jnp.concatenate([params['dec_b'], params['W_p_gen_b']])
    gxp = linear(x_flat, _bf16(gate_w), gate_b)                    # [T*B, 4H+1]
    gx_all = gxp[:, :4 * H].reshape(T, B, 4 * H)
    pgx_all = gxp[:, 4 * H:].reshape(T, B, 1)

    # Fold the remaining p_gen columns into W_s (c part) and W_out (h/ctx parts)
    ws = params['W_s_w']                 # rows: [h(H) | c(H)]
    ws_h = jnp.concatenate([ws[:H], jnp.zeros((H, 1), ws.dtype)], axis=1)
    ws_c = jnp.concatenate([ws[H:], wpg[3 * H:4 * H]], axis=1)
    ws_b = jnp.concatenate([params['W_s_b'],
                            jnp.zeros((1,), ws.dtype)]).reshape(1, H + 1)
    wo = params['W_out_w']               # rows: [h(H) | ctx(2H)]
    wout_h = jnp.concatenate([wo[:H], wpg[2 * H:3 * H]], axis=1)
    wout_ctx = jnp.concatenate([wo[H:], wpg[:2 * H]], axis=1)
    wout_b = jnp.concatenate([params['W_out_b'],
                              jnp.zeros((1,), wo.dtype)]).reshape(1, H + 1)

    dec_out, attn_all, pgen_all = decoder_forward(
        gx_all, pgx_all, new_h, new_c, _bf16(params['dec_whh']),
        enc_feat, encoder_states, params['v'].reshape(1, H),
        enc_padding_mask.astype(jnp.float32),
        _bf16(ws_h), _bf16(ws_c), ws_b,
        _bf16(wout_h), _bf16(wout_ctx), wout_b)

    # ---- vocab projection + softmax hoisted out of the recurrence (all T*B rows
    # at once); the kernel pre-scales by p_gen and zero-pads to the extended vocab.
    base = vocab_pointer_base(
        dec_out.reshape(T * B, H), pgen_all.reshape(T * B, 1),
        _bf16(params['out_proj_w']), params['out_proj_b'],
        max_art_oovs).reshape(T, B, Vext)

    # glue: scatter the (1 - p_gen)-scaled attention mass onto extended-vocab
    # ids; positions holding token id 1 contribute nothing (reference drops id 1).
    ids = jnp.broadcast_to(enc_batch_extend_vocab[None, :, :], (T, B, S))
    copy_mass = jnp.where(ids == 1, 0.0, (1.0 - pgen_all) * attn_all)
    t_idx = jnp.arange(T)[:, None, None]
    b_idx = jnp.arange(B)[None, :, None]
    final_all = base.at[t_idx, b_idx, ids].add(copy_mass)          # [T,B,Vext]

    # TODO(synk): pad B/S/Vext to sublane/lane multiples (8 / 128) for production
    # shapes; left unpadded here at demo sizes.
    final_dists = [final_all[i] for i in range(T)]
    attn_dists = [attn_all[i] for i in range(T)]
    return final_dists, attn_dists


# ----------------------------------- main --------------------------------------

if __name__ == "__main__":
    key = jax.random.PRNGKey(0)
    vocab_size, embed_dim, hidden_dim = 50, 16, 16
    B, S, T, max_art_oovs = 2, 8, 4, 3

    k1, k2, k3, kp = jax.random.split(key, 4)
    params = init_params(kp, vocab_size, embed_dim, hidden_dim)

    enc_batch = jax.random.randint(k1, (B, S), 0, vocab_size)
    dec_batch = jax.random.randint(k2, (B, T), 0, vocab_size)
    # extended-vocab ids avoid token id 1 (whose copy mass the reference drops)
    enc_batch_extend_vocab = jax.random.randint(
        k3, (B, S), 2, vocab_size + max_art_oovs)
    enc_padding_mask = jnp.ones((B, S), jnp.float32).at[1, 6:].set(0.0)

    fwd = jax.jit(run_model, static_argnames=("max_art_oovs",))
    final_dists, attn_dists = fwd(params, enc_batch, dec_batch, enc_padding_mask,
                                  enc_batch_extend_vocab,
                                  max_art_oovs=max_art_oovs)
    jax.block_until_ready(final_dists)
    jax.block_until_ready(attn_dists)

    assert len(final_dists) == T and len(attn_dists) == T
    assert final_dists[0].shape == (B, vocab_size + max_art_oovs)
    assert attn_dists[0].shape == (B, S)
    assert all(bool(jnp.all(jnp.isfinite(d))) for d in final_dists)
    sums = jnp.stack([jnp.sum(d, axis=-1) for d in final_dists])
    assert bool(jnp.all(jnp.abs(sums - 1.0) < 1e-3))   # exact final normalizations
    attn_sums = jnp.stack([jnp.sum(a, axis=-1) for a in attn_dists])
    assert bool(jnp.all(jnp.abs(attn_sums - 1.0) < 1e-3))
    print("KERNEL_OK")
</pallas_src>

<mosaic_0001>
module attributes {stable_mosaic.version = 11 : i64} {
  func.func private @main(%arg0: i32) attributes {dimension_semantics = [#tpu.dimension_semantics<core_parallel>], iteration_bounds = array<i64: 2>, tpu.core_type = #tpu.core_type<sc_scalar_subcore>, window_params = []} {
    return
  }
}

module attributes {stable_mosaic.version = 11 : i64} {
  func.func private @main(%arg0: i32) attributes {dimension_semantics = [#tpu.dimension_semantics<core_parallel>], iteration_bounds = array<i64: 2>, tpu.core_type = #tpu.core_type<sc_scalar_subcore>, window_params = []} {
    return
  }
}

module attributes {stable_mosaic.version = 11 : i64} {
  func.func @_linear_kernel(%arg0: i32, %arg1: memref<8x16xf32, #tpu.memory_space<vmem>>, %arg2: memref<16x16xbf16, #tpu.memory_space<vmem>>, %arg3: memref<1x16xf32, #tpu.memory_space<vmem>>, %arg4: memref<8x16xbf16, #tpu.memory_space<vmem>>) attributes {dimension_semantics = [#tpu.dimension_semantics<parallel>], iteration_bounds = array<i64: 1>, scalar_prefetch = 0 : i64, scratch_operands = 0 : i64, tpu.core_type = #tpu.core_type<tc>, window_params = [{transform_indices = @transform_0, window_bounds = array<i64: 8, 16>}, {pipeline_mode = #tpu.pipeline_mode<synchronous>, transform_indices = @transform_1, window_bounds = array<i64: 16, 16>}, {pipeline_mode = #tpu.pipeline_mode<synchronous>, transform_indices = @transform_2, window_bounds = array<i64: 1, 16>}, {transform_indices = @transform_3, window_bounds = array<i64: 8, 16>}]} {
    %c0 = arith.constant 0 : index
    %c0_0 = arith.constant 0 : index
    %0 = vector.load %arg1[%c0, %c0_0] : memref<8x16xf32, #tpu.memory_space<vmem>>, vector<8x16xf32>
    %1 = arith.truncf %0 : vector<8x16xf32> to vector<8x16xbf16>
    %c0_1 = arith.constant 0 : index
    %c0_2 = arith.constant 0 : index
    %2 = vector.load %arg2[%c0_1, %c0_2] : memref<16x16xbf16, #tpu.memory_space<vmem>>, vector<16x16xbf16>
    %cst = arith.constant dense<0.000000e+00> : vector<8x16xf32>
    %3 = tpu.matmul %1, %2, %cst {dimension_numbers = #tpu.dot_dimension_numbers<[1], [0], [0], [1], [0, 0, 1, 1], [], []>} : vector<8x16xbf16>, vector<16x16xbf16>, vector<8x16xf32> -> vector<8x16xf32>
    %c0_3 = arith.constant 0 : index
    %c0_4 = arith.constant 0 : index
    %4 = vector.load %arg3[%c0_3, %c0_4] : memref<1x16xf32, #tpu.memory_space<vmem>>, vector<1x16xf32>
    %5 = vector.broadcast %4 : vector<1x16xf32> to vector<8x16xf32>
    %6 = arith.addf %3, %5 : vector<8x16xf32>
    %7 = arith.truncf %6 : vector<8x16xf32> to vector<8x16xbf16>
    %c0_5 = arith.constant 0 : index
    %c0_6 = arith.constant 0 : index
    %8 = vector.load %arg4[%c0_5, %c0_6] : memref<8x16xbf16, #tpu.memory_space<vmem>>, vector<8x16xbf16>
    tpu.vector_store %arg4[%c0_5, %c0_6], %7 {strides = array<i32>} : memref<8x16xbf16, #tpu.memory_space<vmem>>, vector<8x16xbf16>,
    return
  }
  func.func @transform_0(%arg0: i32) -> (i32, i32) {
    %c0_i32 = arith.constant 0 : i32
    %c0_i32_0 = arith.constant 0 : i32
    return %arg0, %c0_i32 : i32, i32
  }
  func.func @transform_1(%arg0: i32) -> (i32, i32) {
    %c0_i32 = arith.constant 0 : i32
    %c0_i32_0 = arith.constant 0 : i32
    %c0_i32_1 = arith.constant 0 : i32
    return %c0_i32, %c0_i32_0 : i32, i32
  }
  func.func @transform_2(%arg0: i32) -> (i32, i32) {
    %c0_i32 = arith.constant 0 : i32
    %c0_i32_0 = arith.constant 0 : i32
    %c0_i32_1 = arith.constant 0 : i32
    return %c0_i32, %c0_i32_0 : i32, i32
  }
  func.func @transform_3(%arg0: i32) -> (i32, i32) {
    %c0_i32 = arith.constant 0 : i32
    %c0_i32_0 = arith.constant 0 : i32
    return %arg0, %c0_i32 : i32, i32
  }
}

module attributes {stable_mosaic.version = 11 : i64} {
  func.func @_linear_kernel(%arg0: i32, %arg1: memref<8x16xbf16, #tpu.memory_space<vmem>>, %arg2: memref<16x65xbf16, #tpu.memory_space<vmem>>, %arg3: memref<1x65xf32, #tpu.memory_space<vmem>>, %arg4: memref<8x65xf32, #tpu.memory_space<vmem>>) attributes {dimension_semantics = [#tpu.dimension_semantics<parallel>], iteration_bounds = array<i64: 1>, scalar_prefetch = 0 : i64, scratch_operands = 0 : i64, tpu.core_type = #tpu.core_type<tc>, window_params = [{transform_indices = @transform_0, window_bounds = array<i64: 8, 16>}, {pipeline_mode = #tpu.pipeline_mode<synchronous>, transform_indices = @transform_1, window_bounds = array<i64: 16, 65>}, {pipeline_mode = #tpu.pipeline_mode<synchronous>, transform_indices = @transform_2, window_bounds = array<i64: 1, 65>}, {transform_indices = @transform_3, window_bounds = array<i64: 8, 65>}]} {
    %c0 = arith.constant 0 : index
    %c0_0 = arith.constant 0 : index
    %0 = vector.load %arg1[%c0, %c0_0] : memref<8x16xbf16, #tpu.memory_space<vmem>>, vector<8x16xbf16>
    %c0_1 = arith.constant 0 : index
    %c0_2 = arith.constant 0 : index
    %1 = vector.load %arg2[%c0_1, %c0_2] : memref<16x65xbf16, #tpu.memory_space<vmem>>, vector<16x65xbf16>
    %cst = arith.constant dense<0.000000e+00> : vector<8x65xf32>
    %2 = tpu.matmul %0, %1, %cst {dimension_numbers = #tpu.dot_dimension_numbers<[1], [0], [0], [1], [0, 0, 1, 1], [], []>} : vector<8x16xbf16>, vector<16x65xbf16>, vector<8x65xf32> -> vector<8x65xf32>
    %c0_3 = arith.constant 0 : index
    %c0_4 = arith.constant 0 : index
    %3 = vector.load %arg3[%c0_3, %c0_4] : memref<1x65xf32, #tpu.memory_space<vmem>>, vector<1x65xf32>
    %4 = vector.broadcast %3 : vector<1x65xf32> to vector<8x65xf32>
    %5 = arith.addf %2, %4 : vector<8x65xf32>
    %c0_5 = arith.constant 0 : index
    %c0_6 = arith.constant 0 : index
    %6 = vector.load %arg4[%c0_5, %c0_6] : memref<8x65xf32, #tpu.memory_space<vmem>>, vector<8x65xf32>
    tpu.vector_store %arg4[%c0_5, %c0_6], %5 {strides = array<i32>} : memref<8x65xf32, #tpu.memory_space<vmem>>, vector<8x65xf32>,
    return
  }
  func.func @transform_0(%arg0: i32) -> (i32, i32) {
    %c0_i32 = arith.constant 0 : i32
    %c0_i32_0 = arith.constant 0 : i32
    return %arg0, %c0_i32 : i32, i32
  }
  func.func @transform_1(%arg0: i32) -> (i32, i32) {
    %c0_i32 = arith.constant 0 : i32
    %c0_i32_0 = arith.constant 0 : i32
    %c0_i32_1 = arith.constant 0 : i32
    return %c0_i32, %c0_i32_0 : i32, i32
  }
  func.func @transform_2(%arg0: i32) -> (i32, i32) {
    %c0_i32 = arith.constant 0 : i32
    %c0_i32_0 = arith.constant 0 : i32
    %c0_i32_1 = arith.constant 0 : i32
    return %c0_i32, %c0_i32_0 : i32, i32
  }
  func.func @transform_3(%arg0: i32) -> (i32, i32) {
    %c0_i32 = arith.constant 0 : i32
    %c0_i32_0 = arith.constant 0 : i32
    return %arg0, %c0_i32 : i32, i32
  }
}

module attributes {stable_mosaic.version = 11 : i64} {
  func.func @_linear_kernel(%arg0: i32, %arg1: memref<16x16xf32, #tpu.memory_space<vmem>>, %arg2: memref<16x64xbf16, #tpu.memory_space<vmem>>, %arg3: memref<1x64xf32, #tpu.memory_space<vmem>>, %arg4: memref<16x64xf32, #tpu.memory_space<vmem>>) attributes {dimension_semantics = [#tpu.dimension_semantics<parallel>], iteration_bounds = array<i64: 1>, scalar_prefetch = 0 : i64, scratch_operands = 0 : i64, tpu.core_type = #tpu.core_type<tc>, window_params = [{transform_indices = @transform_0, window_bounds = array<i64: 16, 16>}, {pipeline_mode = #tpu.pipeline_mode<synchronous>, transform_indices = @transform_1, window_bounds = array<i64: 16, 64>}, {pipeline_mode = #tpu.pipeline_mode<synchronous>, transform_indices = @transform_2, window_bounds = array<i64: 1, 64>}, {transform_indices = @transform_3, window_bounds = array<i64: 16, 64>}]} {
    %c0 = arith.constant 0 : index
    %c0_0 = arith.constant 0 : index
    %0 = vector.load %arg1[%c0, %c0_0] : memref<16x16xf32, #tpu.memory_space<vmem>>, vector<16x16xf32>
    %1 = arith.truncf %0 : vector<16x16xf32> to vector<16x16xbf16>
    %c0_1 = arith.constant 0 : index
    %c0_2 = arith.constant 0 : index
    %2 = vector.load %arg2[%c0_1, %c0_2] : memref<16x64xbf16, #tpu.memory_space<vmem>>, vector<16x64xbf16>
    %cst = arith.constant dense<0.000000e+00> : vector<16x64xf32>
    %3 = tpu.matmul %1, %2, %cst {dimension_numbers = #tpu.dot_dimension_numbers<[1], [0], [0], [1], [0, 0, 1, 1], [], []>} : vector<16x16xbf16>, vector<16x64xbf16>, vector<16x64xf32> -> vector<16x64xf32>
    %c0_3 = arith.constant 0 : index
    %c0_4 = arith.constant 0 : index
    %4 = vector.load %arg3[%c0_3, %c0_4] : memref<1x64xf32, #tpu.memory_space<vmem>>, vector<1x64xf32>
    %5 = vector.broadcast %4 : vector<1x64xf32> to vector<16x64xf32>
    %6 = arith.addf %3, %5 : vector<16x64xf32>
    %c0_5 = arith.constant 0 : index
    %c0_6 = arith.constant 0 : index
    %7 = vector.load %arg4[%c0_5, %c0_6] : memref<16x64xf32, #tpu.memory_space<vmem>>, vector<16x64xf32>
    tpu.vector_store %arg4[%c0_5, %c0_6], %6 {strides = array<i32>} : memref<16x64xf32, #tpu.memory_space<vmem>>, vector<16x64xf32>,
    return
  }
  func.func @transform_0(%arg0: i32) -> (i32, i32) {
    %c0_i32 = arith.constant 0 : i32
    %c0_i32_0 = arith.constant 0 : i32
    return %arg0, %c0_i32 : i32, i32
  }
  func.func @transform_1(%arg0: i32) -> (i32, i32) {
    %c0_i32 = arith.constant 0 : i32
    %c0_i32_0 = arith.constant 0 : i32
    %c0_i32_1 = arith.constant 0 : i32
    return %c0_i32, %c0_i32_0 : i32, i32
  }
  func.func @transform_2(%arg0: i32) -> (i32, i32) {
    %c0_i32 = arith.constant 0 : i32
    %c0_i32_0 = arith.constant 0 : i32
    %c0_i32_1 = arith.constant 0 : i32
    return %c0_i32, %c0_i32_0 : i32, i32
  }
  func.func @transform_3(%arg0: i32) -> (i32, i32) {
    %c0_i32 = arith.constant 0 : i32
    %c0_i32_0 = arith.constant 0 : i32
    return %arg0, %c0_i32 : i32, i32
  }
}

module attributes {stable_mosaic.version = 11 : i64} {
  func.func @_enc_bilstm_kernel(%arg0: i32, %arg1: memref<8x2x64xf32, #tpu.memory_space<vmem>>, %arg2: memref<8x2x64xf32, #tpu.memory_space<vmem>>, %arg3: memref<16x64xbf16, #tpu.memory_space<vmem>>, %arg4: memref<16x64xbf16, #tpu.memory_space<vmem>>, %arg5: memref<8x2x16xf32, #tpu.memory_space<vmem>>, %arg6: memref<8x2x16xf32, #tpu.memory_space<vmem>>, %arg7: memref<2x16xf32, #tpu.memory_space<vmem>>, %arg8: memref<2x16xf32, #tpu.memory_space<vmem>>, %arg9: memref<2x16xf32, #tpu.memory_space<vmem>>, %arg10: memref<2x16xf32, #tpu.memory_space<vmem>>) attributes {dimension_semantics = [#tpu.dimension_semantics<arbitrary>], iteration_bounds = array<i64: 1>, scalar_prefetch = 0 : i64, scratch_operands = 0 : i64, tpu.core_type = #tpu.core_type<tc>, window_params = [{transform_indices = @transform_0, window_bounds = array<i64: 8, 2, 64>}, {transform_indices = @transform_1, window_bounds = array<i64: 8, 2, 64>}, {pipeline_mode = #tpu.pipeline_mode<synchronous>, transform_indices = @transform_2, window_bounds = array<i64: 16, 64>}, {pipeline_mode = #tpu.pipeline_mode<synchronous>, transform_indices = @transform_3, window_bounds = array<i64: 16, 64>}, {transform_indices = @transform_4, window_bounds = array<i64: 8, 2, 16>}, {transform_indices = @transform_5, window_bounds = array<i64: 8, 2, 16>}, {pipeline_mode = #tpu.pipeline_mode<synchronous>, transform_indices = @transform_6, window_bounds = array<i64: 2, 16>}, {pipeline_mode = #tpu.pipeline_mode<synchronous>, transform_indices = @transform_7, window_bounds = array<i64: 2, 16>}, {pipeline_mode = #tpu.pipeline_mode<synchronous>, transform_indices = @transform_8, window_bounds = array<i64: 2, 16>}, {pipeline_mode = #tpu.pipeline_mode<synchronous>, transform_indices = @transform_9, window_bounds = array<i64: 2, 16>}]} {
    %c0_i32 = arith.constant 0 : i32
    %0 = arith.cmpi eq, %arg0, %c0_i32 : i32
    %1 = arith.extui %0 : i1 to i32
    %c0_i32_0 = arith.constant 0 : i32
    %2 = arith.cmpi ne, %1, %c0_i32_0 : i32
    scf.if %2 {
      %cst_172 = arith.constant 0.000000e+00 : f32
      %541 = vector.broadcast %cst_172 : f32 to vector<2x16xf32>
      %c0_173 = arith.constant 0 : index
      %c0_174 = arith.constant 0 : index
      %542 = vector.load %arg7[%c0_173, %c0_174] : memref<2x16xf32, #tpu.memory_space<vmem>>, vector<2x16xf32>
      tpu.vector_store %arg7[%c0_173, %c0_174], %541 {strides = array<i32>} : memref<2x16xf32, #tpu.memory_space<vmem>>, vector<2x16xf32>,
      %cst_175 = arith.constant 0.000000e+00 : f32
      %543 = vector.broadcast %cst_175 : f32 to vector<2x16xf32>
      %c0_176 = arith.constant 0 : index
      %c0_177 = arith.constant 0 : index
      %544 = vector.load %arg8[%c0_176, %c0_177] : memref<2x16xf32, #tpu.memory_space<vmem>>, vector<2x16xf32>
      tpu.vector_store %arg8[%c0_176, %c0_177], %543 {strides = array<i32>} : memref<2x16xf32, #tpu.memory_space<vmem>>, vector<2x16xf32>,
      %cst_178 = arith.constant 0.000000e+00 : f32
      %545 = vector.broadcast %cst_178 : f32 to vector<2x16xf32>
      %c0_179 = arith.constant 0 : index
      %c0_180 = arith.constant 0 : index
      %546 = vector.load %arg9[%c0_179, %c0_180] : memref<2x16xf32, #tpu.memory_space<vmem>>, vector<2x16xf32>
      tpu.vector_store %arg9[%c0_179, %c0_180], %545 {strides = array<i32>} : memref<2x16xf32, #tpu.memory_space<vmem>>, vector<2x16xf32>,
      %cst_181 = arith.constant 0.000000e+00 : f32
      %547 = vector.broadcast %cst_181 : f32 to vector<2x16xf32>
      %c0_182 = arith.constant 0 : index
      %c0_183 = arith.constant 0 : index
      %548 = vector.load %arg10[%c0_182, %c0_183] : memref<2x16xf32, #tpu.memory_space<vmem>>, vector<2x16xf32>
      tpu.vector_store %arg10[%c0_182, %c0_183], %547 {strides = array<i32>} : memref<2x16xf32, #tpu.memory_space<vmem>>, vector<2x16xf32>,
    } else {
    }
    %c0 = arith.constant 0 : index
    %c0_1 = arith.constant 0 : index
    %3 = vector.load %arg3[%c0, %c0_1] : memref<16x64xbf16, #tpu.memory_space<vmem>>, vector<16x64xbf16>
    %c0_2 = arith.constant 0 : index
    %c0_3 = arith.constant 0 : index
    %4 = vector.load %arg4[%c0_2, %c0_3] : memref<16x64xbf16, #tpu.memory_space<vmem>>, vector<16x64xbf16>
    %c0_4 = arith.constant 0 : index
    %c0_5 = arith.constant 0 : index
    %5 = vector.load %arg7[%c0_4, %c0_5] : memref<2x16xf32, #tpu.memory_space<vmem>>, vector<2x16xf32>
    %c0_6 = arith.constant 0 : index
    %c0_7 = arith.constant 0 : index
    %6 = vector.load %arg8[%c0_6, %c0_7] : memref<2x16xf32, #tpu.memory_space<vmem>>, vector<2x16xf32>
    %c0_8 = arith.constant 0 : index
    %c0_9 = arith.constant 0 : index
    %7 = vector.load %arg9[%c0_8, %c0_9] : memref<2x16xf32, #tpu.memory_space<vmem>>, vector<2x16xf32>
    %c0_10 = arith.constant 0 : index
    %c0_11 = arith.constant 0 : index
    %8 = vector.load %arg10[%c0_10, %c0_11] : memref<2x16xf32, #tpu.memory_space<vmem>>, vector<2x16xf32>
    %c0_12 = arith.constant 0 : index
    %c0_13 = arith.constant 0 : index
    %c0_14 = arith.constant 0 : index
    %9 = vector.load %arg1[%c0_12, %c0_13, %c0_14] : memref<8x2x64xf32, #tpu.memory_space<vmem>>, vector<1x2x64xf32>
    %10 = vector.shape_cast %9 : vector<1x2x64xf32> to vector<2x64xf32>
    %11 = arith.truncf %5 : vector<2x16xf32> to vector<2x16xbf16>
    %cst = arith.constant dense<0.000000e+00> : vector<2x64xf32>
    %12 = tpu.matmul %11, %3, %cst {dimension_numbers = #tpu.dot_dimension_numbers<[1], [0], [0], [1], [0, 0, 1, 1], [], []>} : vector<2x16xbf16>, vector<16x64xbf16>, vector<2x64xf32> -> vector<2x64xf32>
    %13 = arith.addf %10, %12 : vector<2x64xf32>
    %14 = vector.extract_strided_slice %13 {offsets = [0, 0], sizes = [2, 16], strides = [1, 1]} : vector<2x64xf32> to vector<2x16xf32>
    %15 = arith.negf %14 : vector<2x16xf32>
    %16 = math.exp %15 : vector<2x16xf32>
    %cst_15 = arith.constant 1.000000e+00 : f32
    %17 = vector.broadcast %cst_15 : f32 to vector<2x16xf32>
    %18 = arith.addf %17, %16 : vector<2x16xf32>
    %19 = arith.divf %17, %18 : vector<2x16xf32>
    %20 = vector.extract_strided_slice %13 {offsets = [0, 16], sizes = [2, 16], strides = [1, 1]} : vector<2x64xf32> to vector<2x16xf32>
    %21 = arith.negf %20 : vector<2x16xf32>
    %22 = math.exp %21 : vector<2x16xf32>
    %cst_16 = arith.constant 1.000000e+00 : f32
    %23 = vector.broadcast %cst_16 : f32 to vector<2x16xf32>
    %24 = arith.addf %23, %22 : vector<2x16xf32>
    %25 = arith.divf %23, %24 : vector<2x16xf32>
    %26 = vector.extract_strided_slice %13 {offsets = [0, 32], sizes = [2, 16], strides = [1, 1]} : vector<2x64xf32> to vector<2x16xf32>
    %27 = math.tanh %26 : vector<2x16xf32>
    %28 = vector.extract_strided_slice %13 {offsets = [0, 48], sizes = [2, 16], strides = [1, 1]} : vector<2x64xf32> to vector<2x16xf32>
    %29 = arith.negf %28 : vector<2x16xf32>
    %30 = math.exp %29 : vector<2x16xf32>
    %cst_17 = arith.constant 1.000000e+00 : f32
    %31 = vector.broadcast %cst_17 : f32 to vector<2x16xf32>
    %32 = arith.addf %31, %30 : vector<2x16xf32>
    %33 = arith.divf %31, %32 : vector<2x16xf32>
    %34 = arith.mulf %25, %6 : vector<2x16xf32>
    %35 = arith.mulf %19, %27 : vector<2x16xf32>
    %36 = arith.addf %34, %35 : vector<2x16xf32>
    %37 = math.tanh %36 : vector<2x16xf32>
    %38 = arith.mulf %33, %37 : vector<2x16xf32>
    %c0_18 = arith.constant 0 : index
    %c0_19 = arith.constant 0 : index
    %c0_20 = arith.constant 0 : index
    %39 = vector.load %arg5[%c0_18, %c0_19, %c0_20] : memref<8x2x16xf32, #tpu.memory_space<vmem>>, vector<1x2x16xf32>
    %40 = vector.shape_cast %39 : vector<1x2x16xf32> to vector<2x16xf32>
    %41 = vector.shape_cast %38 : vector<2x16xf32> to vector<1x2x16xf32>
    tpu.vector_store %arg5[%c0_18, %c0_19, %c0_20], %41 {strides = array<i32>} : memref<8x2x16xf32, #tpu.memory_space<vmem>>, vector<1x2x16xf32>,
    %c7 = arith.constant 7 : index
    %c0_21 = arith.constant 0 : index
    %c0_22 = arith.constant 0 : index
    %42 = vector.load %arg2[%c7, %c0_21, %c0_22] : memref<8x2x64xf32, #tpu.memory_space<vmem>>, vector<1x2x64xf32>
    %43 = vector.shape_cast %42 : vector<1x2x64xf32> to vector<2x64xf32>
    %44 = arith.truncf %7 : vector<2x16xf32> to vector<2x16xbf16>
    %cst_23 = arith.constant dense<0.000000e+00> : vector<2x64xf32>
    %45 = tpu.matmul %44, %4, %cst_23 {dimension_numbers = #tpu.dot_dimension_numbers<[1], [0], [0], [1], [0, 0, 1, 1], [], []>} : vector<2x16xbf16>, vector<16x64xbf16>, vector<2x64xf32> -> vector<2x64xf32>
    %46 = arith.addf %43, %45 : vector<2x64xf32>
    %47 = vector.extract_strided_slice %46 {offsets = [0, 0], sizes = [2, 16], strides = [1, 1]} : vector<2x64xf32> to vector<2x16xf32>
    %48 = arith.negf %47 : vector<2x16xf32>
    %49 = math.exp %48 : vector<2x16xf32>
    %cst_24 = arith.constant 1.000000e+00 : f32
    %50 = vector.broadcast %cst_24 : f32 to vector<2x16xf32>
    %51 = arith.addf %50, %49 : vector<2x16xf32>
    %52 = arith.divf %50, %51 : vector<2x16xf32>
    %53 = vector.extract_strided_slice %46 {offsets = [0, 16], sizes = [2, 16], strides = [1, 1]} : vector<2x64xf32> to vector<2x16xf32>
    %54 = arith.negf %53 : vector<2x16xf32>
    %55 = math.exp %54 : vector<2x16xf32>
    %cst_25 = arith.constant 1.000000e+00 : f32
    %56 = vector.broadcast %cst_25 : f32 to vector<2x16xf32>
    %57 = arith.addf %56, %55 : vector<2x16xf32>
    %58 = arith.divf %56, %57 : vector<2x16xf32>
    %59 = vector.extract_strided_slice %46 {offsets = [0, 32], sizes = [2, 16], strides = [1, 1]} : vector<2x64xf32> to vector<2x16xf32>
    %60 = math.tanh %59 : vector<2x16xf32>
    %61 = vector.extract_strided_slice %46 {offsets = [0, 48], sizes = [2, 16], strides = [1, 1]} : vector<2x64xf32> to vector<2x16xf32>
    %62 = arith.negf %61 : vector<2x16xf32>
    %63 = math.exp %62 : vector<2x16xf32>
    %cst_26 = arith.constant 1.000000e+00 : f32
    %64 = vector.broadcast %cst_26 : f32 to vector<2x16xf32>
    %65 = arith.addf %64, %63 : vector<2x16xf32>
    %66 = arith.divf %64, %65 : vector<2x16xf32>
    %67 = arith.mulf %58, %8 : vector<2x16xf32>
    %68 = arith.mulf %52, %60 : vector<2x16xf32>
    %69 = arith.addf %67, %68 : vector<2x16xf32>
    %70 = math.tanh %69 : vector<2x16xf32>
    %71 = arith.mulf %66, %70 : vector<2x16xf32>
    %c7_27 = arith.constant 7 : index
    %c0_28 = arith.constant 0 : index
    %c0_29 = arith.constant 0 : index
    %72 = vector.load %arg6[%c7_27, %c0_28, %c0_29] : memref<8x2x16xf32, #tpu.memory_space<vmem>>, vector<1x2x16xf32>
    %73 = vector.shape_cast %72 : vector<1x2x16xf32> to vector<2x16xf32>
    %74 = vector.shape_cast %71 : vector<2x16xf32> to vector<1x2x16xf32>
    tpu.vector_store %arg6[%c7_27, %c0_28, %c0_29], %74 {strides = array<i32>} : memref<8x2x16xf32, #tpu.memory_space<vmem>>, vector<1x2x16xf32>,
    %c1 = arith.constant 1 : index
    %c0_30 = arith.constant 0 : index
    %c0_31 = arith.constant 0 : index
    %75 = vector.load %arg1[%c1, %c0_30, %c0_31] : memref<8x2x64xf32, #tpu.memory_space<vmem>>, vector<1x2x64xf32>
    %76 = vector.shape_cast %75 : vector<1x2x64xf32> to vector<2x64xf32>
    %77 = arith.truncf %38 : vector<2x16xf32> to vector<2x16xbf16>
    %cst_32 = arith.constant dense<0.000000e+00> : vector<2x64xf32>
    %78 = tpu.matmul %77, %3, %cst_32 {dimension_numbers = #tpu.dot_dimension_numbers<[1], [0], [0], [1], [0, 0, 1, 1], [], []>} : vector<2x16xbf16>, vector<16x64xbf16>, vector<2x64xf32> -> vector<2x64xf32>
    %79 = arith.addf %76, %78 : vector<2x64xf32>
    %80 = vector.extract_strided_slice %79 {offsets = [0, 0], sizes = [2, 16], strides = [1, 1]} : vector<2x64xf32> to vector<2x16xf32>
    %81 = arith.negf %80 : vector<2x16xf32>
    %82 = math.exp %81 : vector<2x16xf32>
    %cst_33 = arith.constant 1.000000e+00 : f32
    %83 = vector.broadcast %cst_33 : f32 to vector<2x16xf32>
    %84 = arith.addf %83, %82 : vector<2x16xf32>
    %85 = arith.divf %83, %84 : vector<2x16xf32>
    %86 = vector.extract_strided_slice %79 {offsets = [0, 16], sizes = [2, 16], strides = [1, 1]} : vector<2x64xf32> to vector<2x16xf32>
    %87 = arith.negf %86 : vector<2x16xf32>
    %88 = math.exp %87 : vector<2x16xf32>
    %cst_34 = arith.constant 1.000000e+00 : f32
    %89 = vector.broadcast %cst_34 : f32 to vector<2x16xf32>
    %90 = arith.addf %89, %88 : vector<2x16xf32>
    %91 = arith.divf %89, %90 : vector<2x16xf32>
    %92 = vector.extract_strided_slice %79 {offsets = [0, 32], sizes = [2, 16], strides = [1, 1]} : vector<2x64xf32> to vector<2x16xf32>
    %93 = math.tanh %92 : vector<2x16xf32>
    %94 = vector.extract_strided_slice %79 {offsets = [0, 48], sizes = [2, 16], strides = [1, 1]} : vector<2x64xf32> to vector<2x16xf32>
    %95 = arith.negf %94 : vector<2x16xf32>
    %96 = math.exp %95 : vector<2x16xf32>
    %cst_35 = arith.constant 1.000000e+00 : f32
    %97 = vector.broadcast %cst_35 : f32 to vector<2x16xf32>
    %98 = arith.addf %97, %96 : vector<2x16xf32>
    %99 = arith.divf %97, %98 : vector<2x16xf32>
    %100 = arith.mulf %91, %36 : vector<2x16xf32>
    %101 = arith.mulf %85, %93 : vector<2x16xf32>
    %102 = arith.addf %100, %101 : vector<2x16xf32>
    %103 = math.tanh %102 : vector<2x16xf32>
    %104 = arith.mulf %99, %103 : vector<2x16xf32>
    %c1_36 = arith.constant 1 : index
    %c0_37 = arith.constant 0 : index
    %c0_38 = arith.constant 0 : index
    %105 = vector.load %arg5[%c1_36, %c0_37, %c0_38] : memref<8x2x16xf32, #tpu.memory_space<vmem>>, vector<1x2x16xf32>
    %106 = vector.shape_cast %105 : vector<1x2x16xf32> to vector<2x16xf32>
    %107 = vector.shape_cast %104 : vector<2x16xf32> to vector<1x2x16xf32>
    tpu.vector_store %arg5[%c1_36, %c0_37, %c0_38], %107 {strides = array<i32>} : memref<8x2x16xf32, #tpu.memory_space<vmem>>, vector<1x2x16xf32>,
    %c6 = arith.constant 6 : index
    %c0_39 = arith.constant 0 : index
    %c0_40 = arith.constant 0 : index
    %108 = vector.load %arg2[%c6, %c0_39, %c0_40] : memref<8x2x64xf32, #tpu.memory_space<vmem>>, vector<1x2x64xf32>
    %109 = vector.shape_cast %108 : vector<1x2x64xf32> to vector<2x64xf32>
    %110 = arith.truncf %71 : vector<2x16xf32> to vector<2x16xbf16>
    %cst_41 = arith.constant dense<0.000000e+00> : vector<2x64xf32>
    %111 = tpu.matmul %110, %4, %cst_41 {dimension_numbers = #tpu.dot_dimension_numbers<[1], [0], [0], [1], [0, 0, 1, 1], [], []>} : vector<2x16xbf16>, vector<16x64xbf16>, vector<2x64xf32> -> vector<2x64xf32>
    %112 = arith.addf %109, %111 : vector<2x64xf32>
    %113 = vector.extract_strided_slice %112 {offsets = [0, 0], sizes = [2, 16], strides = [1, 1]} : vector<2x64xf32> to vector<2x16xf32>
    %114 = arith.negf %113 : vector<2x16xf32>
    %115 = math.exp %114 : vector<2x16xf32>
    %cst_42 = arith.constant 1.000000e+00 : f32
    %116 = vector.broadcast %cst_42 : f32 to vector<2x16xf32>
    %117 = arith.addf %116, %115 : vector<2x16xf32>
    %118 = arith.divf %116, %117 : vector<2x16xf32>
    %119 = vector.extract_strided_slice %112 {offsets = [0, 16], sizes = [2, 16], strides = [1, 1]} : vector<2x64xf32> to vector<2x16xf32>
    %120 = arith.negf %119 : vector<2x16xf32>
    %121 = math.exp %120 : vector<2x16xf32>
    %cst_43 = arith.constant 1.000000e+00 : f32
    %122 = vector.broadcast %cst_43 : f32 to vector<2x16xf32>
    %123 = arith.addf %122, %121 : vector<2x16xf32>
    %124 = arith.divf %122, %123 : vector<2x16xf32>
    %125 = vector.extract_strided_slice %112 {offsets = [0, 32], sizes = [2, 16], strides = [1, 1]} : vector<2x64xf32> to vector<2x16xf32>
    %126 = math.tanh %125 : vector<2x16xf32>
    %127 = vector.extract_strided_slice %112 {offsets = [0, 48], sizes = [2, 16], strides = [1, 1]} : vector<2x64xf32> to vector<2x16xf32>
    %128 = arith.negf %127 : vector<2x16xf32>
    %129 = math.exp %128 : vector<2x16xf32>
    %cst_44 = arith.constant 1.000000e+00 : f32
    %130 = vector.broadcast %cst_44 : f32 to vector<2x16xf32>
    %131 = arith.addf %130, %129 : vector<2x16xf32>
    %132 = arith.divf %130, %131 : vector<2x16xf32>
    %133 = arith.mulf %124, %69 : vector<2x16xf32>
    %134 = arith.mulf %118, %126 : vector<2x16xf32>
    %135 = arith.addf %133, %134 : vector<2x16xf32>
    %136 = math.tanh %135 : vector<2x16xf32>
    %137 = arith.mulf %132, %136 : vector<2x16xf32>
    %c6_45 = arith.constant 6 : index
    %c0_46 = arith.constant 0 : index
    %c0_47 = arith.constant 0 : index
    %138 = vector.load %arg6[%c6_45, %c0_46, %c0_47] : memref<8x2x16xf32, #tpu.memory_space<vmem>>, vector<1x2x16xf32>
    %139 = vector.shape_cast %138 : vector<1x2x16xf32> to vector<2x16xf32>
    %140 = vector.shape_cast %137 : vector<2x16xf32> to vector<1x2x16xf32>
    tpu.vector_store %arg6[%c6_45, %c0_46, %c0_47], %140 {strides = array<i32>} : memref<8x2x16xf32, #tpu.memory_space<vmem>>, vector<1x2x16xf32>,
    %c2 = arith.constant 2 : index
    %c0_48 = arith.constant 0 : index
    %c0_49 = arith.constant 0 : index
    %141 = vector.load %arg1[%c2, %c0_48, %c0_49] : memref<8x2x64xf32, #tpu.memory_space<vmem>>, vector<1x2x64xf32>
    %142 = vector.shape_cast %141 : vector<1x2x64xf32> to vector<2x64xf32>
    %143 = arith.truncf %104 : vector<2x16xf32> to vector<2x16xbf16>
    %cst_50 = arith.constant dense<0.000000e+00> : vector<2x64xf32>
    %144 = tpu.matmul %143, %3, %cst_50 {dimension_numbers = #tpu.dot_dimension_numbers<[1], [0], [0], [1], [0, 0, 1, 1], [], []>} : vector<2x16xbf16>, vector<16x64xbf16>, vector<2x64xf32> -> vector<2x64xf32>
    %145 = arith.addf %142, %144 : vector<2x64xf32>
    %146 = vector.extract_strided_slice %145 {offsets = [0, 0], sizes = [2, 16], strides = [1, 1]} : vector<2x64xf32> to vector<2x16xf32>
    %147 = arith.negf %146 : vector<2x16xf32>
    %148 = math.exp %147 : vector<2x16xf32>
    %cst_51 = arith.constant 1.000000e+00 : f32
    %149 = vector.broadcast %cst_51 : f32 to vector<2x16xf32>
    %150 = arith.addf %149, %148 : vector<2x16xf32>
    %151 = arith.divf %149, %150 : vector<2x16xf32>
    %152 = vector.extract_strided_slice %145 {offsets = [0, 16], sizes = [2, 16], strides = [1, 1]} : vector<2x64xf32> to vector<2x16xf32>
    %153 = arith.negf %152 : vector<2x16xf32>
    %154 = math.exp %153 : vector<2x16xf32>
    %cst_52 = arith.constant 1.000000e+00 : f32
    %155 = vector.broadcast %cst_52 : f32 to vector<2x16xf32>
    %156 = arith.addf %155, %154 : vector<2x16xf32>
    %157 = arith.divf %155, %156 : vector<2x16xf32>
    %158 = vector.extract_strided_slice %145 {offsets = [0, 32], sizes = [2, 16], strides = [1, 1]} : vector<2x64xf32> to vector<2x16xf32>
    %159 = math.tanh %158 : vector<2x16xf32>
    %160 = vector.extract_strided_slice %145 {offsets = [0, 48], sizes = [2, 16], strides = [1, 1]} : vector<2x64xf32> to vector<2x16xf32>
    %161 = arith.negf %160 : vector<2x16xf32>
    %162 = math.exp %161 : vector<2x16xf32>
    %cst_53 = arith.constant 1.000000e+00 : f32
    %163 = vector.broadcast %cst_53 : f32 to vector<2x16xf32>
    %164 = arith.addf %163, %162 : vector<2x16xf32>
    %165 = arith.divf %163, %164 : vector<2x16xf32>
    %166 = arith.mulf %157, %102 : vector<2x16xf32>
    %167 = arith.mulf %151, %159 : vector<2x16xf32>
    %168 = arith.addf %166, %167 : vector<2x16xf32>
    %169 = math.tanh %168 : vector<2x16xf32>
    %170 = arith.mulf %165, %169 : vector<2x16xf32>
    %c2_54 = arith.constant 2 : index
    %c0_55 = arith.constant 0 : index
    %c0_56 = arith.constant 0 : index
    %171 = vector.load %arg5[%c2_54, %c0_55, %c0_56] : memref<8x2x16xf32, #tpu.memory_space<vmem>>, vector<1x2x16xf32>
    %172 = vector.shape_cast %171 : vector<1x2x16xf32> to vector<2x16xf32>
    %173 = vector.shape_cast %170 : vector<2x16xf32> to vector<1x2x16xf32>
    tpu.vector_store %arg5[%c2_54, %c0_55, %c0_56], %173 {strides = array<i32>} : memref<8x2x16xf32, #tpu.memory_space<vmem>>, vector<1x2x16xf32>,
    %c5 = arith.constant 5 : index
    %c0_57 = arith.constant 0 : index
    %c0_58 = arith.constant 0 : index
    %174 = vector.load %arg2[%c5, %c0_57, %c0_58] : memref<8x2x64xf32, #tpu.memory_space<vmem>>, vector<1x2x64xf32>
    %175 = vector.shape_cast %174 : vector<1x2x64xf32> to vector<2x64xf32>
    %176 = arith.truncf %137 : vector<2x16xf32> to vector<2x16xbf16>
    %cst_59 = arith.constant dense<0.000000e+00> : vector<2x64xf32>
    %177 = tpu.matmul %176, %4, %cst_59 {dimension_numbers = #tpu.dot_dimension_numbers<[1], [0], [0], [1], [0, 0, 1, 1], [], []>} : vector<2x16xbf16>, vector<16x64xbf16>, vector<2x64xf32> -> vector<2x64xf32>
    %178 = arith.addf %175, %177 : vector<2x64xf32>
    %179 = vector.extract_strided_slice %178 {offsets = [0, 0], sizes = [2, 16], strides = [1, 1]} : vector<2x64xf32> to vector<2x16xf32>
    %180 = arith.negf %179 : vector<2x16xf32>
    %181 = math.exp %180 : vector<2x16xf32>
    %cst_60 = arith.constant 1.000000e+00 : f32
    %182 = vector.broadcast %cst_60 : f32 to vector<2x16xf32>
    %183 = arith.addf %182, %181 : vector<2x16xf32>
    %184 = arith.divf %182, %183 : vector<2x16xf32>
    %185 = vector.extract_strided_slice %178 {offsets = [0, 16], sizes = [2, 16], strides = [1, 1]} : vector<2x64xf32> to vector<2x16xf32>
    %186 = arith.negf %185 : vector<2x16xf32>
    %187 = math.exp %186 : vector<2x16xf32>
    %cst_61 = arith.constant 1.000000e+00 : f32
    %188 = vector.broadcast %cst_61 : f32 to vector<2x16xf32>
    %189 = arith.addf %188, %187 : vector<2x16xf32>
    %190 = arith.divf %188, %189 : vector<2x16xf32>
    %191 = vector.extract_strided_slice %178 {offsets = [0, 32], sizes = [2, 16], strides = [1, 1]} : vector<2x64xf32> to vector<2x16xf32>
    %192 = math.tanh %191 : vector<2x16xf32>
    %193 = vector.extract_strided_slice %178 {offsets = [0, 48], sizes = [2, 16], strides = [1, 1]} : vector<2x64xf32> to vector<2x16xf32>
    %194 = arith.negf %193 : vector<2x16xf32>
    %195 = math.exp %194 : vector<2x16xf32>
    %cst_62 = arith.constant 1.000000e+00 : f32
    %196 = vector.broadcast %cst_62 : f32 to vector<2x16xf32>
    %197 = arith.addf %196, %195 : vector<2x16xf32>
    %198 = arith.divf %196, %197 : vector<2x16xf32>
    %199 = arith.mulf %190, %135 : vector<2x16xf32>
    %200 = arith.mulf %184, %192 : vector<2x16xf32>
    %201 = arith.addf %199, %200 : vector<2x16xf32>
    %202 = math.tanh %201 : vector<2x16xf32>
    %203 = arith.mulf %198, %202 : vector<2x16xf32>
    %c5_63 = arith.constant 5 : index
    %c0_64 = arith.constant 0 : index
    %c0_65 = arith.constant 0 : index
    %204 = vector.load %arg6[%c5_63, %c0_64, %c0_65] : memref<8x2x16xf32, #tpu.memory_space<vmem>>, vector<1x2x16xf32>
    %205 = vector.shape_cast %204 : vector<1x2x16xf32> to vector<2x16xf32>
    %206 = vector.shape_cast %203 : vector<2x16xf32> to vector<1x2x16xf32>
    tpu.vector_store %arg6[%c5_63, %c0_64, %c0_65], %206 {strides = array<i32>} : memref<8x2x16xf32, #tpu.memory_space<vmem>>, vector<1x2x16xf32>,
    %c3 = arith.constant 3 : index
    %c0_66 = arith.constant 0 : index
    %c0_67 = arith.constant 0 : index
    %207 = vector.load %arg1[%c3, %c0_66, %c0_67] : memref<8x2x64xf32, #tpu.memory_space<vmem>>, vector<1x2x64xf32>
    %208 = vector.shape_cast %207 : vector<1x2x64xf32> to vector<2x64xf32>
    %209 = arith.truncf %170 : vector<2x16xf32> to vector<2x16xbf16>
    %cst_68 = arith.constant dense<0.000000e+00> : vector<2x64xf32>
    %210 = tpu.matmul %209, %3, %cst_68 {dimension_numbers = #tpu.dot_dimension_numbers<[1], [0], [0], [1], [0, 0, 1, 1], [], []>} : vector<2x16xbf16>, vector<16x64xbf16>, vector<2x64xf32> -> vector<2x64xf32>
    %211 = arith.addf %208, %210 : vector<2x64xf32>
    %212 = vector.extract_strided_slice %211 {offsets = [0, 0], sizes = [2, 16], strides = [1, 1]} : vector<2x64xf32> to vector<2x16xf32>
    %213 = arith.negf %212 : vector<2x16xf32>
    %214 = math.exp %213 : vector<2x16xf32>
    %cst_69 = arith.constant 1.000000e+00 : f32
    %215 = vector.broadcast %cst_69 : f32 to vector<2x16xf32>
    %216 = arith.addf %215, %214 : vector<2x16xf32>
    %217 = arith.divf %215, %216 : vector<2x16xf32>
    %218 = vector.extract_strided_slice %211 {offsets = [0, 16], sizes = [2, 16], strides = [1, 1]} : vector<2x64xf32> to vector<2x16xf32>
    %219 = arith.negf %218 : vector<2x16xf32>
    %220 = math.exp %219 : vector<2x16xf32>
    %cst_70 = arith.constant 1.000000e+00 : f32
    %221 = vector.broadcast %cst_70 : f32 to vector<2x16xf32>
    %222 = arith.addf %221, %220 : vector<2x16xf32>
    %223 = arith.divf %221, %222 : vector<2x16xf32>
    %224 = vector.extract_strided_slice %211 {offsets = [0, 32], sizes = [2, 16], strides = [1, 1]} : vector<2x64xf32> to vector<2x16xf32>
    %225 = math.tanh %224 : vector<2x16xf32>
    %226 = vector.extract_strided_slice %211 {offsets = [0, 48], sizes = [2, 16], strides = [1, 1]} : vector<2x64xf32> to vector<2x16xf32>
    %227 = arith.negf %226 : vector<2x16xf32>
    %228 = math.exp %227 : vector<2x16xf32>
    %cst_71 = arith.constant 1.000000e+00 : f32
    %229 = vector.broadcast %cst_71 : f32 to vector<2x16xf32>
    %230 = arith.addf %229, %228 : vector<2x16xf32>
    %231 = arith.divf %229, %230 : vector<2x16xf32>
    %232 = arith.mulf %223, %168 : vector<2x16xf32>
    %233 = arith.mulf %217, %225 : vector<2x16xf32>
    %234 = arith.addf %232, %233 : vector<2x16xf32>
    %235 = math.tanh %234 : vector<2x16xf32>
    %236 = arith.mulf %231, %235 : vector<2x16xf32>
    %c3_72 = arith.constant 3 : index
    %c0_73 = arith.constant 0 : index
    %c0_74 = arith.constant 0 : index
    %237 = vector.load %arg5[%c3_72, %c0_73, %c0_74] : memref<8x2x16xf32, #tpu.memory_space<vmem>>, vector<1x2x16xf32>
    %238 = vector.shape_cast %237 : vector<1x2x16xf32> to vector<2x16xf32>
    %239 = vector.shape_cast %236 : vector<2x16xf32> to vector<1x2x16xf32>
    tpu.vector_store %arg5[%c3_72, %c0_73, %c0_74], %239 {strides = array<i32>} : memref<8x2x16xf32, #tpu.memory_space<vmem>>, vector<1x2x16xf32>,
    %c4 = arith.constant 4 : index
    %c0_75 = arith.constant 0 : index
    %c0_76 = arith.constant 0 : index
    %240 = vector.load %arg2[%c4, %c0_75, %c0_76] : memref<8x2x64xf32, #tpu.memory_space<vmem>>, vector<1x2x64xf32>
    %241 = vector.shape_cast %240 : vector<1x2x64xf32> to vector<2x64xf32>
    %242 = arith.truncf %203 : vector<2x16xf32> to vector<2x16xbf16>
    %cst_77 = arith.constant dense<0.000000e+00> : vector<2x64xf32>
    %243 = tpu.matmul %242, %4, %cst_77 {dimension_numbers = #tpu.dot_dimension_numbers<[1], [0], [0], [1], [0, 0, 1, 1], [], []>} : vector<2x16xbf16>, vector<16x64xbf16>, vector<2x64xf32> -> vector<2x64xf32>
    %244 = arith.addf %241, %243 : vector<2x64xf32>
    %245 = vector.extract_strided_slice %244 {offsets = [0, 0], sizes = [2, 16], strides = [1, 1]} : vector<2x64xf32> to vector<2x16xf32>
    %246 = arith.negf %245 : vector<2x16xf32>
    %247 = math.exp %246 : vector<2x16xf32>
    %cst_78 = arith.constant 1.000000e+00 : f32
    %248 = vector.broadcast %cst_78 : f32 to vector<2x16xf32>
    %249 = arith.addf %248, %247 : vector<2x16xf32>
    %250 = arith.divf %248, %249 : vector<2x16xf32>
    %251 = vector.extract_strided_slice %244 {offsets = [0, 16], sizes = [2, 16], strides = [1, 1]} : vector<2x64xf32> to vector<2x16xf32>
    %252 = arith.negf %251 : vector<2x16xf32>
    %253 = math.exp %252 : vector<2x16xf32>
    %cst_79 = arith.constant 1.000000e+00 : f32
    %254 = vector.broadcast %cst_79 : f32 to vector<2x16xf32>
    %255 = arith.addf %254, %253 : vector<2x16xf32>
    %256 = arith.divf %254, %255 : vector<2x16xf32>
    %257 = vector.extract_strided_slice %244 {offsets = [0, 32], sizes = [2, 16], strides = [1, 1]} : vector<2x64xf32> to vector<2x16xf32>
    %258 = math.tanh %257 : vector<2x16xf32>
    %259 = vector.extract_strided_slice %244 {offsets = [0, 48], sizes = [2, 16], strides = [1, 1]} : vector<2x64xf32> to vector<2x16xf32>
    %260 = arith.negf %259 : vector<2x16xf32>
    %261 = math.exp %260 : vector<2x16xf32>
    %cst_80 = arith.constant 1.000000e+00 : f32
    %262 = vector.broadcast %cst_80 : f32 to vector<2x16xf32>
    %263 = arith.addf %262, %261 : vector<2x16xf32>
    %264 = arith.divf %262, %263 : vector<2x16xf32>
    %265 = arith.mulf %256, %201 : vector<2x16xf32>
    %266 = arith.mulf %250, %258 : vector<2x16xf32>
    %267 = arith.addf %265, %266 : vector<2x16xf32>
    %268 = math.tanh %267 : vector<2x16xf32>
    %269 = arith.mulf %264, %268 : vector<2x16xf32>
    %c4_81 = arith.constant 4 : index
    %c0_82 = arith.constant 0 : index
    %c0_83 = arith.constant 0 : index
    %270 = vector.load %arg6[%c4_81, %c0_82, %c0_83] : memref<8x2x16xf32, #tpu.memory_space<vmem>>, vector<1x2x16xf32>
    %271 = vector.shape_cast %270 : vector<1x2x16xf32> to vector<2x16xf32>
    %272 = vector.shape_cast %269 : vector<2x16xf32> to vector<1x2x16xf32>
    tpu.vector_store %arg6[%c4_81, %c0_82, %c0_83], %272 {strides = array<i32>} : memref<8x2x16xf32, #tpu.memory_space<vmem>>, vector<1x2x16xf32>,
    %c4_84 = arith.constant 4 : index
    %c0_85 = arith.constant 0 : index
    %c0_86 = arith.constant 0 : index
    %273 = vector.load %arg1[%c4_84, %c0_85, %c0_86] : memref<8x2x64xf32, #tpu.memory_space<vmem>>, vector<1x2x64xf32>
    %274 = vector.shape_cast %273 : vector<1x2x64xf32> to vector<2x64xf32>
    %275 = arith.truncf %236 : vector<2x16xf32> to vector<2x16xbf16>
    %cst_87 = arith.constant dense<0.000000e+00> : vector<2x64xf32>
    %276 = tpu.matmul %275, %3, %cst_87 {dimension_numbers = #tpu.dot_dimension_numbers<[1], [0], [0], [1], [0, 0, 1, 1], [], []>} : vector<2x16xbf16>, vector<16x64xbf16>, vector<2x64xf32> -> vector<2x64xf32>
    %277 = arith.addf %274, %276 : vector<2x64xf32>
    %278 = vector.extract_strided_slice %277 {offsets = [0, 0], sizes = [2, 16], strides = [1, 1]} : vector<2x64xf32> to vector<2x16xf32>
    %279 = arith.negf %278 : vector<2x16xf32>
    %280 = math.exp %279 : vector<2x16xf32>
    %cst_88 = arith.constant 1.000000e+00 : f32
    %281 = vector.broadcast %cst_88 : f32 to vector<2x16xf32>
    %282 = arith.addf %281, %280 : vector<2x16xf32>
    %283 = arith.divf %281, %282 : vector<2x16xf32>
    %284 = vector.extract_strided_slice %277 {offsets = [0, 16], sizes = [2, 16], strides = [1, 1]} : vector<2x64xf32> to vector<2x16xf32>
    %285 = arith.negf %284 : vector<2x16xf32>
    %286 = math.exp %285 : vector<2x16xf32>
    %cst_89 = arith.constant 1.000000e+00 : f32
    %287 = vector.broadcast %cst_89 : f32 to vector<2x16xf32>
    %288 = arith.addf %287, %286 : vector<2x16xf32>
    %289 = arith.divf %287, %288 : vector<2x16xf32>
    %290 = vector.extract_strided_slice %277 {offsets = [0, 32], sizes = [2, 16], strides = [1, 1]} : vector<2x64xf32> to vector<2x16xf32>
    %291 = math.tanh %290 : vector<2x16xf32>
    %292 = vector.extract_strided_slice %277 {offsets = [0, 48], sizes = [2, 16], strides = [1, 1]} : vector<2x64xf32> to vector<2x16xf32>
    %293 = arith.negf %292 : vector<2x16xf32>
    %294 = math.exp %293 : vector<2x16xf32>
    %cst_90 = arith.constant 1.000000e+00 : f32
    %295 = vector.broadcast %cst_90 : f32 to vector<2x16xf32>
    %296 = arith.addf %295, %294 : vector<2x16xf32>
    %297 = arith.divf %295, %296 : vector<2x16xf32>
    %298 = arith.mulf %289, %234 : vector<2x16xf32>
    %299 = arith.mulf %283, %291 : vector<2x16xf32>
    %300 = arith.addf %298, %299 : vector<2x16xf32>
    %301 = math.tanh %300 : vector<2x16xf32>
    %302 = arith.mulf %297, %301 : vector<2x16xf32>
    %c4_91 = arith.constant 4 : index
    %c0_92 = arith.constant 0 : index
    %c0_93 = arith.constant 0 : index
    %303 = vector.load %arg5[%c4_91, %c0_92, %c0_93] : memref<8x2x16xf32, #tpu.memory_space<vmem>>, vector<1x2x16xf32>
    %304 = vector.shape_cast %303 : vector<1x2x16xf32> to vector<2x16xf32>
    %305 = vector.shape_cast %302 : vector<2x16xf32> to vector<1x2x16xf32>
    tpu.vector_store %arg5[%c4_91, %c0_92, %c0_93], %305 {strides = array<i32>} : memref<8x2x16xf32, #tpu.memory_space<vmem>>, vector<1x2x16xf32>,
    %c3_94 = arith.constant 3 : index
    %c0_95 = arith.constant 0 : index
    %c0_96 = arith.constant 0 : index
    %306 = vector.load %arg2[%c3_94, %c0_95, %c0_96] : memref<8x2x64xf32, #tpu.memory_space<vmem>>, vector<1x2x64xf32>
    %307 = vector.shape_cast %306 : vector<1x2x64xf32> to vector<2x64xf32>
    %308 = arith.truncf %269 : vector<2x16xf32> to vector<2x16xbf16>
    %cst_97 = arith.constant dense<0.000000e+00> : vector<2x64xf32>
    %309 = tpu.matmul %308, %4, %cst_97 {dimension_numbers = #tpu.dot_dimension_numbers<[1], [0], [0], [1], [0, 0, 1, 1], [], []>} : vector<2x16xbf16>, vector<16x64xbf16>, vector<2x64xf32> -> vector<2x64xf32>
    %310 = arith.addf %307, %309 : vector<2x64xf32>
    %311 = vector.extract_strided_slice %310 {offsets = [0, 0], sizes = [2, 16], strides = [1, 1]} : vector<2x64xf32> to vector<2x16xf32>
    %312 = arith.negf %311 : vector<2x16xf32>
    %313 = math.exp %312 : vector<2x16xf32>
    %cst_98 = arith.constant 1.000000e+00 : f32
    %314 = vector.broadcast %cst_98 : f32 to vector<2x16xf32>
    %315 = arith.addf %314, %313 : vector<2x16xf32>
    %316 = arith.divf %314, %315 : vector<2x16xf32>
    %317 = vector.extract_strided_slice %310 {offsets = [0, 16], sizes = [2, 16], strides = [1, 1]} : vector<2x64xf32> to vector<2x16xf32>
    %318 = arith.negf %317 : vector<2x16xf32>
    %319 = math.exp %318 : vector<2x16xf32>
    %cst_99 = arith.constant 1.000000e+00 : f32
    %320 = vector.broadcast %cst_99 : f32 to vector<2x16xf32>
    %321 = arith.addf %320, %319 : vector<2x16xf32>
    %322 = arith.divf %320, %321 : vector<2x16xf32>
    %323 = vector.extract_strided_slice %310 {offsets = [0, 32], sizes = [2, 16], strides = [1, 1]} : vector<2x64xf32> to vector<2x16xf32>
    %324 = math.tanh %323 : vector<2x16xf32>
    %325 = vector.extract_strided_slice %310 {offsets = [0, 48], sizes = [2, 16], strides = [1, 1]} : vector<2x64xf32> to vector<2x16xf32>
    %326 = arith.negf %325 : vector<2x16xf32>
    %327 = math.exp %326 : vector<2x16xf32>
    %cst_100 = arith.constant 1.000000e+00 : f32
    %328 = vector.broadcast %cst_100 : f32 to vector<2x16xf32>
    %329 = arith.addf %328, %327 : vector<2x16xf32>
    %330 = arith.divf %328, %329 : vector<2x16xf32>
    %331 = arith.mulf %322, %267 : vector<2x16xf32>
    %332 = arith.mulf %316, %324 : vector<2x16xf32>
    %333 = arith.addf %331, %332 : vector<2x16xf32>
    %334 = math.tanh %333 : vector<2x16xf32>
    %335 = arith.mulf %330, %334 : vector<2x16xf32>
    %c3_101 = arith.constant 3 : index
    %c0_102 = arith.constant 0 : index
    %c0_103 = arith.constant 0 : index
    %336 = vector.load %arg6[%c3_101, %c0_102, %c0_103] : memref<8x2x16xf32, #tpu.memory_space<vmem>>, vector<1x2x16xf32>
    %337 = vector.shape_cast %336 : vector<1x2x16xf32> to vector<2x16xf32>
    %338 = vector.shape_cast %335 : vector<2x16xf32> to vector<1x2x16xf32>
    tpu.vector_store %arg6[%c3_101, %c0_102, %c0_103], %338 {strides = array<i32>} : memref<8x2x16xf32, #tpu.memory_space<vmem>>, vector<1x2x16xf32>,
    %c5_104 = arith.constant 5 : index
    %c0_105 = arith.constant 0 : index
    %c0_106 = arith.constant 0 : index
    %339 = vector.load %arg1[%c5_104, %c0_105, %c0_106] : memref<8x2x64xf32, #tpu.memory_space<vmem>>, vector<1x2x64xf32>
    %340 = vector.shape_cast %339 : vector<1x2x64xf32> to vector<2x64xf32>
    %341 = arith.truncf %302 : vector<2x16xf32> to vector<2x16xbf16>
    %cst_107 = arith.constant dense<0.000000e+00> : vector<2x64xf32>
    %342 = tpu.matmul %341, %3, %cst_107 {dimension_numbers = #tpu.dot_dimension_numbers<[1], [0], [0], [1], [0, 0, 1, 1], [], []>} : vector<2x16xbf16>, vector<16x64xbf16>, vector<2x64xf32> -> vector<2x64xf32>
    %343 = arith.addf %340, %342 : vector<2x64xf32>
    %344 = vector.extract_strided_slice %343 {offsets = [0, 0], sizes = [2, 16], strides = [1, 1]} : vector<2x64xf32> to vector<2x16xf32>
    %345 = arith.negf %344 : vector<2x16xf32>
    %346 = math.exp %345 : vector<2x16xf32>
    %cst_108 = arith.constant 1.000000e+00 : f32
    %347 = vector.broadcast %cst_108 : f32 to vector<2x16xf32>
    %348 = arith.addf %347, %346 : vector<2x16xf32>
    %349 = arith.divf %347, %348 : vector<2x16xf32>
    %350 = vector.extract_strided_slice %343 {offsets = [0, 16], sizes = [2, 16], strides = [1, 1]} : vector<2x64xf32> to vector<2x16xf32>
    %351 = arith.negf %350 : vector<2x16xf32>
    %352 = math.exp %351 : vector<2x16xf32>
    %cst_109 = arith.constant 1.000000e+00 : f32
    %353 = vector.broadcast %cst_109 : f32 to vector<2x16xf32>
    %354 = arith.addf %353, %352 : vector<2x16xf32>
    %355 = arith.divf %353, %354 : vector<2x16xf32>
    %356 = vector.extract_strided_slice %343 {offsets = [0, 32], sizes = [2, 16], strides = [1, 1]} : vector<2x64xf32> to vector<2x16xf32>
    %357 = math.tanh %356 : vector<2x16xf32>
    %358 = vector.extract_strided_slice %343 {offsets = [0, 48], sizes = [2, 16], strides = [1, 1]} : vector<2x64xf32> to vector<2x16xf32>
    %359 = arith.negf %358 : vector<2x16xf32>
    %360 = math.exp %359 : vector<2x16xf32>
    %cst_110 = arith.constant 1.000000e+00 : f32
    %361 = vector.broadcast %cst_110 : f32 to vector<2x16xf32>
    %362 = arith.addf %361, %360 : vector<2x16xf32>
    %363 = arith.divf %361, %362 : vector<2x16xf32>
    %364 = arith.mulf %355, %300 : vector<2x16xf32>
    %365 = arith.mulf %349, %357 : vector<2x16xf32>
    %366 = arith.addf %364, %365 : vector<2x16xf32>
    %367 = math.tanh %366 : vector<2x16xf32>
    %368 = arith.mulf %363, %367 : vector<2x16xf32>
    %c5_111 = arith.constant 5 : index
    %c0_112 = arith.constant 0 : index
    %c0_113 = arith.constant 0 : index
    %369 = vector.load %arg5[%c5_111, %c0_112, %c0_113] : memref<8x2x16xf32, #tpu.memory_space<vmem>>, vector<1x2x16xf32>
    %370 = vector.shape_cast %369 : vector<1x2x16xf32> to vector<2x16xf32>
    %371 = vector.shape_cast %368 : vector<2x16xf32> to vector<1x2x16xf32>
    tpu.vector_store %arg5[%c5_111, %c0_112, %c0_113], %371 {strides = array<i32>} : memref<8x2x16xf32, #tpu.memory_space<vmem>>, vector<1x2x16xf32>,
    %c2_114 = arith.constant 2 : index
    %c0_115 = arith.constant 0 : index
    %c0_116 = arith.constant 0 : index
    %372 = vector.load %arg2[%c2_114, %c0_115, %c0_116] : memref<8x2x64xf32, #tpu.memory_space<vmem>>, vector<1x2x64xf32>
    %373 = vector.shape_cast %372 : vector<1x2x64xf32> to vector<2x64xf32>
    %374 = arith.truncf %335 : vector<2x16xf32> to vector<2x16xbf16>
    %cst_117 = arith.constant dense<0.000000e+00> : vector<2x64xf32>
    %375 = tpu.matmul %374, %4, %cst_117 {dimension_numbers = #tpu.dot_dimension_numbers<[1], [0], [0], [1], [0, 0, 1, 1], [], []>} : vector<2x16xbf16>, vector<16x64xbf16>, vector<2x64xf32> -> vector<2x64xf32>
    %376 = arith.addf %373, %375 : vector<2x64xf32>
    %377 = vector.extract_strided_slice %376 {offsets = [0, 0], sizes = [2, 16], strides = [1, 1]} : vector<2x64xf32> to vector<2x16xf32>
    %378 = arith.negf %377 : vector<2x16xf32>
    %379 = math.exp %378 : vector<2x16xf32>
    %cst_118 = arith.constant 1.000000e+00 : f32
    %380 = vector.broadcast %cst_118 : f32 to vector<2x16xf32>
    %381 = arith.addf %380, %379 : vector<2x16xf32>
    %382 = arith.divf %380, %381 : vector<2x16xf32>
    %383 = vector.extract_strided_slice %376 {offsets = [0, 16], sizes = [2, 16], strides = [1, 1]} : vector<2x64xf32> to vector<2x16xf32>
    %384 = arith.negf %383 : vector<2x16xf32>
    %385 = math.exp %384 : vector<2x16xf32>
    %cst_119 = arith.constant 1.000000e+00 : f32
    %386 = vector.broadcast %cst_119 : f32 to vector<2x16xf32>
    %387 = arith.addf %386, %385 : vector<2x16xf32>
    %388 = arith.divf %386, %387 : vector<2x16xf32>
    %389 = vector.extract_strided_slice %376 {offsets = [0, 32], sizes = [2, 16], strides = [1, 1]} : vector<2x64xf32> to vector<2x16xf32>
    %390 = math.tanh %389 : vector<2x16xf32>
    %391 = vector.extract_strided_slice %376 {offsets = [0, 48], sizes = [2, 16], strides = [1, 1]} : vector<2x64xf32> to vector<2x16xf32>
    %392 = arith.negf %391 : vector<2x16xf32>
    %393 = math.exp %392 : vector<2x16xf32>
    %cst_120 = arith.constant 1.000000e+00 : f32
    %394 = vector.broadcast %cst_120 : f32 to vector<2x16xf32>
    %395 = arith.addf %394, %393 : vector<2x16xf32>
    %396 = arith.divf %394, %395 : vector<2x16xf32>
    %397 = arith.mulf %388, %333 : vector<2x16xf32>
    %398 = arith.mulf %382, %390 : vector<2x16xf32>
    %399 = arith.addf %397, %398 : vector<2x16xf32>
    %400 = math.tanh %399 : vector<2x16xf32>
    %401 = arith.mulf %396, %400 : vector<2x16xf32>
    %c2_121 = arith.constant 2 : index
    %c0_122 = arith.constant 0 : index
    %c0_123 = arith.constant 0 : index
    %402 = vector.load %arg6[%c2_121, %c0_122, %c0_123] : memref<8x2x16xf32, #tpu.memory_space<vmem>>, vector<1x2x16xf32>
    %403 = vector.shape_cast %402 : vector<1x2x16xf32> to vector<2x16xf32>
    %404 = vector.shape_cast %401 : vector<2x16xf32> to vector<1x2x16xf32>
    tpu.vector_store %arg6[%c2_121, %c0_122, %c0_123], %404 {strides = array<i32>} : memref<8x2x16xf32, #tpu.memory_space<vmem>>, vector<1x2x16xf32>,
    %c6_124 = arith.constant 6 : index
    %c0_125 = arith.constant 0 : index
    %c0_126 = arith.constant 0 : index
    %405 = vector.load %arg1[%c6_124, %c0_125, %c0_126] : memref<8x2x64xf32, #tpu.memory_space<vmem>>, vector<1x2x64xf32>
    %406 = vector.shape_cast %405 : vector<1x2x64xf32> to vector<2x64xf32>
    %407 = arith.truncf %368 : vector<2x16xf32> to vector<2x16xbf16>
    %cst_127 = arith.constant dense<0.000000e+00> : vector<2x64xf32>
    %408 = tpu.matmul %407, %3, %cst_127 {dimension_numbers = #tpu.dot_dimension_numbers<[1], [0], [0], [1], [0, 0, 1, 1], [], []>} : vector<2x16xbf16>, vector<16x64xbf16>, vector<2x64xf32> -> vector<2x64xf32>
    %409 = arith.addf %406, %408 : vector<2x64xf32>
    %410 = vector.extract_strided_slice %409 {offsets = [0, 0], sizes = [2, 16], strides = [1, 1]} : vector<2x64xf32> to vector<2x16xf32>
    %411 = arith.negf %410 : vector<2x16xf32>
    %412 = math.exp %411 : vector<2x16xf32>
    %cst_128 = arith.constant 1.000000e+00 : f32
    %413 = vector.broadcast %cst_128 : f32 to vector<2x16xf32>
    %414 = arith.addf %413, %412 : vector<2x16xf32>
    %415 = arith.divf %413, %414 : vector<2x16xf32>
    %416 = vector.extract_strided_slice %409 {offsets = [0, 16], sizes = [2, 16], strides = [1, 1]} : vector<2x64xf32> to vector<2x16xf32>
    %417 = arith.negf %416 : vector<2x16xf32>
    %418 = math.exp %417 : vector<2x16xf32>
    %cst_129 = arith.constant 1.000000e+00 : f32
    %419 = vector.broadcast %cst_129 : f32 to vector<2x16xf32>
    %420 = arith.addf %419, %418 : vector<2x16xf32>
    %421 = arith.divf %419, %420 : vector<2x16xf32>
    %422 = vector.extract_strided_slice %409 {offsets = [0, 32], sizes = [2, 16], strides = [1, 1]} : vector<2x64xf32> to vector<2x16xf32>
    %423 = math.tanh %422 : vector<2x16xf32>
    %424 = vector.extract_strided_slice %409 {offsets = [0, 48], sizes = [2, 16], strides = [1, 1]} : vector<2x64xf32> to vector<2x16xf32>
    %425 = arith.negf %424 : vector<2x16xf32>
    %426 = math.exp %425 : vector<2x16xf32>
    %cst_130 = arith.constant 1.000000e+00 : f32
    %427 = vector.broadcast %cst_130 : f32 to vector<2x16xf32>
    %428 = arith.addf %427, %426 : vector<2x16xf32>
    %429 = arith.divf %427, %428 : vector<2x16xf32>
    %430 = arith.mulf %421, %366 : vector<2x16xf32>
    %431 = arith.mulf %415, %423 : vector<2x16xf32>
    %432 = arith.addf %430, %431 : vector<2x16xf32>
    %433 = math.tanh %432 : vector<2x16xf32>
    %434 = arith.mulf %429, %433 : vector<2x16xf32>
    %c6_131 = arith.constant 6 : index
    %c0_132 = arith.constant 0 : index
    %c0_133 = arith.constant 0 : index
    %435 = vector.load %arg5[%c6_131, %c0_132, %c0_133] : memref<8x2x16xf32, #tpu.memory_space<vmem>>, vector<1x2x16xf32>
    %436 = vector.shape_cast %435 : vector<1x2x16xf32> to vector<2x16xf32>
    %437 = vector.shape_cast %434 : vector<2x16xf32> to vector<1x2x16xf32>
    tpu.vector_store %arg5[%c6_131, %c0_132, %c0_133], %437 {strides = array<i32>} : memref<8x2x16xf32, #tpu.memory_space<vmem>>, vector<1x2x16xf32>,
    %c1_134 = arith.constant 1 : index
    %c0_135 = arith.constant 0 : index
    %c0_136 = arith.constant 0 : index
    %438 = vector.load %arg2[%c1_134, %c0_135, %c0_136] : memref<8x2x64xf32, #tpu.memory_space<vmem>>, vector<1x2x64xf32>
    %439 = vector.shape_cast %438 : vector<1x2x64xf32> to vector<2x64xf32>
    %440 = arith.truncf %401 : vector<2x16xf32> to vector<2x16xbf16>
    %cst_137 = arith.constant dense<0.000000e+00> : vector<2x64xf32>
    %441 = tpu.matmul %440, %4, %cst_137 {dimension_numbers = #tpu.dot_dimension_numbers<[1], [0], [0], [1], [0, 0, 1, 1], [], []>} : vector<2x16xbf16>, vector<16x64xbf16>, vector<2x64xf32> -> vector<2x64xf32>
    %442 = arith.addf %439, %441 : vector<2x64xf32>
    %443 = vector.extract_strided_slice %442 {offsets = [0, 0], sizes = [2, 16], strides = [1, 1]} : vector<2x64xf32> to vector<2x16xf32>
    %444 = arith.negf %443 : vector<2x16xf32>
    %445 = math.exp %444 : vector<2x16xf32>
    %cst_138 = arith.constant 1.000000e+00 : f32
    %446 = vector.broadcast %cst_138 : f32 to vector<2x16xf32>
    %447 = arith.addf %446, %445 : vector<2x16xf32>
    %448 = arith.divf %446, %447 : vector<2x16xf32>
    %449 = vector.extract_strided_slice %442 {offsets = [0, 16], sizes = [2, 16], strides = [1, 1]} : vector<2x64xf32> to vector<2x16xf32>
    %450 = arith.negf %449 : vector<2x16xf32>
    %451 = math.exp %450 : vector<2x16xf32>
    %cst_139 = arith.constant 1.000000e+00 : f32
    %452 = vector.broadcast %cst_139 : f32 to vector<2x16xf32>
    %453 = arith.addf %452, %451 : vector<2x16xf32>
    %454 = arith.divf %452, %453 : vector<2x16xf32>
    %455 = vector.extract_strided_slice %442 {offsets = [0, 32], sizes = [2, 16], strides = [1, 1]} : vector<2x64xf32> to vector<2x16xf32>
    %456 = math.tanh %455 : vector<2x16xf32>
    %457 = vector.extract_strided_slice %442 {offsets = [0, 48], sizes = [2, 16], strides = [1, 1]} : vector<2x64xf32> to vector<2x16xf32>
    %458 = arith.negf %457 : vector<2x16xf32>
    %459 = math.exp %458 : vector<2x16xf32>
    %cst_140 = arith.constant 1.000000e+00 : f32
    %460 = vector.broadcast %cst_140 : f32 to vector<2x16xf32>
    %461 = arith.addf %460, %459 : vector<2x16xf32>
    %462 = arith.divf %460, %461 : vector<2x16xf32>
    %463 = arith.mulf %454, %399 : vector<2x16xf32>
    %464 = arith.mulf %448, %456 : vector<2x16xf32>
    %465 = arith.addf %463, %464 : vector<2x16xf32>
    %466 = math.tanh %465 : vector<2x16xf32>
    %467 = arith.mulf %462, %466 : vector<2x16xf32>
    %c1_141 = arith.constant 1 : index
    %c0_142 = arith.constant 0 : index
    %c0_143 = arith.constant 0 : index
    %468 = vector.load %arg6[%c1_141, %c0_142, %c0_143] : memref<8x2x16xf32, #tpu.memory_space<vmem>>, vector<1x2x16xf32>
    %469 = vector.shape_cast %468 : vector<1x2x16xf32> to vector<2x16xf32>
    %470 = vector.shape_cast %467 : vector<2x16xf32> to vector<1x2x16xf32>
    tpu.vector_store %arg6[%c1_141, %c0_142, %c0_143], %470 {strides = array<i32>} : memref<8x2x16xf32, #tpu.memory_space<vmem>>, vector<1x2x16xf32>,
    %c7_144 = arith.constant 7 : index
    %c0_145 = arith.constant 0 : index
    %c0_146 = arith.constant 0 : index
    %471 = vector.load %arg1[%c7_144, %c0_145, %c0_146] : memref<8x2x64xf32, #tpu.memory_space<vmem>>, vector<1x2x64xf32>
    %472 = vector.shape_cast %471 : vector<1x2x64xf32> to vector<2x64xf32>
    %473 = arith.truncf %434 : vector<2x16xf32> to vector<2x16xbf16>
    %cst_147 = arith.constant dense<0.000000e+00> : vector<2x64xf32>
    %474 = tpu.matmul %473, %3, %cst_147 {dimension_numbers = #tpu.dot_dimension_numbers<[1], [0], [0], [1], [0, 0, 1, 1], [], []>} : vector<2x16xbf16>, vector<16x64xbf16>, vector<2x64xf32> -> vector<2x64xf32>
    %475 = arith.addf %472, %474 : vector<2x64xf32>
    %476 = vector.extract_strided_slice %475 {offsets = [0, 0], sizes = [2, 16], strides = [1, 1]} : vector<2x64xf32> to vector<2x16xf32>
    %477 = arith.negf %476 : vector<2x16xf32>
    %478 = math.exp %477 : vector<2x16xf32>
    %cst_148 = arith.constant 1.000000e+00 : f32
    %479 = vector.broadcast %cst_148 : f32 to vector<2x16xf32>
    %480 = arith.addf %479, %478 : vector<2x16xf32>
    %481 = arith.divf %479, %480 : vector<2x16xf32>
    %482 = vector.extract_strided_slice %475 {offsets = [0, 16], sizes = [2, 16], strides = [1, 1]} : vector<2x64xf32> to vector<2x16xf32>
    %483 = arith.negf %482 : vector<2x16xf32>
    %484 = math.exp %483 : vector<2x16xf32>
    %cst_149 = arith.constant 1.000000e+00 : f32
    %485 = vector.broadcast %cst_149 : f32 to vector<2x16xf32>
    %486 = arith.addf %485, %484 : vector<2x16xf32>
    %487 = arith.divf %485, %486 : vector<2x16xf32>
    %488 = vector.extract_strided_slice %475 {offsets = [0, 32], sizes = [2, 16], strides = [1, 1]} : vector<2x64xf32> to vector<2x16xf32>
    %489 = math.tanh %488 : vector<2x16xf32>
    %490 = vector.extract_strided_slice %475 {offsets = [0, 48], sizes = [2, 16], strides = [1, 1]} : vector<2x64xf32> to vector<2x16xf32>
    %491 = arith.negf %490 : vector<2x16xf32>
    %492 = math.exp %491 : vector<2x16xf32>
    %cst_150 = arith.constant 1.000000e+00 : f32
    %493 = vector.broadcast %cst_150 : f32 to vector<2x16xf32>
    %494 = arith.addf %493, %492 : vector<2x16xf32>
    %495 = arith.divf %493, %494 : vector<2x16xf32>
    %496 = arith.mulf %487, %432 : vector<2x16xf32>
    %497 = arith.mulf %481, %489 : vector<2x16xf32>
    %498 = arith.addf %496, %497 : vector<2x16xf32>
    %499 = math.tanh %498 : vector<2x16xf32>
    %500 = arith.mulf %495, %499 : vector<2x16xf32>
    %c7_151 = arith.constant 7 : index
    %c0_152 = arith.constant 0 : index
    %c0_153 = arith.constant 0 : index
    %501 = vector.load %arg5[%c7_151, %c0_152, %c0_153] : memref<8x2x16xf32, #tpu.memory_space<vmem>>, vector<1x2x16xf32>
    %502 = vector.shape_cast %501 : vector<1x2x16xf32> to vector<2x16xf32>
    %503 = vector.shape_cast %500 : vector<2x16xf32> to vector<1x2x16xf32>
    tpu.vector_store %arg5[%c7_151, %c0_152, %c0_153], %503 {strides = array<i32>} : memref<8x2x16xf32, #tpu.memory_space<vmem>>, vector<1x2x16xf32>,
    %c0_154 = arith.constant 0 : index
    %c0_155 = arith.constant 0 : index
    %c0_156 = arith.constant 0 : index
    %504 = vector.load %arg2[%c0_154, %c0_155, %c0_156] : memref<8x2x64xf32, #tpu.memory_space<vmem>>, vector<1x2x64xf32>
    %505 = vector.shape_cast %504 : vector<1x2x64xf32> to vector<2x64xf32>
    %506 = arith.truncf %467 : vector<2x16xf32> to vector<2x16xbf16>
    %cst_157 = arith.constant dense<0.000000e+00> : vector<2x64xf32>
    %507 = tpu.matmul %506, %4, %cst_157 {dimension_numbers = #tpu.dot_dimension_numbers<[1], [0], [0], [1], [0, 0, 1, 1], [], []>} : vector<2x16xbf16>, vector<16x64xbf16>, vector<2x64xf32> -> vector<2x64xf32>
    %508 = arith.addf %505, %507 : vector<2x64xf32>
    %509 = vector.extract_strided_slice %508 {offsets = [0, 0], sizes = [2, 16], strides = [1, 1]} : vector<2x64xf32> to vector<2x16xf32>
    %510 = arith.negf %509 : vector<2x16xf32>
    %511 = math.exp %510 : vector<2x16xf32>
    %cst_158 = arith.constant 1.000000e+00 : f32
    %512 = vector.broadcast %cst_158 : f32 to vector<2x16xf32>
    %513 = arith.addf %512, %511 : vector<2x16xf32>
    %514 = arith.divf %512, %513 : vector<2x16xf32>
    %515 = vector.extract_strided_slice %508 {offsets = [0, 16], sizes = [2, 16], strides = [1, 1]} : vector<2x64xf32> to vector<2x16xf32>
    %516 = arith.negf %515 : vector<2x16xf32>
    %517 = math.exp %516 : vector<2x16xf32>
    %cst_159 = arith.constant 1.000000e+00 : f32
    %518 = vector.broadcast %cst_159 : f32 to vector<2x16xf32>
    %519 = arith.addf %518, %517 : vector<2x16xf32>
    %520 = arith.divf %518, %519 : vector<2x16xf32>
    %521 = vector.extract_strided_slice %508 {offsets = [0, 32], sizes = [2, 16], strides = [1, 1]} : vector<2x64xf32> to vector<2x16xf32>
    %522 = math.tanh %521 : vector<2x16xf32>
    %523 = vector.extract_strided_slice %508 {offsets = [0, 48], sizes = [2, 16], strides = [1, 1]} : vector<2x64xf32> to vector<2x16xf32>
    %524 = arith.negf %523 : vector<2x16xf32>
    %525 = math.exp %524 : vector<2x16xf32>
    %cst_160 = arith.constant 1.000000e+00 : f32
    %526 = vector.broadcast %cst_160 : f32 to vector<2x16xf32>
    %527 = arith.addf %526, %525 : vector<2x16xf32>
    %528 = arith.divf %526, %527 : vector<2x16xf32>
    %529 = arith.mulf %520, %465 : vector<2x16xf32>
    %530 = arith.mulf %514, %522 : vector<2x16xf32>
    %531 = arith.addf %529, %530 : vector<2x16xf32>
    %532 = math.tanh %531 : vector<2x16xf32>
    %533 = arith.mulf %528, %532 : vector<2x16xf32>
    %c0_161 = arith.constant 0 : index
    %c0_162 = arith.constant 0 : index
    %c0_163 = arith.constant 0 : index
    %534 = vector.load %arg6[%c0_161, %c0_162, %c0_163] : memref<8x2x16xf32, #tpu.memory_space<vmem>>, vector<1x2x16xf32>
    %535 = vector.shape_cast %534 : vector<1x2x16xf32> to vector<2x16xf32>
    %536 = vector.shape_cast %533 : vector<2x16xf32> to vector<1x2x16xf32>
    tpu.vector_store %arg6[%c0_161, %c0_162, %c0_163], %536 {strides = array<i32>} : memref<8x2x16xf32, #tpu.memory_space<vmem>>, vector<1x2x16xf32>,
    %c0_164 = arith.constant 0 : index
    %c0_165 = arith.constant 0 : index
    %537 = vector.load %arg7[%c0_164, %c0_165] : memref<2x16xf32, #tpu.memory_space<vmem>>, vector<2x16xf32>
    tpu.vector_store %arg7[%c0_164, %c0_165], %500 {strides = array<i32>} : memref<2x16xf32, #tpu.memory_space<vmem>>, vector<2x16xf32>,
    %c0_166 = arith.constant 0 : index
    %c0_167 = arith.constant 0 : index
    %538 = vector.load %arg8[%c0_166, %c0_167] : memref<2x16xf32, #tpu.memory_space<vmem>>, vector<2x16xf32>
    tpu.vector_store %arg8[%c0_166, %c0_167], %498 {strides = array<i32>} : memref<2x16xf32, #tpu.memory_space<vmem>>, vector<2x16xf32>,
    %c0_168 = arith.constant 0 : index
    %c0_169 = arith.constant 0 : index
    %539 = vector.load %arg9[%c0_168, %c0_169] : memref<2x16xf32, #tpu.memory_space<vmem>>, vector<2x16xf32>
    tpu.vector_store %arg9[%c0_168, %c0_169], %533 {strides = array<i32>} : memref<2x16xf32, #tpu.memory_space<vmem>>, vector<2x16xf32>,
    %c0_170 = arith.constant 0 : index
    %c0_171 = arith.constant 0 : index
    %540 = vector.load %arg10[%c0_170, %c0_171] : memref<2x16xf32, #tpu.memory_space<vmem>>, vector<2x16xf32>
    tpu.vector_store %arg10[%c0_170, %c0_171], %531 {strides = array<i32>} : memref<2x16xf32, #tpu.memory_space<vmem>>, vector<2x16xf32>,
    return
  }
  func.func @transform_0(%arg0: i32) -> (i32, i32, i32) {
    %c0_i32 = arith.constant 0 : i32
    %c0_i32_0 = arith.constant 0 : i32
    %c0_i32_1 = arith.constant 0 : i32
    return %arg0, %c0_i32, %c0_i32_0 : i32, i32, i32
  }
  func.func @transform_1(%arg0: i32) -> (i32, i32, i32) {
    %c0_i32 = arith.constant 0 : i32
    %0 = arith.subi %c0_i32, %arg0 : i32
    %c0_i32_0 = arith.constant 0 : i32
    %c0_i32_1 = arith.constant 0 : i32
    %c0_i32_2 = arith.constant 0 : i32
    return %0, %c0_i32_0, %c0_i32_1 : i32, i32, i32
  }
  func.func @transform_2(%arg0: i32) -> (i32, i32) {
    %c0_i32 = arith.constant 0 : i32
    %c0_i32_0 = arith.constant 0 : i32
    %c0_i32_1 = arith.constant 0 : i32
    return %c0_i32, %c0_i32_0 : i32, i32
  }
  func.func @transform_3(%arg0: i32) -> (i32, i32) {
    %c0_i32 = arith.constant 0 : i32
    %c0_i32_0 = arith.constant 0 : i32
    %c0_i32_1 = arith.constant 0 : i32
    return %c0_i32, %c0_i32_0 : i32, i32
  }
  func.func @transform_4(%arg0: i32) -> (i32, i32, i32) {
    %c0_i32 = arith.constant 0 : i32
    %c0_i32_0 = arith.constant 0 : i32
    %c0_i32_1 = arith.constant 0 : i32
    return %arg0, %c0_i32, %c0_i32_0 : i32, i32, i32
  }
  func.func @transform_5(%arg0: i32) -> (i32, i32, i32) {
    %c0_i32 = arith.constant 0 : i32
    %0 = arith.subi %c0_i32, %arg0 : i32
    %c0_i32_0 = arith.constant 0 : i32
    %c0_i32_1 = arith.constant 0 : i32
    %c0_i32_2 = arith.constant 0 : i32
    return %0, %c0_i32_0, %c0_i32_1 : i32, i32, i32
  }
  func.func @transform_6(%arg0: i32) -> (i32, i32) {
    %c0_i32 = arith.constant 0 : i32
    %c0_i32_0 = arith.constant 0 : i32
    %c0_i32_1 = arith.constant 0 : i32
    return %c0_i32, %c0_i32_0 : i32, i32
  }
  func.func @transform_7(%arg0: i32) -> (i32, i32) {
    %c0_i32 = arith.constant 0 : i32
    %c0_i32_0 = arith.constant 0 : i32
    %c0_i32_1 = arith.constant 0 : i32
    return %c0_i32, %c0_i32_0 : i32, i32
  }
  func.func @transform_8(%arg0: i32) -> (i32, i32) {
    %c0_i32 = arith.constant 0 : i32
    %c0_i32_0 = arith.constant 0 : i32
    %c0_i32_1 = arith.constant 0 : i32
    return %c0_i32, %c0_i32_0 : i32, i32
  }
  func.func @transform_9(%arg0: i32) -> (i32, i32) {
    %c0_i32 = arith.constant 0 : i32
    %c0_i32_0 = arith.constant 0 : i32
    %c0_i32_1 = arith.constant 0 : i32
    return %c0_i32, %c0_i32_0 : i32, i32
  }
}

module attributes {stable_mosaic.version = 11 : i64} {
  func.func @_linear_kernel(%arg0: i32, %arg1: memref<2x32xf32, #tpu.memory_space<vmem>>, %arg2: memref<32x16xbf16, #tpu.memory_space<vmem>>, %arg3: memref<1x16xf32, #tpu.memory_space<vmem>>, %arg4: memref<2x16xf32, #tpu.memory_space<vmem>>) attributes {dimension_semantics = [#tpu.dimension_semantics<parallel>], iteration_bounds = array<i64: 1>, scalar_prefetch = 0 : i64, scratch_operands = 0 : i64, tpu.core_type = #tpu.core_type<tc>, window_params = [{transform_indices = @transform_0, window_bounds = array<i64: 2, 32>}, {pipeline_mode = #tpu.pipeline_mode<synchronous>, transform_indices = @transform_1, window_bounds = array<i64: 32, 16>}, {pipeline_mode = #tpu.pipeline_mode<synchronous>, transform_indices = @transform_2, window_bounds = array<i64: 1, 16>}, {transform_indices = @transform_3, window_bounds = array<i64: 2, 16>}]} {
    %c0 = arith.constant 0 : index
    %c0_0 = arith.constant 0 : index
    %0 = vector.load %arg1[%c0, %c0_0] : memref<2x32xf32, #tpu.memory_space<vmem>>, vector<2x32xf32>
    %1 = arith.truncf %0 : vector<2x32xf32> to vector<2x32xbf16>
    %c0_1 = arith.constant 0 : index
    %c0_2 = arith.constant 0 : index
    %2 = vector.load %arg2[%c0_1, %c0_2] : memref<32x16xbf16, #tpu.memory_space<vmem>>, vector<32x16xbf16>
    %cst = arith.constant dense<0.000000e+00> : vector<2x16xf32>
    %3 = tpu.matmul %1, %2, %cst {dimension_numbers = #tpu.dot_dimension_numbers<[1], [0], [0], [1], [0, 0, 1, 1], [], []>} : vector<2x32xbf16>, vector<32x16xbf16>, vector<2x16xf32> -> vector<2x16xf32>
    %c0_3 = arith.constant 0 : index
    %c0_4 = arith.constant 0 : index
    %4 = vector.load %arg3[%c0_3, %c0_4] : memref<1x16xf32, #tpu.memory_space<vmem>>, vector<1x16xf32>
    %5 = vector.broadcast %4 : vector<1x16xf32> to vector<2x16xf32>
    %6 = arith.addf %3, %5 : vector<2x16xf32>
    %c0_5 = arith.constant 0 : index
    %c0_6 = arith.constant 0 : index
    %7 = vector.load %arg4[%c0_5, %c0_6] : memref<2x16xf32, #tpu.memory_space<vmem>>, vector<2x16xf32>
    tpu.vector_store %arg4[%c0_5, %c0_6], %6 {strides = array<i32>} : memref<2x16xf32, #tpu.memory_space<vmem>>, vector<2x16xf32>,
    return
  }
  func.func @transform_0(%arg0: i32) -> (i32, i32) {
    %c0_i32 = arith.constant 0 : i32
    %c0_i32_0 = arith.constant 0 : i32
    return %arg0, %c0_i32 : i32, i32
  }
  func.func @transform_1(%arg0: i32) -> (i32, i32) {
    %c0_i32 = arith.constant 0 : i32
    %c0_i32_0 = arith.constant 0 : i32
    %c0_i32_1 = arith.constant 0 : i32
    return %c0_i32, %c0_i32_0 : i32, i32
  }
  func.func @transform_2(%arg0: i32) -> (i32, i32) {
    %c0_i32 = arith.constant 0 : i32
    %c0_i32_0 = arith.constant 0 : i32
    %c0_i32_1 = arith.constant 0 : i32
    return %c0_i32, %c0_i32_0 : i32, i32
  }
  func.func @transform_3(%arg0: i32) -> (i32, i32) {
    %c0_i32 = arith.constant 0 : i32
    %c0_i32_0 = arith.constant 0 : i32
    return %arg0, %c0_i32 : i32, i32
  }
}

module attributes {stable_mosaic.version = 11 : i64} {
  func.func @_linear_kernel(%arg0: i32, %arg1: memref<16x32xf32, #tpu.memory_space<vmem>>, %arg2: memref<32x16xbf16, #tpu.memory_space<vmem>>, %arg3: memref<1x16xf32, #tpu.memory_space<vmem>>, %arg4: memref<16x16xf32, #tpu.memory_space<vmem>>) attributes {dimension_semantics = [#tpu.dimension_semantics<parallel>], iteration_bounds = array<i64: 1>, scalar_prefetch = 0 : i64, scratch_operands = 0 : i64, tpu.core_type = #tpu.core_type<tc>, window_params = [{transform_indices = @transform_0, window_bounds = array<i64: 16, 32>}, {pipeline_mode = #tpu.pipeline_mode<synchronous>, transform_indices = @transform_1, window_bounds = array<i64: 32, 16>}, {pipeline_mode = #tpu.pipeline_mode<synchronous>, transform_indices = @transform_2, window_bounds = array<i64: 1, 16>}, {transform_indices = @transform_3, window_bounds = array<i64: 16, 16>}]} {
    %c0 = arith.constant 0 : index
    %c0_0 = arith.constant 0 : index
    %0 = vector.load %arg1[%c0, %c0_0] : memref<16x32xf32, #tpu.memory_space<vmem>>, vector<16x32xf32>
    %1 = arith.truncf %0 : vector<16x32xf32> to vector<16x32xbf16>
    %c0_1 = arith.constant 0 : index
    %c0_2 = arith.constant 0 : index
    %2 = vector.load %arg2[%c0_1, %c0_2] : memref<32x16xbf16, #tpu.memory_space<vmem>>, vector<32x16xbf16>
    %cst = arith.constant dense<0.000000e+00> : vector<16x16xf32>
    %3 = tpu.matmul %1, %2, %cst {dimension_numbers = #tpu.dot_dimension_numbers<[1], [0], [0], [1], [0, 0, 1, 1], [], []>} : vector<16x32xbf16>, vector<32x16xbf16>, vector<16x16xf32> -> vector<16x16xf32>
    %c0_3 = arith.constant 0 : index
    %c0_4 = arith.constant 0 : index
    %4 = vector.load %arg3[%c0_3, %c0_4] : memref<1x16xf32, #tpu.memory_space<vmem>>, vector<1x16xf32>
    %5 = vector.broadcast %4 : vector<1x16xf32> to vector<16x16xf32>
    %6 = arith.addf %3, %5 : vector<16x16xf32>
    %c0_5 = arith.constant 0 : index
    %c0_6 = arith.constant 0 : index
    %7 = vector.load %arg4[%c0_5, %c0_6] : memref<16x16xf32, #tpu.memory_space<vmem>>, vector<16x16xf32>
    tpu.vector_store %arg4[%c0_5, %c0_6], %6 {strides = array<i32>} : memref<16x16xf32, #tpu.memory_space<vmem>>, vector<16x16xf32>,
    return
  }
  func.func @transform_0(%arg0: i32) -> (i32, i32) {
    %c0_i32 = arith.constant 0 : i32
    %c0_i32_0 = arith.constant 0 : i32
    return %arg0, %c0_i32 : i32, i32
  }
  func.func @transform_1(%arg0: i32) -> (i32, i32) {
    %c0_i32 = arith.constant 0 : i32
    %c0_i32_0 = arith.constant 0 : i32
    %c0_i32_1 = arith.constant 0 : i32
    return %c0_i32, %c0_i32_0 : i32, i32
  }
  func.func @transform_2(%arg0: i32) -> (i32, i32) {
    %c0_i32 = arith.constant 0 : i32
    %c0_i32_0 = arith.constant 0 : i32
    %c0_i32_1 = arith.constant 0 : i32
    return %c0_i32, %c0_i32_0 : i32, i32
  }
  func.func @transform_3(%arg0: i32) -> (i32, i32) {
    %c0_i32 = arith.constant 0 : i32
    %c0_i32_0 = arith.constant 0 : i32
    return %arg0, %c0_i32 : i32, i32
  }
}

module attributes {stable_mosaic.version = 11 : i64} {
  func.func @_decoder_kernel(%arg0: i32, %arg1: memref<1x2x64xf32, #tpu.memory_space<vmem>>, %arg2: memref<1x2x1xf32, #tpu.memory_space<vmem>>, %arg3: memref<2x16xf32, #tpu.memory_space<vmem>>, %arg4: memref<2x16xf32, #tpu.memory_space<vmem>>, %arg5: memref<16x64xbf16, #tpu.memory_space<vmem>>, %arg6: memref<2x8x16xf32, #tpu.memory_space<vmem>>, %arg7: memref<2x8x32xf32, #tpu.memory_space<vmem>>, %arg8: memref<1x16xf32, #tpu.memory_space<vmem>>, %arg9: memref<2x8xf32, #tpu.memory_space<vmem>>, %arg10: memref<16x17xbf16, #tpu.memory_space<vmem>>, %arg11: memref<16x17xbf16, #tpu.memory_space<vmem>>, %arg12: memref<1x17xf32, #tpu.memory_space<vmem>>, %arg13: memref<16x17xbf16, #tpu.memory_space<vmem>>, %arg14: memref<32x17xbf16, #tpu.memory_space<vmem>>, %arg15: memref<1x17xf32, #tpu.memory_space<vmem>>, %arg16: memref<1x2x16xf32, #tpu.memory_space<vmem>>, %arg17: memref<1x2x8xf32, #tpu.memory_space<vmem>>, %arg18: memref<1x2x1xf32, #tpu.memory_space<vmem>>, %arg19: memref<2x16xf32, #tpu.memory_space<vmem>>, %arg20: memref<2x16xf32, #tpu.memory_space<vmem>>) attributes {dimension_semantics = [#tpu.dimension_semantics<arbitrary>], iteration_bounds = array<i64: 4>, scalar_prefetch = 0 : i64, scratch_operands = 2 : i64, tpu.core_type = #tpu.core_type<tc>, window_params = [{transform_indices = @transform_0, window_bounds = array<i64: 1, 2, 64>}, {transform_indices = @transform_1, window_bounds = array<i64: 1, 2, 1>}, {pipeline_mode = #tpu.pipeline_mode<synchronous>, transform_indices = @transform_2, window_bounds = array<i64: 2, 16>}, {pipeline_mode = #tpu.pipeline_mode<synchronous>, transform_indices = @transform_3, window_bounds = array<i64: 2, 16>}, {pipeline_mode = #tpu.pipeline_mode<synchronous>, transform_indices = @transform_4, window_bounds = array<i64: 16, 64>}, {pipeline_mode = #tpu.pipeline_mode<synchronous>, transform_indices = @transform_5, window_bounds = array<i64: 2, 8, 16>}, {pipeline_mode = #tpu.pipeline_mode<synchronous>, transform_indices = @transform_6, window_bounds = array<i64: 2, 8, 32>}, {pipeline_mode = #tpu.pipeline_mode<synchronous>, transform_indices = @transform_7, window_bounds = array<i64: 1, 16>}, {pipeline_mode = #tpu.pipeline_mode<synchronous>, transform_indices = @transform_8, window_bounds = array<i64: 2, 8>}, {pipeline_mode = #tpu.pipeline_mode<synchronous>, transform_indices = @transform_9, window_bounds = array<i64: 16, 17>}, {pipeline_mode = #tpu.pipeline_mode<synchronous>, transform_indices = @transform_10, window_bounds = array<i64: 16, 17>}, {pipeline_mode = #tpu.pipeline_mode<synchronous>, transform_indices = @transform_11, window_bounds = array<i64: 1, 17>}, {pipeline_mode = #tpu.pipeline_mode<synchronous>, transform_indices = @transform_12, window_bounds = array<i64: 16, 17>}, {pipeline_mode = #tpu.pipeline_mode<synchronous>, transform_indices = @transform_13, window_bounds = array<i64: 32, 17>}, {pipeline_mode = #tpu.pipeline_mode<synchronous>, transform_indices = @transform_14, window_bounds = array<i64: 1, 17>}, {transform_indices = @transform_15, window_bounds = array<i64: 1, 2, 16>}, {transform_indices = @transform_16, window_bounds = array<i64: 1, 2, 8>}, {transform_indices = @transform_17, window_bounds = array<i64: 1, 2, 1>}]} {
    %c0_i32 = arith.constant 0 : i32
    %0 = arith.cmpi eq, %arg0, %c0_i32 : i32
    %1 = arith.extui %0 : i1 to i32
    %c0_i32_0 = arith.constant 0 : i32
    %2 = arith.cmpi ne, %1, %c0_i32_0 : i32
    scf.if %2 {
      %c0_60 = arith.constant 0 : index
      %c0_61 = arith.constant 0 : index
      %107 = vector.load %arg3[%c0_60, %c0_61] : memref<2x16xf32, #tpu.memory_space<vmem>>, vector<2x16xf32>
      %c0_62 = arith.constant 0 : index
      %c0_63 = arith.constant 0 : index
      %108 = vector.load %arg19[%c0_62, %c0_63] : memref<2x16xf32, #tpu.memory_space<vmem>>, vector<2x16xf32>
      tpu.vector_store %arg19[%c0_62, %c0_63], %107 {strides = array<i32>} : memref<2x16xf32, #tpu.memory_space<vmem>>, vector<2x16xf32>,
      %c0_64 = arith.constant 0 : index
      %c0_65 = arith.constant 0 : index
      %109 = vector.load %arg4[%c0_64, %c0_65] : memref<2x16xf32, #tpu.memory_space<vmem>>, vector<2x16xf32>
      %c0_66 = arith.constant 0 : index
      %c0_67 = arith.constant 0 : index
      %110 = vector.load %arg20[%c0_66, %c0_67] : memref<2x16xf32, #tpu.memory_space<vmem>>, vector<2x16xf32>
      tpu.vector_store %arg20[%c0_66, %c0_67], %109 {strides = array<i32>} : memref<2x16xf32, #tpu.memory_space<vmem>>, vector<2x16xf32>,
    } else {
    }
    %c0 = arith.constant 0 : index
    %c0_1 = arith.constant 0 : index
    %c0_2 = arith.constant 0 : index
    %3 = vector.load %arg1[%c0, %c0_1, %c0_2] : memref<1x2x64xf32, #tpu.memory_space<vmem>>, vector<1x2x64xf32>
    %4 = vector.shape_cast %3 : vector<1x2x64xf32> to vector<2x64xf32>
    %c0_3 = arith.constant 0 : index
    %c0_4 = arith.constant 0 : index
    %5 = vector.load %arg19[%c0_3, %c0_4] : memref<2x16xf32, #tpu.memory_space<vmem>>, vector<2x16xf32>
    %6 = arith.truncf %5 : vector<2x16xf32> to vector<2x16xbf16>
    %c0_5 = arith.constant 0 : index
    %c0_6 = arith.constant 0 : index
    %7 = vector.load %arg5[%c0_5, %c0_6] : memref<16x64xbf16, #tpu.memory_space<vmem>>, vector<16x64xbf16>
    %cst = arith.constant dense<0.000000e+00> : vector<2x64xf32>
    %8 = tpu.matmul %6, %7, %cst {dimension_numbers = #tpu.dot_dimension_numbers<[1], [0], [0], [1], [0, 0, 1, 1], [], []>} : vector<2x16xbf16>, vector<16x64xbf16>, vector<2x64xf32> -> vector<2x64xf32>
    %9 = arith.addf %4, %8 : vector<2x64xf32>
    %c0_7 = arith.constant 0 : index
    %c0_8 = arith.constant 0 : index
    %10 = vector.load %arg20[%c0_7, %c0_8] : memref<2x16xf32, #tpu.memory_space<vmem>>, vector<2x16xf32>
    %11 = vector.extract_strided_slice %9 {offsets = [0, 0], sizes = [2, 16], strides = [1, 1]} : vector<2x64xf32> to vector<2x16xf32>
    %12 = arith.negf %11 : vector<2x16xf32>
    %13 = math.exp %12 : vector<2x16xf32>
    %cst_9 = arith.constant 1.000000e+00 : f32
    %14 = vector.broadcast %cst_9 : f32 to vector<2x16xf32>
    %15 = arith.addf %14, %13 : vector<2x16xf32>
    %16 = arith.divf %14, %15 : vector<2x16xf32>
    %17 = vector.extract_strided_slice %9 {offsets = [0, 16], sizes = [2, 16], strides = [1, 1]} : vector<2x64xf32> to vector<2x16xf32>
    %18 = arith.negf %17 : vector<2x16xf32>
    %19 = math.exp %18 : vector<2x16xf32>
    %cst_10 = arith.constant 1.000000e+00 : f32
    %20 = vector.broadcast %cst_10 : f32 to vector<2x16xf32>
    %21 = arith.addf %20, %19 : vector<2x16xf32>
    %22 = arith.divf %20, %21 : vector<2x16xf32>
    %23 = vector.extract_strided_slice %9 {offsets = [0, 32], sizes = [2, 16], strides = [1, 1]} : vector<2x64xf32> to vector<2x16xf32>
    %24 = math.tanh %23 : vector<2x16xf32>
    %25 = vector.extract_strided_slice %9 {offsets = [0, 48], sizes = [2, 16], strides = [1, 1]} : vector<2x64xf32> to vector<2x16xf32>
    %26 = arith.negf %25 : vector<2x16xf32>
    %27 = math.exp %26 : vector<2x16xf32>
    %cst_11 = arith.constant 1.000000e+00 : f32
    %28 = vector.broadcast %cst_11 : f32 to vector<2x16xf32>
    %29 = arith.addf %28, %27 : vector<2x16xf32>
    %30 = arith.divf %28, %29 : vector<2x16xf32>
    %31 = arith.mulf %22, %10 : vector<2x16xf32>
    %32 = arith.mulf %16, %24 : vector<2x16xf32>
    %33 = arith.addf %31, %32 : vector<2x16xf32>
    %34 = math.tanh %33 : vector<2x16xf32>
    %35 = arith.mulf %30, %34 : vector<2x16xf32>
    %c0_12 = arith.constant 0 : index
    %c0_13 = arith.constant 0 : index
    %36 = vector.load %arg19[%c0_12, %c0_13] : memref<2x16xf32, #tpu.memory_space<vmem>>, vector<2x16xf32>
    tpu.vector_store %arg19[%c0_12, %c0_13], %35 {strides = array<i32>} : memref<2x16xf32, #tpu.memory_space<vmem>>, vector<2x16xf32>,
    %c0_14 = arith.constant 0 : index
    %c0_15 = arith.constant 0 : index
    %37 = vector.load %arg20[%c0_14, %c0_15] : memref<2x16xf32, #tpu.memory_space<vmem>>, vector<2x16xf32>
    tpu.vector_store %arg20[%c0_14, %c0_15], %33 {strides = array<i32>} : memref<2x16xf32, #tpu.memory_space<vmem>>, vector<2x16xf32>,
    %38 = arith.truncf %35 : vector<2x16xf32> to vector<2x16xbf16>
    %39 = arith.truncf %33 : vector<2x16xf32> to vector<2x16xbf16>
    %c0_16 = arith.constant 0 : index
    %c0_17 = arith.constant 0 : index
    %40 = vector.load %arg10[%c0_16, %c0_17] : memref<16x17xbf16, #tpu.memory_space<vmem>>, vector<16x17xbf16>
    %cst_18 = arith.constant dense<0.000000e+00> : vector<2x17xf32>
    %41 = tpu.matmul %38, %40, %cst_18 {dimension_numbers = #tpu.dot_dimension_numbers<[1], [0], [0], [1], [0, 0, 1, 1], [], []>} : vector<2x16xbf16>, vector<16x17xbf16>, vector<2x17xf32> -> vector<2x17xf32>
    %c0_19 = arith.constant 0 : index
    %c0_20 = arith.constant 0 : index
    %42 = vector.load %arg11[%c0_19, %c0_20] : memref<16x17xbf16, #tpu.memory_space<vmem>>, vector<16x17xbf16>
    %cst_21 = arith.constant dense<0.000000e+00> : vector<2x17xf32>
    %43 = tpu.matmul %39, %42, %cst_21 {dimension_numbers = #tpu.dot_dimension_numbers<[1], [0], [0], [1], [0, 0, 1, 1], [], []>} : vector<2x16xbf16>, vector<16x17xbf16>, vector<2x17xf32> -> vector<2x17xf32>
    %44 = arith.addf %41, %43 : vector<2x17xf32>
    %c0_22 = arith.constant 0 : index
    %c0_23 = arith.constant 0 : index
    %45 = vector.load %arg12[%c0_22, %c0_23] : memref<1x17xf32, #tpu.memory_space<vmem>>, vector<1x17xf32>
    %46 = vector.broadcast %45 : vector<1x17xf32> to vector<2x17xf32>
    %47 = arith.addf %44, %46 : vector<2x17xf32>
    %48 = vector.extract_strided_slice %47 {offsets = [0, 0], sizes = [2, 16], strides = [1, 1]} : vector<2x17xf32> to vector<2x16xf32>
    %49 = vector.extract_strided_slice %47 {offsets = [0, 16], sizes = [2, 1], strides = [1, 1]} : vector<2x17xf32> to vector<2x1xf32>
    %c0_24 = arith.constant 0 : index
    %c0_25 = arith.constant 0 : index
    %c0_26 = arith.constant 0 : index
    %50 = vector.load %arg6[%c0_24, %c0_25, %c0_26] : memref<2x8x16xf32, #tpu.memory_space<vmem>>, vector<2x8x16xf32>
    %51 = vector.shape_cast %48 : vector<2x16xf32> to vector<2x1x16xf32>
    %52 = vector.broadcast %51 : vector<2x1x16xf32> to vector<2x8x16xf32>
    %53 = arith.addf %50, %52 : vector<2x8x16xf32>
    %54 = math.tanh %53 : vector<2x8x16xf32>
    %c0_27 = arith.constant 0 : index
    %c0_28 = arith.constant 0 : index
    %55 = vector.load %arg8[%c0_27, %c0_28] : memref<1x16xf32, #tpu.memory_space<vmem>>, vector<1x16xf32>
    %56 = vector.shape_cast %55 : vector<1x16xf32> to vector<1x1x16xf32>
    %57 = vector.broadcast %56 : vector<1x1x16xf32> to vector<2x8x16xf32>
    %58 = arith.mulf %57, %54 : vector<2x8x16xf32>
    %cst_29 = arith.constant dense<0.000000e+00> : vector<2x8xf32>
    %59 = vector.multi_reduction <add>, %58, %cst_29 [2] : vector<2x8x16xf32> to vector<2x8xf32>
    %cst_30 = arith.constant dense<0xFF800000> : vector<2xf32>
    %60 = vector.multi_reduction <maximumf>, %59, %cst_30 [1] : vector<2x8xf32> to vector<2xf32>
    %61 = vector.shape_cast %60 : vector<2xf32> to vector<2x1xf32>
    %62 = vector.broadcast %61 : vector<2x1xf32> to vector<2x8xf32>
    %63 = arith.subf %59, %62 : vector<2x8xf32>
    %64 = math.exp %63 : vector<2x8xf32>
    %c0_31 = arith.constant 0 : index
    %c0_32 = arith.constant 0 : index
    %65 = vector.load %arg9[%c0_31, %c0_32] : memref<2x8xf32, #tpu.memory_space<vmem>>, vector<2x8xf32>
    %66 = arith.mulf %64, %65 : vector<2x8xf32>
    %cst_33 = arith.constant dense<0.000000e+00> : vector<2xf32>
    %67 = vector.multi_reduction <add>, %66, %cst_33 [1] : vector<2x8xf32> to vector<2xf32>
    %68 = vector.shape_cast %67 : vector<2xf32> to vector<2x1xf32>
    %cst_34 = arith.constant 9.99999971E-10 : f32
    %69 = vector.broadcast %cst_34 : f32 to vector<2x1xf32>
    %70 = arith.maximumf %68, %69 : vector<2x1xf32>
    %71 = vector.broadcast %70 : vector<2x1xf32> to vector<2x8xf32>
    %72 = arith.divf %66, %71 : vector<2x8xf32>
    %73 = vector.shape_cast %72 : vector<2x8xf32> to vector<2x8x1xf32>
    %c0_35 = arith.constant 0 : index
    %c0_36 = arith.constant 0 : index
    %c0_37 = arith.constant 0 : index
    %74 = vector.load %arg7[%c0_35, %c0_36, %c0_37] : memref<2x8x32xf32, #tpu.memory_space<vmem>>, vector<2x8x32xf32>
    %75 = vector.broadcast %73 : vector<2x8x1xf32> to vector<2x8x32xf32>
    %76 = arith.mulf %75, %74 : vector<2x8x32xf32>
    %cst_38 = arith.constant dense<0.000000e+00> : vector<2x32xf32>
    %77 = vector.multi_reduction <add>, %76, %cst_38 [1] : vector<2x8x32xf32> to vector<2x32xf32>
    %c0_39 = arith.constant 0 : index
    %c0_40 = arith.constant 0 : index
    %78 = vector.load %arg13[%c0_39, %c0_40] : memref<16x17xbf16, #tpu.memory_space<vmem>>, vector<16x17xbf16>
    %cst_41 = arith.constant dense<0.000000e+00> : vector<2x17xf32>
    %79 = tpu.matmul %38, %78, %cst_41 {dimension_numbers = #tpu.dot_dimension_numbers<[1], [0], [0], [1], [0, 0, 1, 1], [], []>} : vector<2x16xbf16>, vector<16x17xbf16>, vector<2x17xf32> -> vector<2x17xf32>
    %80 = arith.truncf %77 : vector<2x32xf32> to vector<2x32xbf16>
    %c0_42 = arith.constant 0 : index
    %c0_43 = arith.constant 0 : index
    %81 = vector.load %arg14[%c0_42, %c0_43] : memref<32x17xbf16, #tpu.memory_space<vmem>>, vector<32x17xbf16>
    %cst_44 = arith.constant dense<0.000000e+00> : vector<2x17xf32>
    %82 = tpu.matmul %80, %81, %cst_44 {dimension_numbers = #tpu.dot_dimension_numbers<[1], [0], [0], [1], [0, 0, 1, 1], [], []>} : vector<2x32xbf16>, vector<32x17xbf16>, vector<2x17xf32> -> vector<2x17xf32>
    %83 = arith.addf %79, %82 : vector<2x17xf32>
    %c0_45 = arith.constant 0 : index
    %c0_46 = arith.constant 0 : index
    %84 = vector.load %arg15[%c0_45, %c0_46] : memref<1x17xf32, #tpu.memory_space<vmem>>, vector<1x17xf32>
    %85 = vector.broadcast %84 : vector<1x17xf32> to vector<2x17xf32>
    %86 = arith.addf %83, %85 : vector<2x17xf32>
    %87 = vector.extract_strided_slice %86 {offsets = [0, 0], sizes = [2, 16], strides = [1, 1]} : vector<2x17xf32> to vector<2x16xf32>
    %c0_47 = arith.constant 0 : index
    %c0_48 = arith.constant 0 : index
    %c0_49 = arith.constant 0 : index
    %88 = vector.load %arg16[%c0_47, %c0_48, %c0_49] : memref<1x2x16xf32, #tpu.memory_space<vmem>>, vector<1x2x16xf32>
    %89 = vector.shape_cast %88 : vector<1x2x16xf32> to vector<2x16xf32>
    %90 = vector.shape_cast %87 : vector<2x16xf32> to vector<1x2x16xf32>
    tpu.vector_store %arg16[%c0_47, %c0_48, %c0_49], %90 {strides = array<i32>} : memref<1x2x16xf32, #tpu.memory_space<vmem>>, vector<1x2x16xf32>,
    %c0_50 = arith.constant 0 : index
    %c0_51 = arith.constant 0 : index
    %c0_52 = arith.constant 0 : index
    %91 = vector.load %arg17[%c0_50, %c0_51, %c0_52] : memref<1x2x8xf32, #tpu.memory_space<vmem>>, vector<1x2x8xf32>
    %92 = vector.shape_cast %91 : vector<1x2x8xf32> to vector<2x8xf32>
    %93 = vector.shape_cast %72 : vector<2x8xf32> to vector<1x2x8xf32>
    tpu.vector_store %arg17[%c0_50, %c0_51, %c0_52], %93 {strides = array<i32>} : memref<1x2x8xf32, #tpu.memory_space<vmem>>, vector<1x2x8xf32>,
    %94 = vector.extract_strided_slice %86 {offsets = [0, 16], sizes = [2, 1], strides = [1, 1]} : vector<2x17xf32> to vector<2x1xf32>
    %95 = arith.addf %94, %49 : vector<2x1xf32>
    %c0_53 = arith.constant 0 : index
    %c0_54 = arith.constant 0 : index
    %c0_55 = arith.constant 0 : index
    %96 = vector.load %arg2[%c0_53, %c0_54, %c0_55] : memref<1x2x1xf32, #tpu.memory_space<vmem>>, vector<1x2x1xf32>
    %97 = vector.shape_cast %96 : vector<1x2x1xf32> to vector<2x1xf32>
    %98 = arith.addf %95, %97 : vector<2x1xf32>
    %99 = arith.negf %98 : vector<2x1xf32>
    %100 = math.exp %99 : vector<2x1xf32>
    %cst_56 = arith.constant 1.000000e+00 : f32
    %101 = vector.broadcast %cst_56 : f32 to vector<2x1xf32>
    %102 = arith.addf %101, %100 : vector<2x1xf32>
    %103 = arith.divf %101, %102 : vector<2x1xf32>
    %c0_57 = arith.constant 0 : index
    %c0_58 = arith.constant 0 : index
    %c0_59 = arith.constant 0 : index
    %104 = vector.load %arg18[%c0_57, %c0_58, %c0_59] : memref<1x2x1xf32, #tpu.memory_space<vmem>>, vector<1x2x1xf32>
    %105 = vector.shape_cast %104 : vector<1x2x1xf32> to vector<2x1xf32>
    %106 = vector.shape_cast %103 : vector<2x1xf32> to vector<1x2x1xf32>
    tpu.vector_store %arg18[%c0_57, %c0_58, %c0_59], %106 {strides = array<i32>} : memref<1x2x1xf32, #tpu.memory_space<vmem>>, vector<1x2x1xf32>,
    return
  }
  func.func @transform_0(%arg0: i32) -> (i32, i32, i32) {
    %c0_i32 = arith.constant 0 : i32
    %c0_i32_0 = arith.constant 0 : i32
    %c0_i32_1 = arith.constant 0 : i32
    return %arg0, %c0_i32, %c0_i32_0 : i32, i32, i32
  }
  func.func @transform_1(%arg0: i32) -> (i32, i32, i32) {
    %c0_i32 = arith.constant 0 : i32
    %c0_i32_0 = arith.constant 0 : i32
    %c0_i32_1 = arith.constant 0 : i32
    return %arg0, %c0_i32, %c0_i32_0 : i32, i32, i32
  }
  func.func @transform_2(%arg0: i32) -> (i32, i32) {
    %c0_i32 = arith.constant 0 : i32
    %c0_i32_0 = arith.constant 0 : i32
    %c0_i32_1 = arith.constant 0 : i32
    return %c0_i32, %c0_i32_0 : i32, i32
  }
  func.func @transform_3(%arg0: i32) -> (i32, i32) {
    %c0_i32 = arith.constant 0 : i32
    %c0_i32_0 = arith.constant 0 : i32
    %c0_i32_1 = arith.constant 0 : i32
    return %c0_i32, %c0_i32_0 : i32, i32
  }
  func.func @transform_4(%arg0: i32) -> (i32, i32) {
    %c0_i32 = arith.constant 0 : i32
    %c0_i32_0 = arith.constant 0 : i32
    %c0_i32_1 = arith.constant 0 : i32
    return %c0_i32, %c0_i32_0 : i32, i32
  }
  func.func @transform_5(%arg0: i32) -> (i32, i32, i32) {
    %c0_i32 = arith.constant 0 : i32
    %c0_i32_0 = arith.constant 0 : i32
    %c0_i32_1 = arith.constant 0 : i32
    %c0_i32_2 = arith.constant 0 : i32
    return %c0_i32, %c0_i32_0, %c0_i32_1 : i32, i32, i32
  }
  func.func @transform_6(%arg0: i32) -> (i32, i32, i32) {
    %c0_i32 = arith.constant 0 : i32
    %c0_i32_0 = arith.constant 0 : i32
    %c0_i32_1 = arith.constant 0 : i32
    %c0_i32_2 = arith.constant 0 : i32
    return %c0_i32, %c0_i32_0, %c0_i32_1 : i32, i32, i32
  }
  func.func @transform_7(%arg0: i32) -> (i32, i32) {
    %c0_i32 = arith.constant 0 : i32
    %c0_i32_0 = arith.constant 0 : i32
    %c0_i32_1 = arith.constant 0 : i32
    return %c0_i32, %c0_i32_0 : i32, i32
  }
  func.func @transform_8(%arg0: i32) -> (i32, i32) {
    %c0_i32 = arith.constant 0 : i32
    %c0_i32_0 = arith.constant 0 : i32
    %c0_i32_1 = arith.constant 0 : i32
    return %c0_i32, %c0_i32_0 : i32, i32
  }
  func.func @transform_9(%arg0: i32) -> (i32, i32) {
    %c0_i32 = arith.constant 0 : i32
    %c0_i32_0 = arith.constant 0 : i32
    %c0_i32_1 = arith.constant 0 : i32
    return %c0_i32, %c0_i32_0 : i32, i32
  }
  func.func @transform_10(%arg0: i32) -> (i32, i32) {
    %c0_i32 = arith.constant 0 : i32
    %c0_i32_0 = arith.constant 0 : i32
    %c0_i32_1 = arith.constant 0 : i32
    return %c0_i32, %c0_i32_0 : i32, i32
  }
  func.func @transform_11(%arg0: i32) -> (i32, i32) {
    %c0_i32 = arith.constant 0 : i32
    %c0_i32_0 = arith.constant 0 : i32
    %c0_i32_1 = arith.constant 0 : i32
    return %c0_i32, %c0_i32_0 : i32, i32
  }
  func.func @transform_12(%arg0: i32) -> (i32, i32) {
    %c0_i32 = arith.constant 0 : i32
    %c0_i32_0 = arith.constant 0 : i32
    %c0_i32_1 = arith.constant 0 : i32
    return %c0_i32, %c0_i32_0 : i32, i32
  }
  func.func @transform_13(%arg0: i32) -> (i32, i32) {
    %c0_i32 = arith.constant 0 : i32
    %c0_i32_0 = arith.constant 0 : i32
    %c0_i32_1 = arith.constant 0 : i32
    return %c0_i32, %c0_i32_0 : i32, i32
  }
  func.func @transform_14(%arg0: i32) -> (i32, i32) {
    %c0_i32 = arith.constant 0 : i32
    %c0_i32_0 = arith.constant 0 : i32
    %c0_i32_1 = arith.constant 0 : i32
    return %c0_i32, %c0_i32_0 : i32, i32
  }
  func.func @transform_15(%arg0: i32) -> (i32, i32, i32) {
    %c0_i32 = arith.constant 0 : i32
    %c0_i32_0 = arith.constant 0 : i32
    %c0_i32_1 = arith.constant 0 : i32
    return %arg0, %c0_i32, %c0_i32_0 : i32, i32, i32
  }
  func.func @transform_16(%arg0: i32) -> (i32, i32, i32) {
    %c0_i32 = arith.constant 0 : i32
    %c0_i32_0 = arith.constant 0 : i32
    %c0_i32_1 = arith.constant 0 : i32
    return %arg0, %c0_i32, %c0_i32_0 : i32, i32, i32
  }
  func.func @transform_17(%arg0: i32) -> (i32, i32, i32) {
    %c0_i32 = arith.constant 0 : i32
    %c0_i32_0 = arith.constant 0 : i32
    %c0_i32_1 = arith.constant 0 : i32
    return %arg0, %c0_i32, %c0_i32_0 : i32, i32, i32
  }
}

module attributes {stable_mosaic.version = 11 : i64} {
  func.func @_vocab_pointer_kernel(%arg0: i32, %arg1: memref<8x16xf32, #tpu.memory_space<vmem>>, %arg2: memref<8x1xf32, #tpu.memory_space<vmem>>, %arg3: memref<16x50xbf16, #tpu.memory_space<vmem>>, %arg4: memref<1x50xf32, #tpu.memory_space<vmem>>, %arg5: memref<8x53xf32, #tpu.memory_space<vmem>>) attributes {dimension_semantics = [#tpu.dimension_semantics<parallel>], iteration_bounds = array<i64: 1>, scalar_prefetch = 0 : i64, scratch_operands = 0 : i64, tpu.core_type = #tpu.core_type<tc>, window_params = [{transform_indices = @transform_0, window_bounds = array<i64: 8, 16>}, {transform_indices = @transform_1, window_bounds = array<i64: 8, 1>}, {pipeline_mode = #tpu.pipeline_mode<synchronous>, transform_indices = @transform_2, window_bounds = array<i64: 16, 50>}, {pipeline_mode = #tpu.pipeline_mode<synchronous>, transform_indices = @transform_3, window_bounds = array<i64: 1, 50>}, {transform_indices = @transform_4, window_bounds = array<i64: 8, 53>}]} {
    %c0 = arith.constant 0 : index
    %c0_0 = arith.constant 0 : index
    %0 = vector.load %arg1[%c0, %c0_0] : memref<8x16xf32, #tpu.memory_space<vmem>>, vector<8x16xf32>
    %1 = arith.truncf %0 : vector<8x16xf32> to vector<8x16xbf16>
    %c0_1 = arith.constant 0 : index
    %c0_2 = arith.constant 0 : index
    %2 = vector.load %arg3[%c0_1, %c0_2] : memref<16x50xbf16, #tpu.memory_space<vmem>>, vector<16x50xbf16>
    %cst = arith.constant dense<0.000000e+00> : vector<8x50xf32>
    %3 = tpu.matmul %1, %2, %cst {dimension_numbers = #tpu.dot_dimension_numbers<[1], [0], [0], [1], [0, 0, 1, 1], [], []>} : vector<8x16xbf16>, vector<16x50xbf16>, vector<8x50xf32> -> vector<8x50xf32>
    %c0_3 = arith.constant 0 : index
    %c0_4 = arith.constant 0 : index
    %4 = vector.load %arg4[%c0_3, %c0_4] : memref<1x50xf32, #tpu.memory_space<vmem>>, vector<1x50xf32>
    %5 = vector.broadcast %4 : vector<1x50xf32> to vector<8x50xf32>
    %6 = arith.addf %3, %5 : vector<8x50xf32>
    %cst_5 = arith.constant dense<0xFF800000> : vector<8xf32>
    %7 = vector.multi_reduction <maximumf>, %6, %cst_5 [1] : vector<8x50xf32> to vector<8xf32>
    %8 = vector.shape_cast %7 : vector<8xf32> to vector<8x1xf32>
    %9 = vector.broadcast %8 : vector<8x1xf32> to vector<8x50xf32>
    %10 = arith.subf %6, %9 : vector<8x50xf32>
    %11 = math.exp %10 : vector<8x50xf32>
    %cst_6 = arith.constant dense<0.000000e+00> : vector<8xf32>
    %12 = vector.multi_reduction <add>, %11, %cst_6 [1] : vector<8x50xf32> to vector<8xf32>
    %13 = vector.shape_cast %12 : vector<8xf32> to vector<8x1xf32>
    %14 = vector.broadcast %13 : vector<8x1xf32> to vector<8x50xf32>
    %15 = arith.divf %11, %14 : vector<8x50xf32>
    %c0_7 = arith.constant 0 : index
    %c0_8 = arith.constant 0 : index
    %16 = vector.load %arg2[%c0_7, %c0_8] : memref<8x1xf32, #tpu.memory_space<vmem>>, vector<8x1xf32>
    %17 = vector.broadcast %16 : vector<8x1xf32> to vector<8x50xf32>
    %18 = arith.mulf %17, %15 : vector<8x50xf32>
    %cst_9 = arith.constant 0.000000e+00 : f32
    %19 = vector.broadcast %cst_9 : f32 to vector<8x3xf32>
    %20 = tpu.concatenate %18, %19 in 1 : vector<8x50xf32>, vector<8x3xf32> -> vector<8x53xf32>
    %c0_10 = arith.constant 0 : index
    %c0_11 = arith.constant 0 : index
    %21 = vector.load %arg5[%c0_10, %c0_11] : memref<8x53xf32, #tpu.memory_space<vmem>>, vector<8x53xf32>
    tpu.vector_store %arg5[%c0_10, %c0_11], %20 {strides = array<i32>} : memref<8x53xf32, #tpu.memory_space<vmem>>, vector<8x53xf32>,
    return
  }
  func.func @transform_0(%arg0: i32) -> (i32, i32) {
    %c0_i32 = arith.constant 0 : i32
    %c0_i32_0 = arith.constant 0 : i32
    return %arg0, %c0_i32 : i32, i32
  }
  func.func @transform_1(%arg0: i32) -> (i32, i32) {
    %c0_i32 = arith.constant 0 : i32
    %c0_i32_0 = arith.constant 0 : i32
    return %arg0, %c0_i32 : i32, i32
  }
  func.func @transform_2(%arg0: i32) -> (i32, i32) {
    %c0_i32 = arith.constant 0 : i32
    %c0_i32_0 = arith.constant 0 : i32
    %c0_i32_1 = arith.constant 0 : i32
    return %c0_i32, %c0_i32_0 : i32, i32
  }
  func.func @transform_3(%arg0: i32) -> (i32, i32) {
    %c0_i32 = arith.constant 0 : i32
    %c0_i32_0 = arith.constant 0 : i32
    %c0_i32_1 = arith.constant 0 : i32
    return %c0_i32, %c0_i32_0 : i32, i32
  }
  func.func @transform_4(%arg0: i32) -> (i32, i32) {
    %c0_i32 = arith.constant 0 : i32
    %c0_i32_0 = arith.constant 0 : i32
    return %arg0, %c0_i32 : i32, i32
  }
}

</mosaic_0001>

<bundles_post_ra>
// kernel: run_model.16
= control target key start
LH: loop header
LB: loop body
LE: loop exit
PB: predicated region body
PF: predicated region fallthrough
CT: control target
= control target key end

     0   :  { %v97_v0 = vmov 0.0   ;;  %vm98_vm0 = vmmov 0   ;;  %vm32_vm1 = vcmask 130048   ;;  %vm77_vm2 = vcmask 125952   ;;  %s131_s1 = inlined_call_operand.vmem [shape: bf16[16,16], index: 1, kind: input, shape index: {}]   ;;  %s132_s0 = inlined_call_operand.vmem [shape: f32[8,16], index: 0, kind: input, shape index: {}]   ;;  %s133_s2 = inlined_call_operand.vmem [shape: f32[1,16], index: 2, kind: input, shape index: {}]   ;;  %s134_s3 = inlined_call_operand.vmem [shape: bf16[8,16], index: 3, kind: output, shape index: {}]  }
   0x1   :  { %88 = vmatprep.subr.bf16.mxu0 %v97_v0  ;;  %v96_v1 = vld [vmem:[%s131_s1] sm:$0xff]   ;;  %90 = vmatprep.mubr.msk.bf16.mxu0 %vm98_vm0, %v97_v0 }
   0x2   :  { %v15_v2 = vld [vmem:[%s132_s0] sm:$0xff]  ;;  %89 = vmatpush3.bf16.msra.mxu0 %v96_v1 }
   0x3   :  { %v16_v3 = vpack.c.bf16 %v15_v2, %v15_v2  ;;  %v83_v4 = vld [vmem:[%s133_s2] ss:$0 sm:$0xff] }
   0x5   :  { %91 = vmatmul.mubr.msk.bf16.vlgmr.msra.gmra.mrb[0].mxu0 %vm32_vm1, %v16_v3 }
  0xd8   :  { %v70_v5 = vpop.f32.mrb[0].mxu0 }
  0xd9   :  { %v71_v6 = vadd.f32 %v83_v4, %v70_v5  ;;  %v92_v7 = vpop.f32.mrb[1].mxu0 }
  0xda   :  { %v73_v8 = vpop.f32.mrb[2].mxu0 }
  0xdb   :  { %v76_v9 = vpack.c.bf16 %v71_v6, %v71_v6  ;;  %v93_v10 = vpop.f32.mrb[3].mxu0 }
  0xdd   :  { %78 = vst.msk [vmem:[%s134_s3] sm:$0xf] %vm77_vm2, %v76_v9 }

// kernel: run_model.17
= control target key start
LH: loop header
LB: loop body
LE: loop exit
PB: predicated region body
PF: predicated region fallthrough
CT: control target
= control target key end

     0   :  { %v95_v0 = vmov 0.0   ;;  %vm96_vm0 = vmmov 0   ;;  %vm31_vm1 = vcmask 130048   ;;  %vm75_vm2 = vcmask 531456   ;;  %s129_s1 = inlined_call_operand.vmem [shape: bf16[16,65], index: 1, kind: input, shape index: {}]   ;;  %s130_s0 = inlined_call_operand.vmem [shape: bf16[8,16], index: 0, kind: input, shape index: {}]   ;;  %s131_s2 = inlined_call_operand.vmem [shape: f32[1,65], index: 2, kind: input, shape index: {}]   ;;  %s132_s3 = inlined_call_operand.vmem [shape: f32[8,65], index: 3, kind: output, shape index: {}]  }
   0x1   :  { %86 = vmatprep.subr.bf16.mxu0 %v95_v0  ;;  %v94_v1 = vld [vmem:[%s129_s1] sm:$0xff]   ;;  %88 = vmatprep.mubr.msk.bf16.mxu0 %vm96_vm0, %v95_v0 }
   0x2   :  { %87 = vmatpush3.bf16.msra.mxu0 %v94_v1  ;;  %v15_v2 = vld [vmem:[%s130_s0] sm:$0xf] }
   0x3   :  { %v81_v3 = vld [vmem:[%s131_s2] ss:$0 sm:$0xff] }
   0x5   :  { %89 = vmatmul.mubr.msk.bf16.vlgmr.msra.gmra.mrb[0].mxu0 %vm31_vm1, %v15_v2 }
  0xd8   :  { %v69_v4 = vpop.f32.mrb[0].mxu0 }
  0xd9   :  { %v70_v5 = vadd.f32 %v81_v3, %v69_v4  ;;  %v90_v6 = vpop.f32.mrb[1].mxu0 }
  0xda   :  { %v72_v7 = vpop.f32.mrb[2].mxu0 }
  0xdb   :  { %76 = vst.msk [vmem:[%s132_s3] sm:$0xff] %vm75_vm2, %v70_v5  ;;  %v91_v8 = vpop.f32.mrb[3].mxu0 }

// kernel: run_model.10
= control target key start
LH: loop header
LB: loop body
LE: loop exit
PB: predicated region body
PF: predicated region fallthrough
CT: control target
= control target key end

     0   :  { %v99_v0 = vmov 0.0   ;;  %vm100_vm0 = vmmov 0   ;;  %vm33_vm1 = vcmask 130048   ;;  %vm78_vm2 = vcmask 523264   ;;  %s139_s1 = inlined_call_operand.vmem [shape: bf16[16,64], index: 1, kind: input, shape index: {}]   ;;  %s140_s0 = inlined_call_operand.vmem [shape: f32[16,16], index: 0, kind: input, shape index: {}]   ;;  %s141_s2 = inlined_call_operand.vmem [shape: f32[1,64], index: 2, kind: input, shape index: {}]   ;;  %s142_s3 = inlined_call_operand.vmem [shape: f32[16,64], index: 3, kind: output, shape index: {}]  }
   0x1   :  { %90 = vmatprep.subr.bf16.mxu0 %v99_v0  ;;  %v98_v1 = vld [vmem:[%s139_s1] sm:$0xff]   ;;  %92 = vmatprep.mubr.msk.bf16.mxu0 %vm100_vm0, %v99_v0  ;;  %v16_v3 = vld [vmem:[%s140_s0 + $0x8] sm:$0xff] }
   0x2   :  { %v15_v2 = vld [vmem:[%s140_s0] sm:$0xff]  ;;  %91 = vmatpush3.bf16.msra.mxu0 %v98_v1 }
   0x3   :  { %v17_v4 = vpack.c.bf16 %v16_v3, %v15_v2  ;;  %v85_v5 = vld [vmem:[%s141_s2] ss:$0 sm:$0xff] }
   0x5   :  { %93 = vmatmul.mubr.msk.bf16.vlgmr.msra.gmra.mrb[0].mxu0 %vm33_vm1, %v17_v4 }
  0xd8   :  { %v71_v6 = vpop.f32.mrb[0].mxu0 }
  0xd9   :  { %v72_v7 = vadd.f32 %v85_v5, %v71_v6  ;;  %v94_v8 = vpop.f32.mrb[1].mxu0 }
  0xda   :  { %v74_v9 = vpop.f32.mrb[2].mxu0 }
  0xdb   :  { %79 = vst.msk [vmem:[%s142_s3] sm:$0xff] %vm78_vm2, %v72_v7  ;;  %v75_v10 = vadd.f32 %v85_v5, %v74_v9  ;;  %v95_v11 = vpop.f32.mrb[3].mxu0 }
  0xdd   :  { %80 = vst.msk [vmem:[%s142_s3 + $0x8] sm:$0xff] %vm78_vm2, %v75_v10 }

// kernel: run_model.14
= control target key start
LH: loop header
LB: loop body
LE: loop exit
PB: predicated region body
PF: predicated region fallthrough
CT: control target
= control target key end

     0   :  { %v109_v0 = vmov 0.0   ;;  %vm110_vm0 = vmmov 0   ;;  %vm40_vm1 = vcmask 261120   ;;  %vm84_vm2 = vcmask 123904   ;;  %s146_s1 = inlined_call_operand.vmem [shape: bf16[32,16], index: 1, kind: input, shape index: {}]   ;;  %s147_s0 = inlined_call_operand.vmem [shape: f32[2,32], index: 0, kind: input, shape index: {}]   ;;  %s148_s2 = inlined_call_operand.vmem [shape: f32[1,16], index: 2, kind: input, shape index: {}]   ;;  %s149_s3 = inlined_call_operand.vmem [shape: f32[2,16], index: 3, kind: output, shape index: {}]  }
   0x1   :  { %97 = vmatprep.subr.bf16.mxu0 %v109_v0  ;;  %v107_v1 = vld [vmem:[%s146_s1] sm:$0xff]   ;;  %101 = vmatprep.mubr.msk.bf16.mxu0 %vm110_vm0, %v109_v0  ;;  %v108_v2 = vld [vmem:[%s146_s1 + $0x8] sm:$0xff]  }
   0x2   :  { %98 = vmatpush3.bf16.msra.mxu0 %v107_v1  ;;  %v15_v3 = vld [vmem:[%s147_s0] sm:$0x3] }
   0x3   :  { %99 = vmatprep.subr.bf16.mxu0 %v109_v0  ;;  %v16_v4 = vpack.c.bf16 %v15_v3, %v15_v3  ;;  %v90_v5 = vld [vmem:[%s148_s2] ss:$0 sm:$0xff] }
   0x6   :  { %100 = vmatpush3.bf16.msra.mxu0 %v108_v2 }
   0x9   :  { %102 = vmatmul.mubr.msk.bf16.vlgmr.msra.gmra.mrb[0].mxu0 %vm40_vm1, %v16_v4 }
  0xdc   :  { %v78_v6 = vpop.f32.mrb[0].mxu0 }
  0xdd   :  { %v79_v7 = vadd.f32 %v90_v5, %v78_v6  ;;  %v103_v8 = vpop.f32.mrb[1].mxu0 }
  0xde   :  { %v81_v9 = vpop.f32.mrb[2].mxu0 }
  0xdf   :  { %85 = vst.msk [vmem:[%s149_s3] sm:$0x3] %vm84_vm2, %v79_v7  ;;  %v104_v10 = vpop.f32.mrb[3].mxu0 }

// kernel: run_model.15
= control target key start
LH: loop header
LB: loop body
LE: loop exit
PB: predicated region body
PF: predicated region fallthrough
CT: control target
= control target key end

     0   :  { %v112_v0 = vmov 0.0   ;;  %vm113_vm0 = vmmov 0   ;;  %vm41_vm1 = vcmask 261120   ;;  %vm86_vm2 = vcmask 130048   ;;  %s155_s1 = inlined_call_operand.vmem [shape: bf16[32,16], index: 1, kind: input, shape index: {}]   ;;  %s156_s0 = inlined_call_operand.vmem [shape: f32[16,32], index: 0, kind: input, shape index: {}]   ;;  %s157_s2 = inlined_call_operand.vmem [shape: f32[1,16], index: 2, kind: input, shape index: {}]   ;;  %s158_s3 = inlined_call_operand.vmem [shape: f32[16,16], index: 3, kind: output, shape index: {}]  }
   0x1   :  { %100 = vmatprep.subr.bf16.mxu0 %v112_v0  ;;  %v110_v1 = vld [vmem:[%s155_s1] sm:$0xff]   ;;  %104 = vmatprep.mubr.msk.bf16.mxu0 %vm113_vm0, %v112_v0  ;;  %v111_v2 = vld [vmem:[%s155_s1 + $0x8] sm:$0xff]  }
   0x2   :  { %101 = vmatpush3.bf16.msra.mxu0 %v110_v1  ;;  %v15_v3 = vld [vmem:[%s156_s0] sm:$0xff]  ;;  %v16_v4 = vld [vmem:[%s156_s0 + $0x8] sm:$0xff] }
   0x3   :  { %102 = vmatprep.subr.bf16.mxu0 %v112_v0  ;;  %v17_v5 = vpack.c.bf16 %v16_v4, %v15_v3  ;;  %v93_v6 = vld [vmem:[%s157_s2] ss:$0 sm:$0xff] }
   0x6   :  { %103 = vmatpush3.bf16.msra.mxu0 %v111_v2 }
   0x9   :  { %105 = vmatmul.mubr.msk.bf16.vlgmr.msra.gmra.mrb[0].mxu0 %vm41_vm1, %v17_v5 }
  0xdc   :  { %v79_v7 = vpop.f32.mrb[0].mxu0 }
  0xdd   :  { %v80_v8 = vadd.f32 %v93_v6, %v79_v7  ;;  %v106_v9 = vpop.f32.mrb[1].mxu0 }
  0xde   :  { %v82_v10 = vpop.f32.mrb[2].mxu0 }
  0xdf   :  { %87 = vst.msk [vmem:[%s158_s3] sm:$0xff] %vm86_vm2, %v80_v8  ;;  %v83_v11 = vadd.f32 %v93_v6, %v82_v10  ;;  %v107_v12 = vpop.f32.mrb[3].mxu0 }
  0xe1   :  { %88 = vst.msk [vmem:[%s158_s3 + $0x8] sm:$0xff] %vm86_vm2, %v83_v11 }

// kernel: run_model.12
= control target key start
LH: loop header
LB: loop body
LE: loop exit
PB: predicated region body
PF: predicated region fallthrough
CT: control target
= control target key end

     0   :  { %vm64_vm0 = vcmask 123904   ;;  %v1760_v0 = vmov 0.0   ;;  %vm1761_vm1 = vmmov 0   ;;  %vm85_vm2 = vcmask 130048   ;;  %s1762_s25 = smov 16   ;;  %s1763_s11 = smov 96   ;;  %s2257_s2 = inlined_call_operand.vmem [shape: bf16[16,64], index: 2, kind: input, shape index: {}]   ;;  %s2258_s3 = inlined_call_operand.vmem [shape: bf16[16,64], index: 3, kind: input, shape index: {}]   ;;  %s2259_s6 = inlined_call_operand.vmem [shape: f32[2,16], index: 6, kind: output, shape index: {2}]   ;;  %s2260_s8 = inlined_call_operand.vmem [shape: f32[2,16], index: 8, kind: output, shape index: {4}]   ;;  %s2261_s7 = inlined_call_operand.vmem [shape: f32[2,16], index: 7, kind: output, shape index: {3}]   ;;  %s2262_s9 = inlined_call_operand.vmem [shape: f32[2,16], index: 9, kind: output, shape index: {5}]   ;;  %s2263_s0 = inlined_call_operand.vmem [shape: f32[8,2,64], index: 0, kind: input, shape index: {}]   ;;  %s2264_s1 = inlined_call_operand.vmem [shape: f32[8,2,64], index: 1, kind: input, shape index: {}]   ;;  %s2265_s4 = inlined_call_operand.vmem [shape: f32[8,2,16], index: 4, kind: output, shape index: {0}]   ;;  %s2266_s5 = inlined_call_operand.vmem [shape: f32[8,2,16], index: 5, kind: output, shape index: {1}]  }
   0x1   :  { %1527 = vmatprep.subr.bf16.mxu0 %v1760_v0  ;;  %v1821_v1 = vld [vmem:[%s2257_s2] sm:$0xff]   ;;  %1533 = vmatprep.subr.bf16.mxu1 %v1760_v0  ;;  %65 = vst.msk [vmem:[%s2259_s6] sm:$0x3] %vm64_vm0, %v1760_v0  ;;  %67 = vst.msk [vmem:[%s2260_s8] sm:$0x3] %vm64_vm0, %v1760_v0  ;;  %s1764_s12 = smov 32  }
   0x2   :  { %66 = vst.msk [vmem:[%s2261_s7] sm:$0x3] %vm64_vm0, %v1760_v0  ;;  %68 = vst.msk [vmem:[%s2262_s9] sm:$0x3] %vm64_vm0, %v1760_v0  ;;  %v1847_v2 = vld [vmem:[%s2258_s3] sm:$0xff]   ;;  %1529 = vmatprep.mubr.msk.bf16.mxu0 %vm1761_vm1, %v1760_v0  ;;  %1535 = vmatprep.mubr.msk.bf16.mxu1 %vm1761_vm1, %v1760_v0  ;;  %s1765_s13 = smov 80  }
   0x3   :  { %1528 = vmatpush3.bf16.msra.mxu0 %v1821_v1  ;;  %1534 = vmatpush3.bf16.msra.mxu1 %v1847_v2  ;;  %v77_v9 = vld [vmem:[%s2263_s0] sm:$0x3]  ;;  %v1436_v10 = vld [vmem:[%s2264_s1 + $0xe] sm:$0x3]  ;;  %v1441_v53 = vld [vmem:[%s2263_s0 + $0x2] sm:$0x3] }
   0x4   :  { %1539 = vmatprep.subr.bf16.mxu0 %v1760_v0  ;;  %1545 = vmatprep.subr.bf16.mxu1 %v1760_v0  ;;  %v1445_v58 = vld [vmem:[%s2264_s1 + $0xc] sm:$0x3] }
   0x8   :  { %v73_v3 = vld [vmem:[%s2259_s6] sm:$0x3] }
   0x9   :  { %v75_v4 = vld [vmem:[%s2260_s8] sm:$0x3]  ;;  %v78_v6 = vpack.c.bf16 %v73_v3, %v73_v3 }
   0xa   :  { %v74_v5 = vld [vmem:[%s2261_s7] sm:$0x3]  ;;  %v166_v7 = vpack.c.bf16 %v75_v4, %v75_v4 }
   0xb   :  { %138 = vrot.lane.b32.xlu1 %v74_v5, %s1762_s25  ;;  %v76_v8 = vld [vmem:[%s2262_s9] sm:$0x3]  ;;  %1530 = vmatmul.mubr.msk.bf16.vlgmr.msra.gmra.mrb[0].mxu0 %vm85_vm2, %v78_v6 }
   0xc   :  { %1536 = vmatmul.mubr.msk.bf16.vlgmr.msra.gmra.mrb[0].mxu1 %vm85_vm2, %v166_v7  ;;  %1540 = vmatpush3.bf16.msra.mxu0 %v1821_v1 }
   0xd   :  { %1546 = vmatpush3.bf16.msra.mxu1 %v1847_v2  ;;  %1541 = vmatprep.mubr.msk.bf16.mxu0 %vm1761_vm1, %v1760_v0 }
   0xe   :  { %1547 = vmatprep.mubr.msk.bf16.mxu1 %vm1761_vm1, %v1760_v0  ;;  %1551 = vmatprep.subr.bf16.mxu0 %v1760_v0 }
   0xf   :  { %225 = vrot.lane.b32.xlu1 %v76_v8, %s1762_s25  ;;  %1557 = vmatprep.subr.bf16.mxu1 %v1760_v0 }
  0x7d   :  { %v139_v35 = vpop.permute.xlu1 %138 }
  0x81   :  { %v226_v37 = vpop.permute.xlu1 %225 }
  0xde   :  { %v123_v11 = vpop.f32.mrb[0].mxu0 }
  0xdf   :  { %v210_v12 = vpop.f32.mrb[0].mxu1  ;;  %v129_v13 = vadd.f32 %v123_v11, %v77_v9  ;;  %v1531_v14 = vpop.f32.mrb[1].mxu0 }
  0xe0   :  { %v216_v15 = vadd.f32 %v1436_v10, %v210_v12  ;;  %v1537_v16 = vpop.f32.mrb[1].mxu1  ;;  %v126_v17 = vpop.f32.mrb[2].mxu0 }
  0xe1   :  { %v213_v18 = vpop.f32.mrb[2].mxu1  ;;  %1632 = vtanh.f32 %v129_v13  ;;  %v1532_v19 = vpop.f32.mrb[3].mxu0  ;;  %v1435_v23 = vmul.f32 -1.442695, %v129_v13 }
  0xe2   :  { %v1538_v20 = vpop.f32.mrb[3].mxu1  ;;  %1634 = vtanh.f32 %v216_v15  ;;  %v1439_v24 = vmul.f32 -1.442695, %v216_v15 }
  0xe3   :  { %1636 = vpow2.f32 %v1435_v23 }
  0xe4   :  { %1638 = vpow2.f32 %v1439_v24 }
  0xeb   :  { %v1633_v21 = vpop.eup %1632 }
  0xec   :  { %143 = vrot.lane.b32.xlu0 %v1633_v21, %s1763_s11  ;;  %v1635_v22 = vpop.eup %1634 }
  0xed   :  { %v1637_v25 = vpop.eup %1636 }
  0xee   :  { %v133_v26 = vadd.f32 1.0, %v1637_v25  ;;  %v1639_v27 = vpop.eup %1638 }
  0xef   :  { %v220_v28 = vadd.f32 1.0, %v1639_v27 }
  0xf0   :  { %230 = vrot.lane.b32.xlu0 %v1635_v22, %s1763_s11  ;;  %1640 = vrcp.f32 %v133_v26 }
  0xf1   :  { %1642 = vrcp.f32 %v220_v28 }
  0xfa   :  { %v1641_v29 = vpop.eup %1640 }
  0xfb   :  { %v1643_v32 = vpop.eup %1642  ;;  %v141_v36 = vmul.f32 %v1641_v29, %v139_v35 }
  0xfc   :  { %v228_v40 = vmul.f32 %v1643_v32, %v226_v37 }
 0x15e   :  { %v144_v30 = vpop.permute.xlu0 %143 }
 0x15f   :  { %v146_v31 = vmul.f32 %v1641_v29, %v144_v30 }
 0x161   :  { %148 = vrot.lane.b32.xlu0 %v146_v31, %s1762_s25 }
 0x162   :  { %v231_v33 = vpop.permute.xlu0 %230 }
 0x163   :  { %v233_v34 = vmul.f32 %v1643_v32, %v231_v33 }
 0x165   :  { %235 = vrot.lane.b32.xlu1 %v233_v34, %s1762_s25  ;;  %v1449_v34 = vld [vmem:[%s2263_s0 + $0x4] sm:$0x3] }
 0x1d3   :  { %v149_v38 = vpop.permute.xlu0 %148 }
 0x1d4   :  { %v1891_v39 = vadd.f32 %v149_v38, %v141_v36 }
 0x1d6   :  { %1644 = vtanh.f32 %v1891_v39 }
 0x1d7   :  { %v236_v41 = vpop.permute.xlu1 %235 }
 0x1d8   :  { %v1894_v42 = vadd.f32 %v236_v41, %v228_v40 }
 0x1da   :  { %1646 = vtanh.f32 %v1894_v42 }
 0x1e0   :  { %v1645_v43 = vpop.eup %1644 }
 0x1e1   :  { %154 = vrot.lane.b32.xlu0 %v1645_v43, %s1764_s12 }
 0x1e4   :  { %v1647_v44 = vpop.eup %1646 }
 0x1e5   :  { %241 = vrot.lane.b32.xlu1 %v1647_v44, %s1764_s12 }
 0x253   :  { %v155_v45 = vpop.permute.xlu0 %154 }
 0x254   :  { %v1899_v46 = vmul.f32 %v1641_v29, %v155_v45 }
 0x256   :  { %v253_v47 = vpack.c.bf16 %v1899_v46, %v1899_v46 }
 0x257   :  { %v242_v48 = vpop.permute.xlu1 %241 }
 0x258   :  { %v1903_v49 = vmul.f32 %v1643_v32, %v242_v48  ;;  %255 = vrot.lane.b32.xlu0 %v253_v47, %s1765_s13 }
 0x25a   :  { %v333_v50 = vpack.c.bf16 %v1903_v49, %v1903_v49 }
 0x25c   :  { %335 = vrot.lane.b32.xlu1 %v333_v50, %s1765_s13 }
 0x2ca   :  { %v256_v51 = vpop.permute.xlu0 %255 }
 0x2cb   :  { %1542 = vmatmul.mubr.msk.bf16.vlgmr.msra.gmra.mrb[4].mxu0 %vm85_vm2, %v256_v51 }
 0x2cc   :  { %1552 = vmatpush3.bf16.msra.mxu0 %v1821_v1  ;;  %1553 = vmatprep.mubr.msk.bf16.mxu0 %vm1761_vm1, %v1760_v0 }
 0x2cd   :  { %1563 = vmatprep.subr.bf16.mxu0 %v1760_v0 }
 0x2ce   :  { %v336_v52 = vpop.permute.xlu1 %335 }
 0x2cf   :  { %1548 = vmatmul.mubr.msk.bf16.vlgmr.msra.gmra.mrb[4].mxu1 %vm85_vm2, %v336_v52 }
 0x2d0   :  { %1558 = vmatpush3.bf16.msra.mxu1 %v1847_v2  ;;  %1559 = vmatprep.mubr.msk.bf16.mxu1 %vm1761_vm1, %v1760_v0 }
 0x2d1   :  { %1569 = vmatprep.subr.bf16.mxu1 %v1760_v0 }
 0x39e   :  { %v294_v54 = vpop.f32.mrb[4].mxu0 }
 0x39f   :  { %v300_v55 = vadd.f32 %v1441_v53, %v294_v54  ;;  %v1543_v56 = vpop.f32.mrb[5].mxu0 }
 0x3a0   :  { %v297_v57 = vpop.f32.mrb[6].mxu0 }
 0x3a1   :  { %1648 = vtanh.f32 %v300_v55  ;;  %v1544_v59 = vpop.f32.mrb[7].mxu0  ;;  %v1443_v6 = vmul.f32 -1.442695, %v300_v55 }
 0x3a2   :  { %v374_v60 = vpop.f32.mrb[4].mxu1 }
 0x3a3   :  { %v380_v61 = vadd.f32 %v1445_v58, %v374_v60  ;;  %v1549_v62 = vpop.f32.mrb[5].mxu1 }
 0x3a4   :  { %v377_v63 = vpop.f32.mrb[6].mxu1 }
 0x3a5   :  { %1650 = vtanh.f32 %v380_v61  ;;  %v1550_v3 = vpop.f32.mrb[7].mxu1  ;;  %v1447_v7 = vmul.f32 -1.442695, %v380_v61 }
 0x3a6   :  { %1652 = vpow2.f32 %v1443_v6 }
 0x3a7   :  { %1654 = vpow2.f32 %v1447_v7 }
 0x3ab   :  { %v1649_v4 = vpop.eup %1648 }
 0x3ac   :  { %310 = vrot.lane.b32.xlu0 %v1649_v4, %s1763_s11 }
 0x3af   :  { %v1651_v5 = vpop.eup %1650 }
 0x3b0   :  { %390 = vrot.lane.b32.xlu1 %v1651_v5, %s1763_s11  ;;  %v1653_v8 = vpop.eup %1652 }
 0x3b1   :  { %v304_v9 = vadd.f32 1.0, %v1653_v8  ;;  %v1655_v10 = vpop.eup %1654 }
 0x3b2   :  { %v384_v11 = vadd.f32 1.0, %v1655_v10 }
 0x3b3   :  { %1656 = vrcp.f32 %v304_v9 }
 0x3b4   :  { %1658 = vrcp.f32 %v384_v11 }
 0x3bd   :  { %v1657_v12 = vpop.eup %1656 }
 0x3be   :  { %v1659_v15 = vpop.eup %1658  ;;  %v308_v18 = vmul.f32 %v1657_v12, %v1891_v39  ;;  %v1453_v39 = vld [vmem:[%s2264_s1 + $0xa] sm:$0x3] }
 0x3bf   :  { %v388_v21 = vmul.f32 %v1659_v15, %v1894_v42 }
 0x41e   :  { %v311_v13 = vpop.permute.xlu0 %310 }
 0x41f   :  { %v313_v14 = vmul.f32 %v1657_v12, %v311_v13 }
 0x421   :  { %315 = vrot.lane.b32.xlu0 %v313_v14, %s1762_s25 }
 0x422   :  { %v391_v16 = vpop.permute.xlu1 %390 }
 0x423   :  { %v393_v17 = vmul.f32 %v1659_v15, %v391_v16 }
 0x425   :  { %395 = vrot.lane.b32.xlu1 %v393_v17, %s1762_s25  ;;  %v1457_v17 = vld [vmem:[%s2263_s0 + $0x6] sm:$0x3] }
 0x493   :  { %v316_v19 = vpop.permute.xlu0 %315 }
 0x494   :  { %v1930_v20 = vadd.f32 %v316_v19, %v308_v18 }
 0x496   :  { %1660 = vtanh.f32 %v1930_v20 }
 0x497   :  { %v396_v22 = vpop.permute.xlu1 %395 }
 0x498   :  { %v1934_v23 = vadd.f32 %v396_v22, %v388_v21  ;;  %v1461_v22 = vld [vmem:[%s2264_s1 + $0x8] sm:$0x3] }
 0x49a   :  { %1662 = vtanh.f32 %v1934_v23 }
 0x4a0   :  { %v1661_v24 = vpop.eup %1660 }
 0x4a1   :  { %321 = vrot.lane.b32.xlu0 %v1661_v24, %s1764_s12 }
 0x4a4   :  { %v1663_v25 = vpop.eup %1662 }
 0x4a5   :  { %401 = vrot.lane.b32.xlu1 %v1663_v25, %s1764_s12 }
 0x513   :  { %v322_v26 = vpop.permute.xlu0 %321 }
 0x514   :  { %v1939_v27 = vmul.f32 %v1657_v12, %v322_v26 }
 0x516   :  { %v413_v28 = vpack.c.bf16 %v1939_v27, %v1939_v27 }
 0x517   :  { %v402_v29 = vpop.permute.xlu1 %401 }
 0x518   :  { %v1943_v30 = vmul.f32 %v1659_v15, %v402_v29  ;;  %415 = vrot.lane.b32.xlu0 %v413_v28, %s1765_s13 }
 0x51a   :  { %v493_v31 = vpack.c.bf16 %v1943_v30, %v1943_v30 }
 0x51c   :  { %495 = vrot.lane.b32.xlu1 %v493_v31, %s1765_s13 }
 0x58a   :  { %v416_v32 = vpop.permute.xlu0 %415 }
 0x58b   :  { %1554 = vmatmul.mubr.msk.bf16.vlgmr.msra.gmra.mrb[8].mxu0 %vm85_vm2, %v416_v32 }
 0x58c   :  { %1564 = vmatpush3.bf16.msra.mxu0 %v1821_v1  ;;  %1565 = vmatprep.mubr.msk.bf16.mxu0 %vm1761_vm1, %v1760_v0 }
 0x58d   :  { %1575 = vmatprep.subr.bf16.mxu0 %v1760_v0 }
 0x58e   :  { %v496_v33 = vpop.permute.xlu1 %495 }
 0x58f   :  { %1560 = vmatmul.mubr.msk.bf16.vlgmr.msra.gmra.mrb[8].mxu1 %vm85_vm2, %v496_v33 }
 0x590   :  { %1570 = vmatpush3.bf16.msra.mxu1 %v1847_v2  ;;  %1571 = vmatprep.mubr.msk.bf16.mxu1 %vm1761_vm1, %v1760_v0 }
 0x591   :  { %1581 = vmatprep.subr.bf16.mxu1 %v1760_v0 }
 0x65e   :  { %v454_v35 = vpop.f32.mrb[8].mxu0 }
 0x65f   :  { %v460_v36 = vadd.f32 %v1449_v34, %v454_v35  ;;  %v1555_v37 = vpop.f32.mrb[9].mxu0 }
 0x660   :  { %v457_v38 = vpop.f32.mrb[10].mxu0 }
 0x661   :  { %1664 = vtanh.f32 %v460_v36  ;;  %v1556_v40 = vpop.f32.mrb[11].mxu0  ;;  %v1451_v50 = vmul.f32 -1.442695, %v460_v36 }
 0x662   :  { %v534_v41 = vpop.f32.mrb[8].mxu1 }
 0x663   :  { %v540_v42 = vadd.f32 %v1453_v39, %v534_v41  ;;  %v1561_v43 = vpop.f32.mrb[9].mxu1 }
 0x664   :  { %v537_v44 = vpop.f32.mrb[10].mxu1 }
 0x665   :  { %1666 = vtanh.f32 %v540_v42  ;;  %v1562_v45 = vpop.f32.mrb[11].mxu1  ;;  %v1455_v51 = vmul.f32 -1.442695, %v540_v42 }
 0x666   :  { %1668 = vpow2.f32 %v1451_v50 }
 0x667   :  { %1670 = vpow2.f32 %v1455_v51 }
 0x66b   :  { %v1665_v47 = vpop.eup %1664 }
 0x66c   :  { %470 = vrot.lane.b32.xlu0 %v1665_v47, %s1763_s11 }
 0x66f   :  { %v1667_v48 = vpop.eup %1666 }
 0x670   :  { %550 = vrot.lane.b32.xlu1 %v1667_v48, %s1763_s11  ;;  %v1669_v52 = vpop.eup %1668 }
 0x671   :  { %v464_v53 = vadd.f32 1.0, %v1669_v52  ;;  %v1671_v54 = vpop.eup %1670 }
 0x672   :  { %v544_v55 = vadd.f32 1.0, %v1671_v54 }
 0x673   :  { %1672 = vrcp.f32 %v464_v53 }
 0x674   :  { %1674 = vrcp.f32 %v544_v55 }
 0x67d   :  { %v1673_v56 = vpop.eup %1672 }
 0x67e   :  { %v1675_v59 = vpop.eup %1674  ;;  %v468_v62 = vmul.f32 %v1673_v56, %v1930_v20 }
 0x67f   :  { %v548_v4 = vmul.f32 %v1675_v59, %v1934_v23 }
 0x6de   :  { %v471_v57 = vpop.permute.xlu0 %470 }
 0x6df   :  { %v473_v58 = vmul.f32 %v1673_v56, %v471_v57 }
 0x6e1   :  { %475 = vrot.lane.b32.xlu0 %v473_v58, %s1762_s25 }
 0x6e2   :  { %v551_v60 = vpop.permute.xlu1 %550 }
 0x6e3   :  { %v553_v61 = vmul.f32 %v1675_v59, %v551_v60 }
 0x6e5   :  { %555 = vrot.lane.b32.xlu1 %v553_v61, %s1762_s25 }
 0x753   :  { %v476_v63 = vpop.permute.xlu0 %475 }
 0x754   :  { %v1970_v3 = vadd.f32 %v476_v63, %v468_v62  ;;  %v1465_v63 = vld [vmem:[%s2263_s0 + $0x8] sm:$0x3] }
 0x756   :  { %1676 = vtanh.f32 %v1970_v3 }
 0x757   :  { %v556_v5 = vpop.permute.xlu1 %555 }
 0x758   :  { %v1974_v6 = vadd.f32 %v556_v5, %v548_v4 }
 0x75a   :  { %1678 = vtanh.f32 %v1974_v6 }
 0x760   :  { %v1677_v7 = vpop.eup %1676 }
 0x761   :  { %481 = vrot.lane.b32.xlu0 %v1677_v7, %s1764_s12  ;;  %v1469_v7 = vld [vmem:[%s2264_s1 + $0x6] sm:$0x3] }
 0x764   :  { %v1679_v8 = vpop.eup %1678 }
 0x765   :  { %561 = vrot.lane.b32.xlu1 %v1679_v8, %s1764_s12 }
 0x7d3   :  { %v482_v9 = vpop.permute.xlu0 %481 }
 0x7d4   :  { %v1979_v10 = vmul.f32 %v1673_v56, %v482_v9 }
 0x7d6   :  { %v573_v11 = vpack.c.bf16 %v1979_v10, %v1979_v10 }
 0x7d7   :  { %v562_v12 = vpop.permute.xlu1 %561 }
 0x7d8   :  { %v1983_v13 = vmul.f32 %v1675_v59, %v562_v12  ;;  %575 = vrot.lane.b32.xlu0 %v573_v11, %s1765_s13 }
 0x7da   :  { %v653_v14 = vpack.c.bf16 %v1983_v13, %v1983_v13 }
 0x7dc   :  { %655 = vrot.lane.b32.xlu1 %v653_v14, %s1765_s13 }
 0x84a   :  { %v576_v15 = vpop.permute.xlu0 %575 }
 0x84b   :  { %1566 = vmatmul.mubr.msk.bf16.vlgmr.msra.gmra.mrb[12].mxu0 %vm85_vm2, %v576_v15 }
 0x84c   :  { %1576 = vmatpush3.bf16.msra.mxu0 %v1821_v1  ;;  %1577 = vmatprep.mubr.msk.bf16.mxu0 %vm1761_vm1, %v1760_v0 }
 0x84d   :  { %1587 = vmatprep.subr.bf16.mxu0 %v1760_v0 }
 0x84e   :  { %v656_v16 = vpop.permute.xlu1 %655 }
 0x84f   :  { %1572 = vmatmul.mubr.msk.bf16.vlgmr.msra.gmra.mrb[12].mxu1 %vm85_vm2, %v656_v16 }
 0x850   :  { %1582 = vmatpush3.bf16.msra.mxu1 %v1847_v2  ;;  %1583 = vmatprep.mubr.msk.bf16.mxu1 %vm1761_vm1, %v1760_v0 }
 0x851   :  { %1593 = vmatprep.subr.bf16.mxu1 %v1760_v0 }
 0x91e   :  { %v614_v18 = vpop.f32.mrb[12].mxu0 }
 0x91f   :  { %v620_v19 = vadd.f32 %v1457_v17, %v614_v18  ;;  %v1567_v20 = vpop.f32.mrb[13].mxu0 }
 0x920   :  { %v617_v21 = vpop.f32.mrb[14].mxu0 }
 0x921   :  { %1680 = vtanh.f32 %v620_v19  ;;  %v1568_v23 = vpop.f32.mrb[15].mxu0  ;;  %v1459_v33 = vmul.f32 -1.442695, %v620_v19 }
 0x922   :  { %v694_v24 = vpop.f32.mrb[12].mxu1 }
 0x923   :  { %v700_v25 = vadd.f32 %v1461_v22, %v694_v24  ;;  %v1573_v26 = vpop.f32.mrb[13].mxu1 }
 0x924   :  { %v697_v28 = vpop.f32.mrb[14].mxu1 }
 0x925   :  { %1682 = vtanh.f32 %v700_v25  ;;  %v1574_v29 = vpop.f32.mrb[15].mxu1  ;;  %v1463_v34 = vmul.f32 -1.442695, %v700_v25 }
 0x926   :  { %1684 = vpow2.f32 %v1459_v33 }
 0x927   :  { %1686 = vpow2.f32 %v1463_v34 }
 0x92b   :  { %v1681_v31 = vpop.eup %1680 }
 0x92c   :  { %630 = vrot.lane.b32.xlu0 %v1681_v31, %s1763_s11 }
 0x92f   :  { %v1683_v32 = vpop.eup %1682 }
 0x930   :  { %710 = vrot.lane.b32.xlu1 %v1683_v32, %s1763_s11  ;;  %v1685_v35 = vpop.eup %1684 }
 0x931   :  { %v624_v36 = vadd.f32 1.0, %v1685_v35  ;;  %v1687_v37 = vpop.eup %1686 }
 0x932   :  { %v704_v38 = vadd.f32 1.0, %v1687_v37 }
 0x933   :  { %1688 = vrcp.f32 %v624_v36 }
 0x934   :  { %1690 = vrcp.f32 %v704_v38 }
 0x93d   :  { %v1689_v39 = vpop.eup %1688 }
 0x93e   :  { %v1691_v42 = vpop.eup %1690  ;;  %v628_v45 = vmul.f32 %v1689_v39, %v1970_v3 }
 0x93f   :  { %v708_v50 = vmul.f32 %v1691_v42, %v1974_v6 }
 0x99e   :  { %v631_v40 = vpop.permute.xlu0 %630 }
 0x99f   :  { %v633_v41 = vmul.f32 %v1689_v39, %v631_v40 }
 0x9a1   :  { %635 = vrot.lane.b32.xlu0 %v633_v41, %s1762_s25 }
 0x9a2   :  { %v711_v43 = vpop.permute.xlu1 %710 }
 0x9a3   :  { %v713_v44 = vmul.f32 %v1691_v42, %v711_v43 }
 0x9a5   :  { %715 = vrot.lane.b32.xlu1 %v713_v44, %s1762_s25 }
 0xa13   :  { %v636_v47 = vpop.permute.xlu0 %635 }
 0xa14   :  { %v2010_v48 = vadd.f32 %v636_v47, %v628_v45 }
 0xa16   :  { %1692 = vtanh.f32 %v2010_v48 }
 0xa17   :  { %v716_v51 = vpop.permute.xlu1 %715 }
 0xa18   :  { %v2014_v52 = vadd.f32 %v716_v51, %v708_v50  ;;  %v1473_v50 = vld [vmem:[%s2263_s0 + $0xa] sm:$0x3] }
 0xa1a   :  { %1694 = vtanh.f32 %v2014_v52 }
 0xa20   :  { %v1693_v53 = vpop.eup %1692 }
 0xa21   :  { %641 = vrot.lane.b32.xlu0 %v1693_v53, %s1764_s12 }
 0xa24   :  { %v1695_v54 = vpop.eup %1694 }
 0xa25   :  { %721 = vrot.lane.b32.xlu1 %v1695_v54, %s1764_s12 }
 0xa93   :  { %v642_v55 = vpop.permute.xlu0 %641 }
 0xa94   :  { %v2019_v56 = vmul.f32 %v1689_v39, %v642_v55  ;;  %v1477_v55 = vld [vmem:[%s2264_s1 + $0x4] sm:$0x3] }
 0xa96   :  { %v733_v57 = vpack.c.bf16 %v2019_v56, %v2019_v56 }
 0xa97   :  { %v722_v58 = vpop.permute.xlu1 %721 }
 0xa98   :  { %v2023_v59 = vmul.f32 %v1691_v42, %v722_v58  ;;  %735 = vrot.lane.b32.xlu0 %v733_v57, %s1765_s13 }
 0xa9a   :  { %v813_v60 = vpack.c.bf16 %v2023_v59, %v2023_v59 }
 0xa9c   :  { %815 = vrot.lane.b32.xlu1 %v813_v60, %s1765_s13 }
 0xb0a   :  { %v736_v61 = vpop.permute.xlu0 %735 }
 0xb0b   :  { %1578 = vmatmul.mubr.msk.bf16.vlgmr.msra.gmra.mrb[16].mxu0 %vm85_vm2, %v736_v61 }
 0xb0c   :  { %1588 = vmatpush3.bf16.msra.mxu0 %v1821_v1  ;;  %1589 = vmatprep.mubr.msk.bf16.mxu0 %vm1761_vm1, %v1760_v0 }
 0xb0d   :  { %1599 = vmatprep.subr.bf16.mxu0 %v1760_v0 }
 0xb0e   :  { %v816_v62 = vpop.permute.xlu1 %815 }
 0xb0f   :  { %1584 = vmatmul.mubr.msk.bf16.vlgmr.msra.gmra.mrb[16].mxu1 %vm85_vm2, %v816_v62 }
 0xb10   :  { %1594 = vmatpush3.bf16.msra.mxu1 %v1847_v2  ;;  %1595 = vmatprep.mubr.msk.bf16.mxu1 %vm1761_vm1, %v1760_v0 }
 0xb11   :  { %1605 = vmatprep.subr.bf16.mxu1 %v1760_v0 }
 0xbde   :  { %v774_v3 = vpop.f32.mrb[16].mxu0 }
 0xbdf   :  { %v780_v4 = vadd.f32 %v1465_v63, %v774_v3  ;;  %v1579_v5 = vpop.f32.mrb[17].mxu0 }
 0xbe0   :  { %v777_v6 = vpop.f32.mrb[18].mxu0 }
 0xbe1   :  { %1696 = vtanh.f32 %v780_v4  ;;  %v1580_v8 = vpop.f32.mrb[19].mxu0  ;;  %v1467_v18 = vmul.f32 -1.442695, %v780_v4 }
 0xbe2   :  { %v854_v9 = vpop.f32.mrb[16].mxu1 }
 0xbe3   :  { %v860_v11 = vadd.f32 %v1469_v7, %v854_v9  ;;  %v1585_v12 = vpop.f32.mrb[17].mxu1 }
 0xbe4   :  { %v857_v14 = vpop.f32.mrb[18].mxu1 }
 0xbe5   :  { %1698 = vtanh.f32 %v860_v11  ;;  %v1586_v15 = vpop.f32.mrb[19].mxu1  ;;  %v1471_v19 = vmul.f32 -1.442695, %v860_v11 }
 0xbe6   :  { %1700 = vpow2.f32 %v1467_v18 }
 0xbe7   :  { %1702 = vpow2.f32 %v1471_v19 }
 0xbeb   :  { %v1697_v16 = vpop.eup %1696 }
 0xbec   :  { %790 = vrot.lane.b32.xlu0 %v1697_v16, %s1763_s11 }
 0xbef   :  { %v1699_v17 = vpop.eup %1698 }
 0xbf0   :  { %870 = vrot.lane.b32.xlu1 %v1699_v17, %s1763_s11  ;;  %v1701_v20 = vpop.eup %1700 }
 0xbf1   :  { %v784_v21 = vadd.f32 1.0, %v1701_v20  ;;  %v1703_v22 = vpop.eup %1702 }
 0xbf2   :  { %v864_v23 = vadd.f32 1.0, %v1703_v22 }
 0xbf3   :  { %1704 = vrcp.f32 %v784_v21 }
 0xbf4   :  { %1706 = vrcp.f32 %v864_v23 }
 0xbfd   :  { %v1705_v24 = vpop.eup %1704 }
 0xbfe   :  { %v1707_v28 = vpop.eup %1706  ;;  %v788_v32 = vmul.f32 %v1705_v24, %v2010_v48 }
 0xbff   :  { %v868_v35 = vmul.f32 %v1707_v28, %v2014_v52 }
 0xc5e   :  { %v791_v25 = vpop.permute.xlu0 %790 }
 0xc5f   :  { %v793_v26 = vmul.f32 %v1705_v24, %v791_v25 }
 0xc61   :  { %795 = vrot.lane.b32.xlu0 %v793_v26, %s1762_s25 }
 0xc62   :  { %v871_v29 = vpop.permute.xlu1 %870 }
 0xc63   :  { %v873_v31 = vmul.f32 %v1707_v28, %v871_v29 }
 0xc65   :  { %875 = vrot.lane.b32.xlu1 %v873_v31, %s1762_s25 }
 0xcd3   :  { %v796_v33 = vpop.permute.xlu0 %795 }
 0xcd4   :  { %v2050_v34 = vadd.f32 %v796_v33, %v788_v32 }
 0xcd6   :  { %1708 = vtanh.f32 %v2050_v34 }
 0xcd7   :  { %v876_v36 = vpop.permute.xlu1 %875 }
 0xcd8   :  { %v2054_v37 = vadd.f32 %v876_v36, %v868_v35 }
 0xcda   :  { %1710 = vtanh.f32 %v2054_v37 }
 0xce0   :  { %v1709_v38 = vpop.eup %1708 }
 0xce1   :  { %801 = vrot.lane.b32.xlu0 %v1709_v38, %s1764_s12 }
 0xce4   :  { %v1711_v39 = vpop.eup %1710 }
 0xce5   :  { %881 = vrot.lane.b32.xlu1 %v1711_v39, %s1764_s12 }
 0xd53   :  { %v802_v40 = vpop.permute.xlu0 %801 }
 0xd54   :  { %v2059_v41 = vmul.f32 %v1705_v24, %v802_v40 }
 0xd56   :  { %v893_v42 = vpack.c.bf16 %v2059_v41, %v2059_v41 }
 0xd57   :  { %v882_v43 = vpop.permute.xlu1 %881 }
 0xd58   :  { %v2063_v44 = vmul.f32 %v1707_v28, %v882_v43  ;;  %895 = vrot.lane.b32.xlu0 %v893_v42, %s1765_s13 }
 0xd5a   :  { %v973_v45 = vpack.c.bf16 %v2063_v44, %v2063_v44 }
 0xd5c   :  { %975 = vrot.lane.b32.xlu1 %v973_v45, %s1765_s13 }
 0xdca   :  { %v896_v47 = vpop.permute.xlu0 %895 }
 0xdcb   :  { %1590 = vmatmul.mubr.msk.bf16.vlgmr.msra.gmra.mrb[20].mxu0 %vm85_vm2, %v896_v47 }
 0xdcc   :  { %1600 = vmatpush3.bf16.msra.mxu0 %v1821_v1  ;;  %1601 = vmatprep.mubr.msk.bf16.mxu0 %vm1761_vm1, %v1760_v0 }
 0xdcd   :  { %1611 = vmatprep.subr.bf16.mxu0 %v1760_v0 }
 0xdce   :  { %v976_v48 = vpop.permute.xlu1 %975 }
 0xdcf   :  { %1596 = vmatmul.mubr.msk.bf16.vlgmr.msra.gmra.mrb[20].mxu1 %vm85_vm2, %v976_v48 }
 0xdd0   :  { %1606 = vmatpush3.bf16.msra.mxu1 %v1847_v2  ;;  %1607 = vmatprep.mubr.msk.bf16.mxu1 %vm1761_vm1, %v1760_v0 }
 0xdd1   :  { %1617 = vmatprep.subr.bf16.mxu1 %v1760_v0 }
 0xe9e   :  { %v934_v51 = vpop.f32.mrb[20].mxu0 }
 0xe9f   :  { %v940_v52 = vadd.f32 %v1473_v50, %v934_v51  ;;  %v1591_v53 = vpop.f32.mrb[21].mxu0 }
 0xea0   :  { %v937_v54 = vpop.f32.mrb[22].mxu0 }
 0xea1   :  { %1712 = vtanh.f32 %v940_v52  ;;  %v1592_v57 = vpop.f32.mrb[23].mxu0  ;;  %v1475_v5 = vmul.f32 -1.442695, %v940_v52 }
 0xea2   :  { %v1014_v58 = vpop.f32.mrb[20].mxu1 }
 0xea3   :  { %v1020_v60 = vadd.f32 %v1477_v55, %v1014_v58  ;;  %v1597_v61 = vpop.f32.mrb[21].mxu1 }
 0xea4   :  { %v1017_v62 = vpop.f32.mrb[22].mxu1 }
 0xea5   :  { %1714 = vtanh.f32 %v1020_v60  ;;  %v1598_v63 = vpop.f32.mrb[23].mxu1  ;;  %v1479_v6 = vmul.f32 -1.442695, %v1020_v60 }
 0xea6   :  { %1716 = vpow2.f32 %v1475_v5 }
 0xea7   :  { %1718 = vpow2.f32 %v1479_v6 }
 0xeab   :  { %v1713_v3 = vpop.eup %1712 }
 0xeac   :  { %950 = vrot.lane.b32.xlu0 %v1713_v3, %s1763_s11 }
 0xeaf   :  { %v1715_v4 = vpop.eup %1714 }
 0xeb0   :  { %1030 = vrot.lane.b32.xlu1 %v1715_v4, %s1763_s11  ;;  %v1717_v7 = vpop.eup %1716 }
 0xeb1   :  { %v944_v8 = vadd.f32 1.0, %v1717_v7  ;;  %v1719_v9 = vpop.eup %1718 }
 0xeb2   :  { %v1024_v11 = vadd.f32 1.0, %v1719_v9 }
 0xeb3   :  { %1720 = vrcp.f32 %v944_v8 }
 0xeb4   :  { %1722 = vrcp.f32 %v1024_v11 }
 0xebd   :  { %v1721_v12 = vpop.eup %1720 }
 0xebe   :  { %v1723_v16 = vpop.eup %1722  ;;  %v948_v19 = vmul.f32 %v1721_v12, %v2050_v34 }
 0xebf   :  { %v1028_v22 = vmul.f32 %v1723_v16, %v2054_v37  ;;  %v1481_v37 = vld [vmem:[%s2263_s0 + $0xc] sm:$0x3] }
 0xf1e   :  { %v951_v14 = vpop.permute.xlu0 %950 }
 0xf1f   :  { %v953_v15 = vmul.f32 %v1721_v12, %v951_v14 }
 0xf21   :  { %955 = vrot.lane.b32.xlu0 %v953_v15, %s1762_s25 }
 0xf22   :  { %v1031_v17 = vpop.permute.xlu1 %1030 }
 0xf23   :  { %v1033_v18 = vmul.f32 %v1723_v16, %v1031_v17 }
 0xf25   :  { %1035 = vrot.lane.b32.xlu1 %v1033_v18, %s1762_s25 }
 0xf93   :  { %v956_v20 = vpop.permute.xlu0 %955 }
 0xf94   :  { %v958_v21 = vadd.f32 %v956_v20, %v948_v19 }
 0xf96   :  { %1724 = vtanh.f32 %v958_v21 }
 0xf97   :  { %v1036_v23 = vpop.permute.xlu1 %1035 }
 0xf98   :  { %v1038_v24 = vadd.f32 %v1036_v23, %v1028_v22  ;;  %v1489_v23 = vld [vmem:[%s2263_s0 + $0xe] sm:$0x3] }
 0xf9a   :  { %1726 = vtanh.f32 %v1038_v24 }
 0xfa0   :  { %v1725_v25 = vpop.eup %1724 }
 0xfa1   :  { %961 = vrot.lane.b32.xlu0 %v1725_v25, %s1764_s12 }
 0xfa4   :  { %v1727_v26 = vpop.eup %1726 }
 0xfa5   :  { %1041 = vrot.lane.b32.xlu1 %v1727_v26, %s1764_s12 }
0x1013   :  { %v962_v28 = vpop.permute.xlu0 %961 }
0x1014   :  { %v2093_v29 = vmul.f32 %v1721_v12, %v962_v28 }
0x1016   :  { %v1053_v31 = vpack.c.bf16 %v2093_v29, %v2093_v29 }
0x1017   :  { %v1042_v32 = vpop.permute.xlu1 %1041 }
0x1018   :  { %v2097_v33 = vmul.f32 %v1723_v16, %v1042_v32  ;;  %1055 = vrot.lane.b32.xlu0 %v1053_v31, %s1765_s13  ;;  %v1291_v31 = vld [vmem:[%s2264_s1] sm:$0x3] }
0x101a   :  { %v1133_v34 = vpack.c.bf16 %v2097_v33, %v2097_v33 }
0x101c   :  { %1135 = vrot.lane.b32.xlu1 %v1133_v34, %s1765_s13 }
0x108a   :  { %v1056_v35 = vpop.permute.xlu0 %1055 }
0x108b   :  { %1602 = vmatmul.mubr.msk.bf16.vlgmr.msra.gmra.mrb[24].mxu0 %vm85_vm2, %v1056_v35 }
0x108c   :  { %1612 = vmatpush3.bf16.msra.mxu0 %v1821_v1  ;;  %1613 = vmatprep.mubr.msk.bf16.mxu0 %vm1761_vm1, %v1760_v0  ;;  %v1485_v1 = vld [vmem:[%s2264_s1 + $0x2] sm:$0x3] }
0x108e   :  { %v1136_v36 = vpop.permute.xlu1 %1135 }
0x108f   :  { %1608 = vmatmul.mubr.msk.bf16.vlgmr.msra.gmra.mrb[24].mxu1 %vm85_vm2, %v1136_v36 }
0x1090   :  { %1618 = vmatpush3.bf16.msra.mxu1 %v1847_v2  ;;  %1619 = vmatprep.mubr.msk.bf16.mxu1 %vm1761_vm1, %v1760_v0 }
0x115e   :  { %v1094_v38 = vpop.f32.mrb[24].mxu0 }
0x115f   :  { %v1100_v39 = vadd.f32 %v1481_v37, %v1094_v38  ;;  %v1603_v40 = vpop.f32.mrb[25].mxu0 }
0x1160   :  { %v1097_v42 = vpop.f32.mrb[26].mxu0 }
0x1161   :  { %1728 = vtanh.f32 %v1100_v39  ;;  %v1604_v43 = vpop.f32.mrb[27].mxu0  ;;  %v1483_v52 = vmul.f32 -1.442695, %v1100_v39 }
0x1162   :  { %v1174_v45 = vpop.f32.mrb[24].mxu1 }
0x1163   :  { %v1180_v47 = vadd.f32 %v1485_v1, %v1174_v45  ;;  %v1609_v2 = vpop.f32.mrb[25].mxu1 }
0x1164   :  { %v1177_v48 = vpop.f32.mrb[26].mxu1 }
0x1165   :  { %1730 = vtanh.f32 %v1180_v47  ;;  %v1610_v0 = vpop.f32.mrb[27].mxu1  ;;  %v1487_v53 = vmul.f32 -1.442695, %v1180_v47 }
0x1166   :  { %1732 = vpow2.f32 %v1483_v52 }
0x1167   :  { %1734 = vpow2.f32 %v1487_v53 }
0x116b   :  { %v1729_v50 = vpop.eup %1728 }
0x116c   :  { %1110 = vrot.lane.b32.xlu0 %v1729_v50, %s1763_s11 }
0x116f   :  { %v1731_v51 = vpop.eup %1730 }
0x1170   :  { %1190 = vrot.lane.b32.xlu1 %v1731_v51, %s1763_s11  ;;  %v1733_v54 = vpop.eup %1732 }
0x1171   :  { %v1104_v55 = vadd.f32 1.0, %v1733_v54  ;;  %v1735_v57 = vpop.eup %1734 }
0x1172   :  { %v1184_v58 = vadd.f32 1.0, %v1735_v57 }
0x1173   :  { %1736 = vrcp.f32 %v1104_v55 }
0x1174   :  { %1738 = vrcp.f32 %v1184_v58 }
0x117d   :  { %v1737_v60 = vpop.eup %1736 }
0x117e   :  { %v1739_v63 = vpop.eup %1738  ;;  %v1108_v5 = vmul.f32 %v1737_v60, %v958_v21 }
0x117f   :  { %v1188_v8 = vmul.f32 %v1739_v63, %v1038_v24 }
0x11de   :  { %v1111_v61 = vpop.permute.xlu0 %1110 }
0x11df   :  { %v1113_v62 = vmul.f32 %v1737_v60, %v1111_v61 }
0x11e1   :  { %1115 = vrot.lane.b32.xlu0 %v1113_v62, %s1762_s25 }
0x11e2   :  { %v1191_v3 = vpop.permute.xlu1 %1190 }
0x11e3   :  { %v1193_v4 = vmul.f32 %v1739_v63, %v1191_v3 }
0x11e5   :  { %1195 = vrot.lane.b32.xlu1 %v1193_v4, %s1762_s25 }
0x1253   :  { %v1116_v6 = vpop.permute.xlu0 %1115 }
0x1254   :  { %v1118_v7 = vadd.f32 %v1116_v6, %v1108_v5 }
0x1256   :  { %1740 = vtanh.f32 %v1118_v7 }
0x1257   :  { %v1196_v9 = vpop.permute.xlu1 %1195 }
0x1258   :  { %v1198_v11 = vadd.f32 %v1196_v9, %v1188_v8 }
0x125a   :  { %1742 = vtanh.f32 %v1198_v11 }
0x1260   :  { %v1741_v12 = vpop.eup %1740 }
0x1261   :  { %1121 = vrot.lane.b32.xlu0 %v1741_v12, %s1764_s12 }
0x1264   :  { %v1743_v14 = vpop.eup %1742 }
0x1265   :  { %1201 = vrot.lane.b32.xlu1 %v1743_v14, %s1764_s12 }
0x12d3   :  { %v1122_v15 = vpop.permute.xlu0 %1121 }
0x12d4   :  { %v2123_v16 = vmul.f32 %v1737_v60, %v1122_v15 }
0x12d6   :  { %v1213_v17 = vpack.c.bf16 %v2123_v16, %v2123_v16 }
0x12d7   :  { %v1202_v18 = vpop.permute.xlu1 %1201 }
0x12d8   :  { %v2127_v19 = vmul.f32 %v1739_v63, %v1202_v18  ;;  %1215 = vrot.lane.b32.xlu0 %v1213_v17, %s1765_s13 }
0x12da   :  { %v1292_v20 = vpack.c.bf16 %v2127_v19, %v2127_v19 }
0x12dc   :  { %1294 = vrot.lane.b32.xlu1 %v1292_v20, %s1765_s13 }
0x134a   :  { %v1216_v21 = vpop.permute.xlu0 %1215 }
0x134b   :  { %1614 = vmatmul.mubr.msk.bf16.vlgmr.msra.gmra.mrb[28].mxu0 %vm85_vm2, %v1216_v21 }
0x134e   :  { %v1295_v22 = vpop.permute.xlu1 %1294 }
0x134f   :  { %1620 = vmatmul.mubr.msk.bf16.vlgmr.msra.gmra.mrb[28].mxu1 %vm85_vm2, %v1295_v22 }
0x141e   :  { %v1254_v24 = vpop.f32.mrb[28].mxu0 }
0x141f   :  { %v1260_v25 = vadd.f32 %v1489_v23, %v1254_v24  ;;  %v1615_v26 = vpop.f32.mrb[29].mxu0 }
0x1420   :  { %v1257_v28 = vpop.f32.mrb[30].mxu0 }
0x1421   :  { %1744 = vtanh.f32 %v1260_v25  ;;  %v1616_v32 = vpop.f32.mrb[31].mxu0  ;;  %v1491_v42 = vmul.f32 -1.442695, %v1260_v25 }
0x1422   :  { %v1333_v34 = vpop.f32.mrb[28].mxu1 }
0x1423   :  { %v1339_v35 = vadd.f32 %v1333_v34, %v1291_v31  ;;  %v1621_v36 = vpop.f32.mrb[29].mxu1 }
0x1424   :  { %v1336_v37 = vpop.f32.mrb[30].mxu1 }
0x1425   :  { %1746 = vtanh.f32 %v1339_v35  ;;  %v1622_v38 = vpop.f32.mrb[31].mxu1  ;;  %v1494_v1 = vmul.f32 -1.442695, %v1339_v35 }
0x1426   :  { %1748 = vpow2.f32 %v1491_v42 }
0x1427   :  { %1750 = vpow2.f32 %v1494_v1 }
0x142b   :  { %v1745_v39 = vpop.eup %1744 }
0x142c   :  { %1270 = vrot.lane.b32.xlu0 %v1745_v39, %s1763_s11 }
0x142f   :  { %v1747_v40 = vpop.eup %1746 }
0x1430   :  { %1349 = vrot.lane.b32.xlu1 %v1747_v40, %s1763_s11  ;;  %v1749_v43 = vpop.eup %1748 }
0x1431   :  { %v1264_v45 = vadd.f32 1.0, %v1749_v43  ;;  %v1751_v47 = vpop.eup %1750 }
0x1432   :  { %v1343_v2 = vadd.f32 1.0, %v1751_v47 }
0x1433   :  { %1752 = vrcp.f32 %v1264_v45 }
0x1434   :  { %1754 = vrcp.f32 %v1343_v2 }
0x143d   :  { %v1753_v48 = vpop.eup %1752 }
0x143e   :  { %v1755_v51 = vpop.eup %1754  ;;  %v1268_v54 = vmul.f32 %v1753_v48, %v1118_v7 }
0x143f   :  { %v1347_v58 = vmul.f32 %v1755_v51, %v1198_v11 }
0x149e   :  { %v1271_v0 = vpop.permute.xlu0 %1270 }
0x149f   :  { %v1273_v50 = vmul.f32 %v1753_v48, %v1271_v0 }
0x14a1   :  { %1275 = vrot.lane.b32.xlu0 %v1273_v50, %s1762_s25 }
0x14a2   :  { %v1350_v52 = vpop.permute.xlu1 %1349 }
0x14a3   :  { %v1352_v53 = vmul.f32 %v1755_v51, %v1350_v52 }
0x14a5   :  { %1354 = vrot.lane.b32.xlu1 %v1352_v53, %s1762_s25  ;;  %s1766_s25 = smov 112  }
0x1513   :  { %v1276_v55 = vpop.permute.xlu0 %1275 }
0x1514   :  { %v1278_v57 = vadd.f32 %v1276_v55, %v1268_v54 }
0x1516   :  { %1756 = vtanh.f32 %v1278_v57 }
0x1517   :  { %v1355_v60 = vpop.permute.xlu1 %1354 }
0x1518   :  { %v1357_v61 = vadd.f32 %v1355_v60, %v1347_v58 }
0x151a   :  { %1758 = vtanh.f32 %v1357_v61 }
0x1520   :  { %v1757_v62 = vpop.eup %1756 }
0x1521   :  { %1281 = vrot.lane.b32.xlu0 %v1757_v62, %s1764_s12 }
0x1524   :  { %v1759_v63 = vpop.eup %1758 }
0x1525   :  { %1360 = vrot.lane.b32.xlu1 %v1759_v63, %s1764_s12  ;;  %159 = vrot.lane.b32.xlu0 %v1899_v46, %s1765_s13 }
0x1529   :  { %246 = vrot.lane.b32.xlu1 %v1903_v49, %s1765_s13  ;;  %326 = vrot.lane.b32.xlu0 %v1939_v27, %s1765_s13 }
0x152d   :  { %406 = vrot.lane.b32.xlu1 %v1943_v30, %s1765_s13  ;;  %486 = vrot.lane.b32.xlu0 %v1979_v10, %s1765_s13 }
0x1531   :  { %566 = vrot.lane.b32.xlu1 %v1983_v13, %s1765_s13  ;;  %646 = vrot.lane.b32.xlu0 %v2019_v56, %s1765_s13 }
0x1535   :  { %726 = vrot.lane.b32.xlu1 %v2023_v59, %s1765_s13  ;;  %806 = vrot.lane.b32.xlu0 %v2059_v41, %s1765_s13 }
0x1539   :  { %886 = vrot.lane.b32.xlu1 %v2063_v44, %s1765_s13  ;;  %966 = vrot.lane.b32.xlu0 %v2093_v29, %s1765_s13 }
0x153d   :  { %1046 = vrot.lane.b32.xlu1 %v2097_v33, %s1765_s13  ;;  %1126 = vrot.lane.b32.xlu0 %v2123_v16, %s1765_s13 }
0x1541   :  { %1206 = vrot.lane.b32.xlu1 %v2127_v19, %s1765_s13 }
0x1593   :  { %v1282_v46 = vpop.permute.xlu0 %1281 }
0x1594   :  { %v1284_v49 = vmul.f32 %v1753_v48, %v1282_v46 }
0x1596   :  { %1286 = vrot.lane.b32.xlu0 %v1284_v49, %s1765_s13 }
0x1597   :  { %v1361_v27 = vpop.permute.xlu1 %1360  ;;  %v160_v30 = vpop.permute.xlu0 %159 }
0x1598   :  { %v1363_v10 = vmul.f32 %v1755_v51, %v1361_v27  ;;  %163 = vst.msk [vmem:[%s2265_s4] sm:$0x3] %vm64_vm0, %v160_v30 }
0x159a   :  { %1365 = vrot.lane.b32.xlu1 %v1363_v10, %s1765_s13  ;;  %1371 = vrot.lane.b32.xlu0 %v1278_v57, %s1766_s25 }
0x159b   :  { %v247_v13 = vpop.permute.xlu1 %246  ;;  %v327_v56 = vpop.permute.xlu0 %326 }
0x159c   :  { %1440 = vst.msk [vmem:[%s2266_s5 + $0xe] sm:$0x3] %vm64_vm0, %v247_v13  ;;  %1444 = vst.msk [vmem:[%s2265_s4 + $0x2] sm:$0x3] %vm64_vm0, %v327_v56 }
0x159e   :  { %1377 = vrot.lane.b32.xlu1 %v1357_v61, %s1766_s25 }
0x159f   :  { %v407_v59 = vpop.permute.xlu1 %406  ;;  %v487_v41 = vpop.permute.xlu0 %486 }
0x15a0   :  { %1448 = vst.msk [vmem:[%s2266_s5 + $0xc] sm:$0x3] %vm64_vm0, %v407_v59  ;;  %1452 = vst.msk [vmem:[%s2265_s4 + $0x4] sm:$0x3] %vm64_vm0, %v487_v41 }
0x15a3   :  { %v567_v44 = vpop.permute.xlu1 %566  ;;  %v647_v29 = vpop.permute.xlu0 %646 }
0x15a4   :  { %1456 = vst.msk [vmem:[%s2266_s5 + $0xa] sm:$0x3] %vm64_vm0, %v567_v44  ;;  %1460 = vst.msk [vmem:[%s2265_s4 + $0x6] sm:$0x3] %vm64_vm0, %v647_v29 }
0x15a7   :  { %v727_v33 = vpop.permute.xlu1 %726  ;;  %v807_v3 = vpop.permute.xlu0 %806 }
0x15a8   :  { %1464 = vst.msk [vmem:[%s2266_s5 + $0x8] sm:$0x3] %vm64_vm0, %v727_v33  ;;  %1468 = vst.msk [vmem:[%s2265_s4 + $0x8] sm:$0x3] %vm64_vm0, %v807_v3 }
0x15ab   :  { %v887_v4 = vpop.permute.xlu1 %886  ;;  %v967_v5 = vpop.permute.xlu0 %966 }
0x15ac   :  { %1472 = vst.msk [vmem:[%s2266_s5 + $0x6] sm:$0x3] %vm64_vm0, %v887_v4  ;;  %1476 = vst.msk [vmem:[%s2265_s4 + $0xa] sm:$0x3] %vm64_vm0, %v967_v5 }
0x15af   :  { %v1047_v6 = vpop.permute.xlu1 %1046  ;;  %v1127_v7 = vpop.permute.xlu0 %1126 }
0x15b0   :  { %1480 = vst.msk [vmem:[%s2266_s5 + $0x4] sm:$0x3] %vm64_vm0, %v1047_v6  ;;  %1484 = vst.msk [vmem:[%s2265_s4 + $0xc] sm:$0x3] %vm64_vm0, %v1127_v7 }
0x15b3   :  { %v1207_v8 = vpop.permute.xlu1 %1206 }
0x15b4   :  { %1488 = vst.msk [vmem:[%s2266_s5 + $0x2] sm:$0x3] %vm64_vm0, %v1207_v8 }
0x1608   :  { %v1287_v9 = vpop.permute.xlu0 %1286 }
0x1609   :  { %1492 = vst.msk [vmem:[%s2265_s4 + $0xe] sm:$0x3] %vm64_vm0, %v1287_v9  ;;  %1369 = vst.msk [vmem:[%s2259_s6] sm:$0x3] %vm64_vm0, %v1287_v9 }
0x160c   :  { %v1366_v11 = vpop.permute.xlu1 %1365  ;;  %v1372_v12 = vpop.permute.xlu0 %1371 }
0x160d   :  { %1368 = vst.msk [vmem:[%s2266_s5] sm:$0x3] %vm64_vm0, %v1366_v11  ;;  %1375 = vst.msk [vmem:[%s2260_s8] sm:$0x3] %vm64_vm0, %v1366_v11 }
0x160e   :  { %1374 = vst.msk [vmem:[%s2261_s7] sm:$0x3] %vm64_vm0, %v1372_v12 }
0x1610   :  { %v1378_v14 = vpop.permute.xlu1 %1377 }
0x1611   :  { %1380 = vst.msk [vmem:[%s2262_s9] sm:$0x3] %vm64_vm0, %v1378_v14 }

// kernel: run_model.19
= control target key start
LH: loop header
LB: loop body
LE: loop exit
PB: predicated region body
PF: predicated region fallthrough
CT: control target
= control target key end

     0   :  { %v126_v0 = vmov 0.0   ;;  %vm127_vm0 = vmmov 0   ;;  %vm35_vm1 = vcmask 130048   ;;  %vm79_vm2 = vcmask 408576   ;;  %s172_s2 = inlined_call_operand.vmem [shape: bf16[16,50], index: 2, kind: input, shape index: {}]   ;;  %s173_s0 = inlined_call_operand.vmem [shape: f32[8,16], index: 0, kind: input, shape index: {}]   ;;  %s174_s3 = inlined_call_operand.vmem [shape: f32[1,50], index: 3, kind: input, shape index: {}]   ;;  %s175_s1 = inlined_call_operand.vmem [shape: f32[8,1], index: 1, kind: input, shape index: {}]   ;;  %s176_s4 = inlined_call_operand.vmem [shape: f32[8,53], index: 4, kind: output, shape index: {}]  }
   0x1   :  { %110 = vmatprep.subr.bf16.mxu0 %v126_v0  ;;  %v121_v1 = vld [vmem:[%s172_s2] sm:$0xff]   ;;  %112 = vmatprep.mubr.msk.bf16.mxu0 %vm127_vm0, %v126_v0  ;;  %v128_v11 = vmov 0   ;;  %vm99_vm3 = vcmask 433152  }
   0x2   :  { %v18_v2 = vld [vmem:[%s173_s0] sm:$0xff]  ;;  %111 = vmatpush3.bf16.msra.mxu0 %v121_v1  ;;  %119 = vset.pattern.permute.xlu1 %v128_v11 }
   0x3   :  { %v19_v3 = vpack.c.bf16 %v18_v2, %v18_v2  ;;  %v105_v4 = vld [vmem:[%s174_s3] ss:$0 sm:$0xff]  ;;  %120 = vset.pattern.permute.xlu0 %v128_v11 }
   0x4   :  { %v91_v12 = vld [vmem:[%s175_s1] sm:$0xff] }
   0x5   :  { %113 = vmatmul.mubr.msk.bf16.vlgmr.msra.gmra.mrb[0].mxu0 %vm35_vm1, %v19_v3  ;;  %94 = vperm.xlu1 %119, %v91_v12  }
  0x84   :  { %v95_v20 = vpop.permute.xlu1 %94 }
  0xd8   :  { %v73_v5 = vpop.f32.mrb[0].mxu0 }
  0xd9   :  { %v74_v6 = vadd.f32 %v105_v4, %v73_v5  ;;  %v114_v7 = vpop.f32.mrb[1].mxu0 }
  0xda   :  { %v76_v8 = vpop.f32.mrb[2].mxu0 }
  0xdb   :  { %v115_v9 = vpop.f32.mrb[3].mxu0  ;;  %v80_v10 = vsel %vm79_vm2, %v74_v6, -inf }
  0xdc   :  { %81 = vmax.xlane.f32.xlu0 %v80_v10 }
 0x169   :  { %v82_v13 = vpop.xlane.xlu0 %81 }
 0x16a   :  { %v83_v14 = vsub.f32 %v74_v6, %v82_v13 }
 0x16c   :  { %v84_v15 = vmul.f32 1.442695, %v83_v14 }
 0x16e   :  { %122 = vpow2.f32 %v84_v15 }
 0x178   :  { %v123_v16 = vpop.eup %122 }
 0x179   :  { %v86_v17 = vsel %vm79_vm2, %v123_v16, 0.0 }
 0x17a   :  { %87 = vadd.xlane.f32.xlu0 %v86_v17 }
 0x207   :  { %v88_v18 = vpop.xlane.xlu0 %87 }
 0x208   :  { %124 = vrcp.f32 %v88_v18 }
 0x212   :  { %v125_v19 = vpop.eup %124 }
 0x213   :  { %v90_v21 = vmul.f32 %v125_v19, %v123_v16 }
 0x215   :  { %v97_v22 = vmul.f32 %v95_v20, %v90_v21 }
 0x217   :  { %v98_v23 = vsel %vm79_vm2, %v97_v22, 0.0 }
 0x218   :  { %100 = vst.msk [vmem:[%s176_s4] sm:$0xff] %vm99_vm3, %v98_v23 }

// kernel: run_model.18
= control target key start
LH: loop header
LB: loop body
LE: loop exit
PB: predicated region body
PF: predicated region fallthrough
CT: control target
= control target key end

     0   :  { %s1491_s24 = smov 0   ;;  %s1668_s0 = inlined_call_operand.vmem [shape: f32[4,2,64], index: 0, kind: input, shape index: {}]   ;;  %s1669_s1 = inlined_call_operand.vmem [shape: f32[4,2,1], index: 1, kind: input, shape index: {}]   ;;  %s1670_s2 = inlined_call_operand.vmem [shape: f32[2,16], index: 2, kind: input, shape index: {}]   ;;  %s1671_s3 = inlined_call_operand.vmem [shape: f32[2,16], index: 3, kind: input, shape index: {}]   ;;  %s1672_s4 = inlined_call_operand.vmem [shape: bf16[16,64], index: 4, kind: input, shape index: {}]   ;;  %s1673_s5 = inlined_call_operand.vmem [shape: f32[2,8,16], index: 5, kind: input, shape index: {}]   ;;  %s1674_s6 = inlined_call_operand.vmem [shape: f32[2,8,32], index: 6, kind: input, shape index: {}]   ;;  %s1675_s7 = inlined_call_operand.vmem [shape: f32[1,16], index: 7, kind: input, shape index: {}]   ;;  %s1676_s8 = inlined_call_operand.vmem [shape: f32[2,8], index: 8, kind: input, shape index: {}]   ;;  %s1677_s9 = inlined_call_operand.vmem [shape: bf16[16,17], index: 9, kind: input, shape index: {}]   ;;  %s1678_s10 = inlined_call_operand.vmem [shape: bf16[16,17], index: 10, kind: input, shape index: {}]   ;;  %s1679_s11 = inlined_call_operand.vmem [shape: f32[1,17], index: 11, kind: input, shape index: {}]   ;;  %s1680_s12 = inlined_call_operand.vmem [shape: bf16[16,17], index: 12, kind: input, shape index: {}]   ;;  %s1681_s13 = inlined_call_operand.vmem [shape: bf16[32,17], index: 13, kind: input, shape index: {}]   ;;  %s1682_s14 = inlined_call_operand.vmem [shape: f32[1,17], index: 14, kind: input, shape index: {}]   ;;  %s1683_s15 = inlined_call_operand.vmem [shape: f32[4,2,16], index: 15, kind: output, shape index: {0}]   ;;  %s1684_s16 = inlined_call_operand.vmem [shape: f32[4,2,8], index: 16, kind: output, shape index: {1}]   ;;  %s1685_s17 = inlined_call_operand.vmem [shape: f32[4,2,1], index: 17, kind: output, shape index: {2}]  }
   0x1   :  { %1689 = sst [smem:[#allocation5_spill]] %s1668_s0 }
   0x2   :  { %1690 = sst [smem:[#allocation6_spill]] %s1669_s1 }
   0x3   :  { %1691 = sst [smem:[#allocation7_spill]] %s1674_s6 }
   0x4   :  { %1692 = sst [smem:[#allocation8_spill]] %s1681_s13 }
   0x5   :  { %1693 = sst [smem:[#allocation9_spill]] %s1682_s14 }
   0x6 LB: > { %1694 = sst [smem:[#allocation4_spill]] %s1390_s24  ;;  %s1263_s25 = sadd.s32 4294967295, %s1390_s24   ;;  %s1390_s24 = sphi %s1491_s24, %s28_s24  }
   0x7   : > { %p1267_p0 = scmp.ge.s32.totalorder %s1390_s24, 1  ;;  %p500_p1 = scmp.lt.s32.totalorder %s1390_s24, 5 }
   0x9   : > { %p501_p2 = pnand %p1267_p0, %p500_p1 }
   0xa   : > { %p562_p3 = scmp.lt.s32.totalorder (!%p501_p2), %s1263_s25, 3  ;;  %s1695_s0 = sld [smem:[#allocation5_spill]] (!%p501_p2) }
   0xb   : > { %504 = sbr.rel (%p501_p2) target bundleno = 2090 (0x82a), region = 80  ;;  %s1696_s1 = sld [smem:[#allocation6_spill]] (!%p501_p2) }
   0xc   : > { %p1273_p4 = scmp.ne.s32.totalorder (!%p501_p2), %s1263_s25, 0 }
  0x12   : > { %s563_s26 = scalar_select %p562_p3, %s1263_s25, 3 }
  0x13   : > { %586 = sbr.rel (%p1273_p4) target bundleno = 26 (0x1a), region = 84  ;;  %v587_v0 = vld [vmem:[%s1670_s2] sm:$0x3] (!%p1273_p4)  ;;  %vm588_vm0 = vcmask (!%p1273_p4), 123904  }
  0x14   : > { %s1499_s27 = sshll.u32 %s563_s26, 1  ;;  %v590_v1 = vld [vmem:[%s1671_s3] sm:$0x3] (!%p1273_p4)  ;;  %589 = vst.msk [vmem:[#allocation2] sm:$0x3] (!%p1273_p4), %vm588_vm0, %v587_v0 }
  0x15   : > { %s565_s30 = scalar_lea.vmem %s1695_s0, %s1499_s27  ;;  %s569_s20 = scalar_lea.vmem %s1696_s1, %s1499_s27  ;;  %591 = vst.msk [vmem:[#allocation3] sm:$0x3] (!%p1273_p4), %vm588_vm0, %v590_v1 }
  0x16   : > { %s573_s23 = scalar_lea.vmem %s1683_s15, %s1499_s27  ;;  %s577_s14 = scalar_lea.vmem %s1684_s16, %s1499_s27 }
  0x17   : > { %s581_s28 = scalar_lea.vmem %s1685_s17, %s1499_s27 }
  0x1a PF: > { %v1354_v2 = vld [vmem:[%s1672_s4] sm:$0xff]   ;;  %v1392_v3 = vmov 0.0   ;;  %vm603_vm1 = vcmask 130048   ;;  %vm1393_vm2 = vmmov 0   ;;  %s1394_s6 = smov 96   ;;  %s1395_s13 = smov 16   ;;  %v812_v40 = vlaneseq }
  0x1b   : > { %1303 = vmatprep.subr.bf16.mxu0 %v1392_v3  ;;  %v593_v4 = vld [vmem:[#allocation2] sm:$0x3]  ;;  %1309 = vmatprep.subr.bf16.mxu1 %v1392_v3  ;;  %s1396_s21 = smov 112   ;;  %s1397_s29 = smov 32   ;;  %v1399_v38 = vmov 1966171168  }
  0x1c   : > { %1304 = vmatpush3.bf16.msra.mxu0 %v1354_v2  ;;  %1305 = vmatprep.mubr.msk.bf16.mxu0 %vm1393_vm2, %v1392_v3  ;;  %v594_v5 = vpack.c.bf16 %v593_v4, %v593_v4  ;;  %v592_v6 = vld [vmem:[%s565_s30] sm:$0x3]  ;;  %v648_v13 = vld [vmem:[#allocation3] sm:$0x3]  ;;  %s1398_s0 = smov 80   ;;  %v810_v39 = vunpack.c.l.s4 %v1399_v38  ;;  %v813_v42 = vshrl.u32 %v812_v40, 7 }
  0x1d   : > { %1311 = vmatprep.mubr.msk.bf16.mxu1 %vm1393_vm2, %v1392_v3  ;;  %1315 = vmatprep.subr.bf16.mxu0 %v1392_v3  ;;  %v1355_v20 = vld [vmem:[%s1678_s10] sm:$0xff]   ;;  %v807_v60 = vld [vmem:[%s1673_s5 + $0x8] sm:$0xff]  ;;  %vm872_vm3 = vcmask 1041409   ;;  %vm875_vm4 = vcmask 58368   ;;  %s1698_s22 = sld [smem:[#allocation8_spill]]  ;;  %s1699_s18 = sld [smem:[#allocation7_spill]] }
  0x1e   : > { %1310 = vmatpush3.bf16.msra.mxu1 %v1355_v20  ;;  %v1356_v26 = vld [vmem:[%s1677_s9] sm:$0xff]   ;;  %v811_v41 = vunpack.c.0.s8 %v810_v39  ;;  %v1577_v52 = vsub.s32 0, %v813_v42  ;;  %vm967_vm5 = vcmask 261120   ;;  %vm681_vm6 = vcmask 123904   ;;  %s1700_s25 = sld [smem:[#allocation9_spill]] }
  0x1f   : > { %1306 = vmatmul.mubr.msk.bf16.vlgmr.msra.gmra.mrb[0].mxu0 %vm603_vm1, %v594_v5  ;;  %1321 = vmatprep.subr.bf16.mxu1 %v1392_v3  ;;  %v1357_v32 = vld [vmem:[%s1680_s12] sm:$0xff]   ;;  %vm1134_vm7 = vcmask 1024  }
  0x20   : > { %1317 = vmatprep.mubr.msk.bf16.mxu0 %vm1393_vm2, %v1392_v3  ;;  %1316 = vmatpush3.bf16.msra.mxu0 %v1356_v26  ;;  %v1281_v44 = vld [vmem:[%s1679_s11] ss:$0 sm:$0xff]  ;;  %v814_v46 = vsub.s32 %v811_v41, %v813_v42 }
  0x21   : > { %1329 = vmatprep.subr.bf16.mxu0 %v1392_v3  ;;  %v806_v55 = vld [vmem:[%s1673_s5] sm:$0xff] }
  0x22   : > { %v1282_v2 = vld [vmem:[%s1675_s7] ss:$0 sm:$0xff] }
  0xf2   : > { %v641_v7 = vpop.f32.mrb[0].mxu0 }
  0xf3   : > { %v647_v8 = vadd.f32 %v641_v7, %v592_v6  ;;  %v1307_v9 = vpop.f32.mrb[1].mxu0 }
  0xf4   : > { %v644_v10 = vpop.f32.mrb[2].mxu0 }
  0xf5   : > { %1360 = vtanh.f32 %v647_v8  ;;  %v1308_v11 = vpop.f32.mrb[3].mxu0  ;;  %v1276_v14 = vmul.f32 -1.442695, %v647_v8  ;;  %v886_v10 = vsub.s32 1, %v813_v42 }
  0xf6   : > { %v896_v11 = vld [vmem:[%s1676_s8] sm:$0x3] }
  0xf7   : > { %1362 = vpow2.f32 %v1276_v14 }
  0xff   : > { %v1361_v12 = vpop.eup %1360 }
 0x100   : > { %662 = vrot.lane.b32.xlu0 %v1361_v12, %s1394_s6  ;;  %v908_v12 = vrot.slane %v896_v11, %v886_v10 }
 0x101   : > { %v1363_v15 = vpop.eup %1362 }
 0x102   : > { %v652_v16 = vadd.f32 1.0, %v1363_v15 }
 0x104   : > { %657 = vrot.lane.b32.xlu0 %v648_v13, %s1395_s13  ;;  %1364 = vrcp.f32 %v652_v16  ;;  %v863_v13 = vand.u32 127, %v812_v40 }
 0x106   : > { %v1597_v14 = vsub.s32 %v863_v13, %v813_v42 }
 0x10e   : > { %v1365_v17 = vpop.eup %1364 }
 0x172   : > { %v663_v18 = vpop.permute.xlu0 %662 }
 0x173   : > { %v665_v19 = vmul.f32 %v1365_v17, %v663_v18 }
 0x175   : > { %667 = vrot.lane.b32.xlu1 %v665_v19, %s1395_s13 }
 0x176   : > { %v658_v21 = vpop.permute.xlu0 %657 }
 0x177   : > { %v660_v22 = vmul.f32 %v1365_v17, %v658_v21  ;;  %v901_v21 = vrot.slane %v896_v11, %v1577_v52 }
 0x1e7   : > { %v668_v23 = vpop.permute.xlu1 %667 }
 0x1e8   : > { %v1546_v24 = vadd.f32 %v668_v23, %v660_v22  ;;  %v1400_v22 = vmov 0  }
 0x1e9   : > { %1353 = vset.pattern.permute.xlu0 %v1400_v22  ;;  %1352 = vset.pattern.permute.xlu1 %v1400_v22 }
 0x1ea   : > { %1366 = vtanh.f32 %v1546_v24  ;;  %v689_v25 = vpack.c.bf16 %v1546_v24, %v1546_v24 }
 0x1ec   : > { %695 = vrot.lane.b32.xlu0 %v689_v25, %s1396_s21 }
 0x1f4   : > { %v1367_v27 = vpop.eup %1366 }
 0x1f5   : > { %673 = vrot.lane.b32.xlu1 %v1367_v27, %s1397_s29 }
 0x25e   : > { %v696_v28 = vpop.permute.xlu0 %695 }
 0x25f   : > { %1312 = vmatmul.mubr.msk.bf16.vlgmr.msra.gmra.mrb[0].mxu1 %vm603_vm1, %v696_v28 }
 0x260   : > { %1325 = vmatprep.mubr.msk.bf16.mxu1 %vm1393_vm2, %v1392_v3 }
 0x267   : > { %v674_v29 = vpop.permute.xlu1 %673 }
 0x268   : > { %v1559_v30 = vmul.f32 %v1365_v17, %v674_v29 }
 0x26a   : > { %v688_v31 = vpack.c.bf16 %v1559_v30, %v1559_v30 }
 0x26c   : > { %747 = vrot.lane.b32.xlu1 %v688_v31, %s1398_s0 }
 0x2de   : > { %v748_v33 = vpop.permute.xlu1 %747 }
 0x2df   : > { %1318 = vmatmul.mubr.msk.bf16.vlgmr.msra.gmra.mrb[4].mxu0 %vm603_vm1, %v748_v33 }
 0x2e0   : > { %1330 = vmatpush3.bf16.msra.mxu0 %v1357_v32  ;;  %1331 = vmatprep.mubr.msk.bf16.mxu0 %vm1393_vm2, %v1392_v3 }
 0x2e7   : > { %1332 = vmatmul.mubr.msk.bf16.vlgmr.msra.gmra.mrb[8].mxu0 %vm603_vm1, %v748_v33 }
 0x332   : > { %v740_v34 = vpop.f32.mrb[0].mxu1 }
 0x333   : > { %v1313_v35 = vpop.f32.mrb[1].mxu1 }
 0x334   : > { %v743_v36 = vpop.f32.mrb[2].mxu1 }
 0x335   : > { %v1314_v37 = vpop.f32.mrb[3].mxu1 }
 0x3b2   : > { %v792_v43 = vpop.f32.mrb[4].mxu0 }
 0x3b3   : > { %v793_v45 = vadd.f32 %v792_v43, %v740_v34  ;;  %v1319_v47 = vpop.f32.mrb[5].mxu0 }
 0x3b4   : > { %v795_v48 = vpop.f32.mrb[6].mxu0 }
 0x3b5   : > { %v1574_v49 = vadd.f32 %v1281_v44, %v793_v45  ;;  %v1320_v50 = vpop.f32.mrb[7].mxu0 }
 0x3b7   : > { %v815_v51 = vrot.slane %v1574_v49, %v814_v46 }
 0x3b9   : > { %v816_v53 = vcombine.high %v815_v51, %v815_v51  ;;  %v823_v54 = vrot.slane %v815_v51, %v814_v46 }
 0x3ba   : > { %v1582_v56 = vpop.f32.mrb[8].mxu0 }
 0x3bb   : > { %v830_v57 = vrot.slane %v816_v53, %v814_v46  ;;  %v834_v58 = vrot.slane %v823_v54, %v1577_v52  ;;  %v1333_v59 = vpop.f32.mrb[9].mxu0  ;;  %v1118_v54 = vld [vmem:[%s569_s20] sm:$0x3] }
 0x3bc   : > { %v1094_v61 = vpop.f32.mrb[10].mxu0 }
 0x3bd   : > { %v838_v62 = vrot.slane %v830_v57, %v1577_v52  ;;  %v841_v63 = vadd.f32 %v834_v58, %v806_v55  ;;  %v1334_v0 = vpop.f32.mrb[11].mxu0  ;;  %v1359_v55 = vld [vmem:[%s1698_s22 + $0x8] sm:$0xff]   ;;  %v953_v57 = vld [vmem:[%s1699_s18] sm:$0xff] }
 0x3be   : > { %v954_v58 = vld [vmem:[%s1699_s18 + $0x8] sm:$0xff] }
 0x3bf   : > { %v842_v1 = vadd.f32 %v838_v62, %v807_v60  ;;  %1368 = vtanh.f32 %v841_v63 }
 0x3c1   : > { %1370 = vtanh.f32 %v842_v1 }
 0x3c9   : > { %v1369_v4 = vpop.eup %1368 }
 0x3ca   : > { %v852_v5 = vmul.f32 %v1369_v4, %v1282_v2 }
 0x3cb   : > { %v1371_v6 = vpop.eup %1370 }
 0x3cc   : > { %v854_v7 = vsel %vm603_vm1, %v852_v5, 0.0  ;;  %v853_v8 = vmul.f32 %v1371_v6, %v1282_v2 }
 0x3cd   : > { %855 = vadd.xlane.f32.xlu0 %v854_v7 }
 0x3ce   : > { %v857_v9 = vsel %vm603_vm1, %v853_v8, 0.0 }
 0x3cf   : > { %858 = vadd.xlane.f32.xlu1 %v857_v9 }
 0x3e0   : > { %910 = vbcast.lane.b32.xlu1 %v908_v12, 256 }
 0x45a   : > { %v856_v15 = vpop.xlane.xlu0 %855 }
 0x45b   : > { %v867_v17 = vrot.slane %v856_v15, %v1597_v14 }
 0x45c   : > { %v859_v16 = vpop.xlane.xlu1 %858 }
 0x45d   : > { %v871_v18 = vrot.slane %v859_v16, %v1597_v14 }
 0x45f   : > { %v873_v19 = vsel %vm872_vm3, %v871_v18, %v867_v17 }
 0x460   : > { %v876_v20 = vsel %vm875_vm4, %v873_v19, -inf  ;;  %v911_v33 = vpop.permute.xlu1 %910 }
 0x461   : > { %877 = vmax.xlane.f32.xlu0 %v876_v20 }
 0x477   : > { %903 = vbcast.lane.b32.xlu0 %v901_v21, 256 }
 0x4ee   : > { %v878_v23 = vpop.xlane.xlu0 %877 }
 0x4ef   : > { %v883_v25 = vrot.slane %v878_v23, %v1577_v52  ;;  %v887_v26 = vrot.slane %v878_v23, %v886_v10 }
 0x4f1   : > { %v890_v27 = vsub.f32 %v856_v15, %v883_v25  ;;  %v891_v28 = vsub.f32 %v859_v16, %v887_v26  ;;  %v1288_v25 = vld [vmem:[%s1700_s25] ss:$0 sm:$0xff] }
 0x4f2   : > { %v904_v32 = vpop.permute.xlu0 %903 }
 0x4f3   : > { %v892_v29 = vmul.f32 1.442695, %v890_v27  ;;  %v894_v31 = vmul.f32 1.442695, %v891_v28 }
 0x4f5   : > { %1372 = vpow2.f32 %v892_v29 }
 0x4f6   : > { %1374 = vpow2.f32 %v894_v31 }
 0x4ff   : > { %v1373_v34 = vpop.eup %1372 }
 0x500   : > { %v1375_v35 = vpop.eup %1374  ;;  %v914_v36 = vmul.f32 %v1373_v34, %v904_v32 }
 0x501   : > { %v915_v37 = vmul.f32 %v1375_v35, %v911_v33 }
 0x502   : > { %919 = vperm.xlu1 %1352, %v914_v36  }
 0x503   : > { %922 = vperm.xlu0 %1353, %v915_v37  }
 0x581   : > { %v920_v38 = vpop.permute.xlu1 %919 }
 0x582   : > { %v923_v39 = vpop.permute.xlu0 %922  ;;  %v927_v40 = vrot.slane %v920_v38, %v1597_v14 }
 0x583   : > { %v931_v41 = vrot.slane %v923_v39, %v1597_v14 }
 0x585   : > { %v932_v42 = vsel %vm872_vm3, %v931_v41, %v927_v40 }
 0x586   : > { %v934_v43 = vsel %vm875_vm4, %v932_v42, 0.0 }
 0x587   : > { %935 = vadd.xlane.f32.xlu1 %v934_v43 }
 0x614   : > { %v936_v44 = vpop.xlane.xlu1 %935 }
 0x615   : > { %v937_v45 = vmax.f32 %v936_v44, 1e-09 }
 0x617   : > { %v942_v46 = vrot.slane %v937_v45, %v1577_v52  ;;  %v946_v47 = vrot.slane %v937_v45, %v886_v10  ;;  %v1358_v52 = vld [vmem:[%s1698_s22] sm:$0xff]  }
 0x618   : > { %1322 = vmatpush3.bf16.msra.mxu1 %v1358_v52 }
 0x619   : > { %1376 = vrcp.f32 %v942_v46  ;;  %1323 = vmatprep.subr.bf16.mxu1 %v1392_v3 }
 0x61a   : > { %1378 = vrcp.f32 %v946_v47 }
 0x61c   : > { %1324 = vmatpush3.bf16.msra.mxu1 %v1359_v55 }
 0x623   : > { %v1377_v48 = vpop.eup %1376 }
 0x624   : > { %v950_v50 = vmul.f32 %v1377_v48, %v914_v36  ;;  %v1379_v51 = vpop.eup %1378 }
 0x625   : > { %v952_v53 = vmul.f32 %v1379_v51, %v915_v37 }
 0x626   : > { %957 = vperm.xlu0 %1353, %v950_v50  }
 0x62a   : > { %962 = vperm.xlu0 %1353, %v952_v53  }
 0x62e   : > { %1120 = vrot.lane.b32.xlu0 %v1118_v54, %s1395_s13 }
 0x632   : > { %678 = vrot.lane.b32.xlu0 %v1559_v30, %s1398_s0 }
 0x636   : > { %684 = vrot.lane.b32.xlu0 %v1546_v24, %s1396_s21 }
 0x6a5   : > { %v958_v30 = vpop.permute.xlu0 %957 }
 0x6a6   : > { %v965_v24 = vmul.f32 %v958_v30, %v953_v57  ;;  %v1109_v61 = vrot.slane %v958_v30, %v1597_v14 }
 0x6a8   : > { %v968_v59 = vsel %vm967_vm5, %v965_v24, 0.0 }
 0x6a9   : > { %v969_v3 = vrot.slane %v968_v59, 4  ;;  %v963_v60 = vpop.permute.xlu0 %962 }
 0x6aa   : > { %v966_v62 = vmul.f32 %v963_v60, %v954_v58  ;;  %v1113_v63 = vrot.slane %v963_v60, %v1597_v14 }
 0x6ab   : > { %v970_v0 = vadd.f32 %v969_v3, %v968_v59 }
 0x6ac   : > { %v975_v1 = vsel %vm967_vm5, %v966_v62, 0.0  ;;  %v1114_v2 = vsel %vm872_vm3, %v1113_v63, %v1109_v61 }
 0x6ad   : > { %v971_v4 = vrot.slane %v970_v0, 2  ;;  %v976_v5 = vrot.slane %v975_v1, 4  ;;  %1116 = vst.msk [vmem:[%s577_s14] sm:$0x3] %vm875_vm4, %v1114_v2  ;;  %v1121_v6 = vpop.permute.xlu0 %1120 }
 0x6af   : > { %v972_v7 = vadd.f32 %v971_v4, %v970_v0  ;;  %v977_v8 = vadd.f32 %v976_v5, %v975_v1 }
 0x6b1   : > { %v973_v9 = vrot.slane %v972_v7, 1  ;;  %v978_v10 = vrot.slane %v977_v8, 2  ;;  %v679_v11 = vpop.permute.xlu0 %678 }
 0x6b2   : > { %682 = vst.msk [vmem:[#allocation2] sm:$0x3] %vm681_vm6, %v679_v11 }
 0x6b3   : > { %v974_v12 = vadd.f32 %v973_v9, %v972_v7  ;;  %v979_v13 = vadd.f32 %v978_v10, %v977_v8 }
 0x6b5   : > { %v980_v14 = vrot.slane %v979_v13, 1  ;;  %v685_v15 = vpop.permute.xlu0 %684  ;;  %v984_v16 = vpack.c.bf16 %v974_v12, %v974_v12 }
 0x6b6   : > { %687 = vst.msk [vmem:[#allocation3] sm:$0x3] %vm681_vm6, %v685_v15 }
 0x6b7   : > { %v981_v17 = vadd.f32 %v980_v14, %v979_v13  ;;  %v992_v19 = vunpack.c.l.b16 %v984_v16 }
 0x6b9   : > { %v985_v18 = vpack.c.bf16 %v981_v17, %v981_v17 }
 0x6bb   : > { %v993_v20 = vunpack.c.l.b16 %v985_v18 }
 0x6bd   : > { %v994_v21 = vsel %vm872_vm3, %v993_v20, %v992_v19 }
 0x6be   : > { %v995_v22 = vpack.c.b16 %v994_v21, %v994_v21 }
 0x6c0   : > { %1326 = vmatmul.mubr.msk.bf16.vlgmr.msra.gmra.mrb[4].mxu1 %vm967_vm5, %v995_v22 }
 0x793   : > { %v1045_v23 = vpop.f32.mrb[4].mxu1 }
 0x794   : > { %v1092_v26 = vadd.f32 %v1582_v56, %v1045_v23  ;;  %v1327_v27 = vpop.f32.mrb[5].mxu1 }
 0x795   : > { %v1048_v28 = vpop.f32.mrb[6].mxu1 }
 0x796   : > { %v1104_v29 = vadd.f32 %v1288_v25, %v1092_v26  ;;  %v1328_v31 = vpop.f32.mrb[7].mxu1 }
 0x798   : > { %1105 = vst.msk [vmem:[%s573_s23] sm:$0x3] %vm681_vm6, %v1104_v29  ;;  %v1117_v32 = vadd.f32 %v1104_v29, %v1574_v49 }
 0x79a   : > { %v1123_v33 = vadd.f32 %v1121_v6, %v1117_v32 }
 0x79c   : > { %v1289_v34 = vmul.f32 -1.442695, %v1123_v33 }
 0x79e   : > { %1380 = vpow2.f32 %v1289_v34 }
 0x7a8   : > { %v1381_v35 = vpop.eup %1380 }
 0x7a9   : > { %v1127_v36 = vadd.f32 1.0, %v1381_v35 }
 0x7ab   : > { %1382 = vrcp.f32 %v1127_v36 }
 0x7b5   : > { %v1383_v56 = vpop.eup %1382 }
 0x7b6   : > { %1131 = vrot.lane.b32.xlu0 %v1383_v56, %s1396_s21 }
 0x828   : > { %v1132_v37 = vpop.permute.xlu0 %1131 }
 0x829   : > { %1135 = vst.msk [vmem:[%s581_s28] sm:$0x3] %vm1134_vm7, %v1132_v37 }
 0x82a PF: > { %s1701_s23 = sld [smem:[#allocation4_spill]] }
 0x830   : > { %s28_s24 = sadd.s32 1, %s1701_s23  }
 0x831   : > { %p25_p5 = scmp.ge.s32.totalorder %s28_s24, 6  }
 0x833   :  { %27 = sbr.rel (!%p25_p5) target bundleno = 6 (0x6), region = 141 }

</bundles_post_ra>
